<compile_context>
chip_gen: v5e
topology: v5e:2x2
jax: 0.10.0
libtpu: 0.0.40
codegen_flags: <defaults>
</compile_context>

<pallas_src>
import functools
import math

import jax
import jax.numpy as jnp
from jax import lax
from jax.experimental import pallas as pl
from jax.experimental.pallas import tpu as pltpu


def _vmem_spec():
    # Whole-array-resident-in-VMEM spec (demo shapes are tiny; no tiling needed).
    # TODO(synk): for large graphs (N in the thousands, especially on v7x's
    # 64 MiB VMEM) the adjacency needs a row-tiled grid (parallel across
    # TensorCores) and/or a bf16 A_hat; at demo scale a gridless VMEM-resident
    # kernel wins.
    return pl.BlockSpec(memory_space=pltpu.MemorySpace.VMEM)


def _log_softmax_rows(x):
    m = jnp.max(x, axis=1, keepdims=True)
    s = x - m
    return s - jnp.log(jnp.sum(jnp.exp(s), axis=1, keepdims=True))


def airgnn_kernel(x_ref, w1t_ref, b1_ref, w2t_ref, b2_ref, adj_ref, o_ref,
                  *, K, alpha, lo_rank, hi_rank, frac):
    # ---- fused 2-layer MLP (dropout == identity in eval mode) ----
    h = jnp.dot(x_ref[...], w1t_ref[...], preferred_element_type=jnp.float32)
    h = jnp.maximum(h + b1_ref[...], 0.0)
    hh = jnp.dot(h, w2t_ref[...], preferred_element_type=jnp.float32) + b2_ref[...]

    # hh never changes across the K propagation steps -> hoist its log-softmax.
    ls_hh = _log_softmax_rows(hh)

    adj = adj_ref[...]                         # load A_hat from VMEM once
    n, c = hh.shape
    ones_c = jnp.ones((1, c), dtype=jnp.float32)
    # Loop-invariant diagonal mask: forces the self-comparison in the rank
    # counting to always count, independent of MXU/VPU summation-order ULPs.
    row_ids = lax.broadcasted_iota(jnp.int32, (n, n), 0)
    col_ids = lax.broadcasted_iota(jnp.int32, (n, n), 1)
    self_pair = row_ids == col_ids

    def step(_, xk):
        # y = A_hat @ x    (gamma * 2 * (1 - lambda_amp) == 1 cancels lambda_amp)
        y = jnp.dot(adj, xk, preferred_element_type=jnp.float32)
        ls_y = _log_softmax_rows(y)
        # KLDivLoss(reduction='none', log_target=True)(ls_hh, ls_y).sum(dim=1)
        kl_elem = jnp.exp(ls_y) * (ls_y - ls_hh)
        kl = jnp.sum(kl_elem, axis=1, keepdims=True)                    # (N, 1)

        # ---- exact torch.quantile(kl, 0.9), 'linear' interpolation ----
        # Lane-dense (1, N) mirror of kl via an MXU 'NT' contraction
        # (contract the class axis of kl_elem with a ones row -> no relayout).
        kl_row = lax.dot_general(ones_c, kl_elem, (((1,), (1,)), ((), ())),
                                 preferred_element_type=jnp.float32)    # (1, N)
        # counts[i] = #{ j : kl[j] <= kl[i] }   (diagonal pinned to 1)
        cmp = jnp.where(self_pair, 1.0, (kl_row <= kl).astype(jnp.float32))
        counts = jnp.sum(cmp, axis=1, keepdims=True)                    # (N, 1)
        big = jnp.float32(1e30)
        v_lo = jnp.min(jnp.where(counts >= lo_rank, kl, big),
                       axis=0, keepdims=True)                           # (1, 1)
        v_hi = jnp.min(jnp.where(counts >= hi_rank, kl, big),
                       axis=0, keepdims=True)                           # (1, 1)
        thresh = v_lo + frac * (v_hi - v_lo)

        mask = jnp.where(kl < thresh, 0.0, 0.1)                         # (N, 1)
        return alpha * hh + (1.0 - alpha) * y + mask * (y - hh)

    xk = lax.fori_loop(0, K, step, hh, unroll=True)

    # final F.log_softmax(x, dim=1)
    o_ref[...] = _log_softmax_rows(xk)


def airgnn_forward(x, adj_hat, params, *, K, alpha):
    n = x.shape[0]
    c = params["w2"].shape[0]
    # torch.quantile(kl, 0.9): position 0.9*(N-1); linear interpolation between
    # the order statistics at 1-indexed ranks lo+1 and hi+1.
    pos = 0.9 * (n - 1)
    lo = math.floor(pos)
    hi = math.ceil(pos)
    kernel = functools.partial(
        airgnn_kernel, K=int(K), alpha=float(alpha),
        lo_rank=float(lo + 1), hi_rank=float(hi + 1), frac=float(pos - lo))
    return pl.pallas_call(
        kernel,
        out_shape=jax.ShapeDtypeStruct((n, c), jnp.float32),
        in_specs=[_vmem_spec()] * 6,
        out_specs=_vmem_spec(),
        compiler_params=pltpu.CompilerParams(
            vmem_limit_bytes=48 * 1024 * 1024),
    )(x, params["w1"].T, params["b1"][None, :],
      params["w2"].T, params["b2"][None, :], adj_hat)


def gcn_norm_dense(adj):
    """A_hat = D^{-1/2} (A + I) D^{-1/2}  (gcn_norm with add_self_loops=True)."""
    n = adj.shape[0]
    a = adj + jnp.eye(n, dtype=adj.dtype)
    deg = jnp.sum(a, axis=1)
    dinv = jnp.where(deg > 0, 1.0 / jnp.sqrt(deg), 0.0)
    return dinv[:, None] * a * dinv[None, :]


def airgnn_reference(x, adj_hat, params, *, K, alpha):
    """Pure-JAX (f32-highest) reference of the same eval-mode forward."""
    hp = lax.Precision.HIGHEST
    h = jnp.maximum(jnp.dot(x, params["w1"].T, precision=hp) + params["b1"], 0.0)
    hh = jnp.dot(h, params["w2"].T, precision=hp) + params["b2"]
    ls_hh = jax.nn.log_softmax(hh, axis=1)
    xk = hh
    for _ in range(K):
        y = jnp.dot(adj_hat, xk, precision=hp)
        ls_y = jax.nn.log_softmax(y, axis=1)
        kl = jnp.sum(jnp.exp(ls_y) * (ls_y - ls_hh), axis=1)
        thresh = jnp.quantile(kl, 0.9)
        mask = jnp.where(kl < thresh, 0.0, 0.1)[:, None]
        xk = alpha * hh + (1.0 - alpha) * y + mask * (y - hh)
    return jax.nn.log_softmax(xk, axis=1)


if __name__ == "__main__":
    # Small synthetic problem: N nodes, F features, H hidden, C classes.
    N, F_IN, H, C = 64, 32, 32, 8
    K, ALPHA = 4, 0.1  # args.K, args.alpha ; args.lambda_amp cancels in forward

    key = jax.random.PRNGKey(0)
    kx, ka, k1, k2, k3, k4 = jax.random.split(key, 6)

    x = jax.random.normal(kx, (N, F_IN), dtype=jnp.float32)

    # Synthetic symmetric adjacency (no self loops; gcn_norm adds them).
    a = (jax.random.uniform(ka, (N, N)) < 0.08).astype(jnp.float32)
    a = jnp.maximum(a, a.T) * (1.0 - jnp.eye(N, dtype=jnp.float32))
    adj_hat = gcn_norm_dense(a)

    # Deterministic Linear parameter init (kaiming-uniform-like bounds).
    bound1 = 1.0 / math.sqrt(F_IN)
    bound2 = 1.0 / math.sqrt(H)
    params = {
        "w1": jax.random.uniform(k1, (H, F_IN), jnp.float32, -bound1, bound1),
        "b1": jax.random.uniform(k2, (H,), jnp.float32, -bound1, bound1),
        "w2": jax.random.uniform(k3, (C, H), jnp.float32, -bound2, bound2),
        "b2": jax.random.uniform(k4, (C,), jnp.float32, -bound2, bound2),
    }

    out = airgnn_forward(x, adj_hat, params, K=K, alpha=ALPHA)
    out = jax.block_until_ready(out)

    assert out.shape == (N, C) and out.dtype == jnp.float32
    assert bool(jnp.all(jnp.isfinite(out)))
    # rows of log_softmax should exp-sum to 1
    assert bool(jnp.allclose(jnp.sum(jnp.exp(out), axis=1), 1.0, atol=1e-4))
    # parity with a pure-JAX reference of the same forward
    ref = airgnn_reference(x, adj_hat, params, K=K, alpha=ALPHA)
    assert bool(jnp.max(jnp.abs(out - ref)) < 5e-3)
    print("KERNEL_OK")
</pallas_src>

<mosaic_0001>
module attributes {stable_mosaic.version = 11 : i64} {
  func.func @airgnn_kernel(%arg0: memref<64x32xf32, #tpu.memory_space<vmem>>, %arg1: memref<32x32xf32, #tpu.memory_space<vmem>>, %arg2: memref<1x32xf32, #tpu.memory_space<vmem>>, %arg3: memref<32x8xf32, #tpu.memory_space<vmem>>, %arg4: memref<1x8xf32, #tpu.memory_space<vmem>>, %arg5: memref<64x64xf32, #tpu.memory_space<vmem>>, %arg6: memref<64x8xf32, #tpu.memory_space<vmem>>) attributes {dimension_semantics = [], scalar_prefetch = 0 : i64, scratch_operands = 0 : i64, tpu.core_type = #tpu.core_type<tc>} {
    %c0 = arith.constant 0 : index
    %c0_0 = arith.constant 0 : index
    %0 = vector.load %arg0[%c0, %c0_0] : memref<64x32xf32, #tpu.memory_space<vmem>>, vector<64x32xf32>
    %c0_1 = arith.constant 0 : index
    %c0_2 = arith.constant 0 : index
    %1 = vector.load %arg1[%c0_1, %c0_2] : memref<32x32xf32, #tpu.memory_space<vmem>>, vector<32x32xf32>
    %cst = arith.constant dense<0.000000e+00> : vector<64x32xf32>
    %2 = tpu.matmul %0, %1, %cst {dimension_numbers = #tpu.dot_dimension_numbers<[1], [0], [0], [1], [0, 0, 1, 1], [], []>} : vector<64x32xf32>, vector<32x32xf32>, vector<64x32xf32> -> vector<64x32xf32>
    %c0_3 = arith.constant 0 : index
    %c0_4 = arith.constant 0 : index
    %3 = vector.load %arg2[%c0_3, %c0_4] : memref<1x32xf32, #tpu.memory_space<vmem>>, vector<1x32xf32>
    %4 = vector.broadcast %3 : vector<1x32xf32> to vector<64x32xf32>
    %5 = arith.addf %2, %4 : vector<64x32xf32>
    %cst_5 = arith.constant 0.000000e+00 : f32
    %6 = vector.broadcast %cst_5 : f32 to vector<64x32xf32>
    %7 = arith.maximumf %5, %6 : vector<64x32xf32>
    %c0_6 = arith.constant 0 : index
    %c0_7 = arith.constant 0 : index
    %8 = vector.load %arg3[%c0_6, %c0_7] : memref<32x8xf32, #tpu.memory_space<vmem>>, vector<32x8xf32>
    %cst_8 = arith.constant dense<0.000000e+00> : vector<64x8xf32>
    %9 = tpu.matmul %7, %8, %cst_8 {dimension_numbers = #tpu.dot_dimension_numbers<[1], [0], [0], [1], [0, 0, 1, 1], [], []>} : vector<64x32xf32>, vector<32x8xf32>, vector<64x8xf32> -> vector<64x8xf32>
    %c0_9 = arith.constant 0 : index
    %c0_10 = arith.constant 0 : index
    %10 = vector.load %arg4[%c0_9, %c0_10] : memref<1x8xf32, #tpu.memory_space<vmem>>, vector<1x8xf32>
    %11 = vector.broadcast %10 : vector<1x8xf32> to vector<64x8xf32>
    %12 = arith.addf %9, %11 : vector<64x8xf32>
    %cst_11 = arith.constant dense<0xFF800000> : vector<64xf32>
    %13 = vector.multi_reduction <maximumf>, %12, %cst_11 [1] : vector<64x8xf32> to vector<64xf32>
    %14 = vector.shape_cast %13 : vector<64xf32> to vector<64x1xf32>
    %15 = vector.broadcast %14 : vector<64x1xf32> to vector<64x8xf32>
    %16 = arith.subf %12, %15 : vector<64x8xf32>
    %17 = math.exp %16 : vector<64x8xf32>
    %cst_12 = arith.constant dense<0.000000e+00> : vector<64xf32>
    %18 = vector.multi_reduction <add>, %17, %cst_12 [1] : vector<64x8xf32> to vector<64xf32>
    %19 = vector.shape_cast %18 : vector<64xf32> to vector<64x1xf32>
    %20 = math.log %19 : vector<64x1xf32>
    %21 = vector.broadcast %20 : vector<64x1xf32> to vector<64x8xf32>
    %22 = arith.subf %16, %21 : vector<64x8xf32>
    %c0_13 = arith.constant 0 : index
    %c0_14 = arith.constant 0 : index
    %23 = vector.load %arg5[%c0_13, %c0_14] : memref<64x64xf32, #tpu.memory_space<vmem>>, vector<64x64xf32>
    %cst_15 = arith.constant 1.000000e+00 : f32
    %24 = vector.broadcast %cst_15 : f32 to vector<1x8xf32>
    %25 = tpu.iota {dimensions = array<i32: 0>} : vector<64x64xi32>
    %26 = tpu.iota {dimensions = array<i32: 1>} : vector<64x64xi32>
    %27 = arith.cmpi eq, %25, %26 : vector<64x64xi32>
    %c0_i32 = arith.constant 0 : i32
    %cst_16 = arith.constant dense<0.000000e+00> : vector<64x8xf32>
    %28 = tpu.matmul %23, %12, %cst_16 {dimension_numbers = #tpu.dot_dimension_numbers<[1], [0], [0], [1], [0, 0, 1, 1], [], []>} : vector<64x64xf32>, vector<64x8xf32>, vector<64x8xf32> -> vector<64x8xf32>
    %cst_17 = arith.constant dense<0xFF800000> : vector<64xf32>
    %29 = vector.multi_reduction <maximumf>, %28, %cst_17 [1] : vector<64x8xf32> to vector<64xf32>
    %30 = vector.shape_cast %29 : vector<64xf32> to vector<64x1xf32>
    %31 = vector.broadcast %30 : vector<64x1xf32> to vector<64x8xf32>
    %32 = arith.subf %28, %31 : vector<64x8xf32>
    %33 = math.exp %32 : vector<64x8xf32>
    %cst_18 = arith.constant dense<0.000000e+00> : vector<64xf32>
    %34 = vector.multi_reduction <add>, %33, %cst_18 [1] : vector<64x8xf32> to vector<64xf32>
    %35 = vector.shape_cast %34 : vector<64xf32> to vector<64x1xf32>
    %36 = math.log %35 : vector<64x1xf32>
    %37 = vector.broadcast %36 : vector<64x1xf32> to vector<64x8xf32>
    %38 = arith.subf %32, %37 : vector<64x8xf32>
    %39 = math.exp %38 : vector<64x8xf32>
    %40 = arith.subf %38, %22 : vector<64x8xf32>
    %41 = arith.mulf %39, %40 : vector<64x8xf32>
    %cst_19 = arith.constant dense<0.000000e+00> : vector<64xf32>
    %42 = vector.multi_reduction <add>, %41, %cst_19 [1] : vector<64x8xf32> to vector<64xf32>
    %43 = vector.shape_cast %42 : vector<64xf32> to vector<64x1xf32>
    %cst_20 = arith.constant dense<0.000000e+00> : vector<1x64xf32>
    %44 = tpu.matmul %24, %41, %cst_20 {dimension_numbers = #tpu.dot_dimension_numbers<[1], [1], [0], [0], [0, 0, 1, 0], [], []>} : vector<1x8xf32>, vector<64x8xf32>, vector<1x64xf32> -> vector<1x64xf32>
    %45 = vector.broadcast %44 : vector<1x64xf32> to vector<64x64xf32>
    %46 = vector.broadcast %43 : vector<64x1xf32> to vector<64x64xf32>
    %47 = arith.cmpf ole, %45, %46 : vector<64x64xf32>
    %48 = arith.extui %47 : vector<64x64xi1> to vector<64x64xi32>
    %49 = arith.sitofp %48 : vector<64x64xi32> to vector<64x64xf32>
    %cst_21 = arith.constant 1.000000e+00 : f32
    %50 = vector.broadcast %cst_21 : f32 to vector<64x64xf32>
    %51 = arith.select %27, %50, %49 : vector<64x64xi1>, vector<64x64xf32>
    %cst_22 = arith.constant dense<0.000000e+00> : vector<64xf32>
    %52 = vector.multi_reduction <add>, %51, %cst_22 [1] : vector<64x64xf32> to vector<64xf32>
    %53 = vector.shape_cast %52 : vector<64xf32> to vector<64x1xf32>
    %cst_23 = arith.constant 5.700000e+01 : f32
    %54 = vector.broadcast %cst_23 : f32 to vector<64x1xf32>
    %55 = arith.cmpf oge, %53, %54 : vector<64x1xf32>
    %cst_24 = arith.constant 1.000000e+30 : f32
    %56 = vector.broadcast %cst_24 : f32 to vector<64x1xf32>
    %57 = arith.select %55, %43, %56 : vector<64x1xi1>, vector<64x1xf32>
    %cst_25 = arith.constant dense<0x7F800000> : vector<1xf32>
    %58 = vector.multi_reduction <minimumf>, %57, %cst_25 [0] : vector<64x1xf32> to vector<1xf32>
    %59 = vector.shape_cast %58 : vector<1xf32> to vector<1x1xf32>
    %cst_26 = arith.constant 5.800000e+01 : f32
    %60 = vector.broadcast %cst_26 : f32 to vector<64x1xf32>
    %61 = arith.cmpf oge, %53, %60 : vector<64x1xf32>
    %cst_27 = arith.constant 1.000000e+30 : f32
    %62 = vector.broadcast %cst_27 : f32 to vector<64x1xf32>
    %63 = arith.select %61, %43, %62 : vector<64x1xi1>, vector<64x1xf32>
    %cst_28 = arith.constant dense<0x7F800000> : vector<1xf32>
    %64 = vector.multi_reduction <minimumf>, %63, %cst_28 [0] : vector<64x1xf32> to vector<1xf32>
    %65 = vector.shape_cast %64 : vector<1xf32> to vector<1x1xf32>
    %66 = arith.subf %65, %59 : vector<1x1xf32>
    %cst_29 = arith.constant 0.699999988 : f32
    %67 = vector.broadcast %cst_29 : f32 to vector<1x1xf32>
    %68 = arith.mulf %67, %66 : vector<1x1xf32>
    %69 = arith.addf %59, %68 : vector<1x1xf32>
    %70 = vector.broadcast %69 : vector<1x1xf32> to vector<64x1xf32>
    %71 = arith.cmpf olt, %43, %70 : vector<64x1xf32>
    %cst_30 = arith.constant 0.000000e+00 : f32
    %cst_31 = arith.constant 1.000000e-01 : f32
    %72 = vector.broadcast %cst_30 : f32 to vector<64x1xf32>
    %73 = vector.broadcast %cst_31 : f32 to vector<64x1xf32>
    %74 = arith.select %71, %72, %73 : vector<64x1xi1>, vector<64x1xf32>
    %cst_32 = arith.constant 1.000000e-01 : f32
    %75 = vector.broadcast %cst_32 : f32 to vector<64x8xf32>
    %76 = arith.mulf %75, %12 : vector<64x8xf32>
    %cst_33 = arith.constant 0.899999976 : f32
    %77 = vector.broadcast %cst_33 : f32 to vector<64x8xf32>
    %78 = arith.mulf %77, %28 : vector<64x8xf32>
    %79 = arith.addf %76, %78 : vector<64x8xf32>
    %80 = arith.subf %28, %12 : vector<64x8xf32>
    %81 = vector.broadcast %74 : vector<64x1xf32> to vector<64x8xf32>
    %82 = arith.mulf %81, %80 : vector<64x8xf32>
    %83 = arith.addf %79, %82 : vector<64x8xf32>
    %c1_i32 = arith.constant 1 : i32
    %cst_34 = arith.constant dense<0.000000e+00> : vector<64x8xf32>
    %84 = tpu.matmul %23, %83, %cst_34 {dimension_numbers = #tpu.dot_dimension_numbers<[1], [0], [0], [1], [0, 0, 1, 1], [], []>} : vector<64x64xf32>, vector<64x8xf32>, vector<64x8xf32> -> vector<64x8xf32>
    %cst_35 = arith.constant dense<0xFF800000> : vector<64xf32>
    %85 = vector.multi_reduction <maximumf>, %84, %cst_35 [1] : vector<64x8xf32> to vector<64xf32>
    %86 = vector.shape_cast %85 : vector<64xf32> to vector<64x1xf32>
    %87 = vector.broadcast %86 : vector<64x1xf32> to vector<64x8xf32>
    %88 = arith.subf %84, %87 : vector<64x8xf32>
    %89 = math.exp %88 : vector<64x8xf32>
    %cst_36 = arith.constant dense<0.000000e+00> : vector<64xf32>
    %90 = vector.multi_reduction <add>, %89, %cst_36 [1] : vector<64x8xf32> to vector<64xf32>
    %91 = vector.shape_cast %90 : vector<64xf32> to vector<64x1xf32>
    %92 = math.log %91 : vector<64x1xf32>
    %93 = vector.broadcast %92 : vector<64x1xf32> to vector<64x8xf32>
    %94 = arith.subf %88, %93 : vector<64x8xf32>
    %95 = math.exp %94 : vector<64x8xf32>
    %96 = arith.subf %94, %22 : vector<64x8xf32>
    %97 = arith.mulf %95, %96 : vector<64x8xf32>
    %cst_37 = arith.constant dense<0.000000e+00> : vector<64xf32>
    %98 = vector.multi_reduction <add>, %97, %cst_37 [1] : vector<64x8xf32> to vector<64xf32>
    %99 = vector.shape_cast %98 : vector<64xf32> to vector<64x1xf32>
    %cst_38 = arith.constant dense<0.000000e+00> : vector<1x64xf32>
    %100 = tpu.matmul %24, %97, %cst_38 {dimension_numbers = #tpu.dot_dimension_numbers<[1], [1], [0], [0], [0, 0, 1, 0], [], []>} : vector<1x8xf32>, vector<64x8xf32>, vector<1x64xf32> -> vector<1x64xf32>
    %101 = vector.broadcast %100 : vector<1x64xf32> to vector<64x64xf32>
    %102 = vector.broadcast %99 : vector<64x1xf32> to vector<64x64xf32>
    %103 = arith.cmpf ole, %101, %102 : vector<64x64xf32>
    %104 = arith.extui %103 : vector<64x64xi1> to vector<64x64xi32>
    %105 = arith.sitofp %104 : vector<64x64xi32> to vector<64x64xf32>
    %cst_39 = arith.constant 1.000000e+00 : f32
    %106 = vector.broadcast %cst_39 : f32 to vector<64x64xf32>
    %107 = arith.select %27, %106, %105 : vector<64x64xi1>, vector<64x64xf32>
    %cst_40 = arith.constant dense<0.000000e+00> : vector<64xf32>
    %108 = vector.multi_reduction <add>, %107, %cst_40 [1] : vector<64x64xf32> to vector<64xf32>
    %109 = vector.shape_cast %108 : vector<64xf32> to vector<64x1xf32>
    %cst_41 = arith.constant 5.700000e+01 : f32
    %110 = vector.broadcast %cst_41 : f32 to vector<64x1xf32>
    %111 = arith.cmpf oge, %109, %110 : vector<64x1xf32>
    %cst_42 = arith.constant 1.000000e+30 : f32
    %112 = vector.broadcast %cst_42 : f32 to vector<64x1xf32>
    %113 = arith.select %111, %99, %112 : vector<64x1xi1>, vector<64x1xf32>
    %cst_43 = arith.constant dense<0x7F800000> : vector<1xf32>
    %114 = vector.multi_reduction <minimumf>, %113, %cst_43 [0] : vector<64x1xf32> to vector<1xf32>
    %115 = vector.shape_cast %114 : vector<1xf32> to vector<1x1xf32>
    %cst_44 = arith.constant 5.800000e+01 : f32
    %116 = vector.broadcast %cst_44 : f32 to vector<64x1xf32>
    %117 = arith.cmpf oge, %109, %116 : vector<64x1xf32>
    %cst_45 = arith.constant 1.000000e+30 : f32
    %118 = vector.broadcast %cst_45 : f32 to vector<64x1xf32>
    %119 = arith.select %117, %99, %118 : vector<64x1xi1>, vector<64x1xf32>
    %cst_46 = arith.constant dense<0x7F800000> : vector<1xf32>
    %120 = vector.multi_reduction <minimumf>, %119, %cst_46 [0] : vector<64x1xf32> to vector<1xf32>
    %121 = vector.shape_cast %120 : vector<1xf32> to vector<1x1xf32>
    %122 = arith.subf %121, %115 : vector<1x1xf32>
    %cst_47 = arith.constant 0.699999988 : f32
    %123 = vector.broadcast %cst_47 : f32 to vector<1x1xf32>
    %124 = arith.mulf %123, %122 : vector<1x1xf32>
    %125 = arith.addf %115, %124 : vector<1x1xf32>
    %126 = vector.broadcast %125 : vector<1x1xf32> to vector<64x1xf32>
    %127 = arith.cmpf olt, %99, %126 : vector<64x1xf32>
    %cst_48 = arith.constant 0.000000e+00 : f32
    %cst_49 = arith.constant 1.000000e-01 : f32
    %128 = vector.broadcast %cst_48 : f32 to vector<64x1xf32>
    %129 = vector.broadcast %cst_49 : f32 to vector<64x1xf32>
    %130 = arith.select %127, %128, %129 : vector<64x1xi1>, vector<64x1xf32>
    %cst_50 = arith.constant 1.000000e-01 : f32
    %131 = vector.broadcast %cst_50 : f32 to vector<64x8xf32>
    %132 = arith.mulf %131, %12 : vector<64x8xf32>
    %cst_51 = arith.constant 0.899999976 : f32
    %133 = vector.broadcast %cst_51 : f32 to vector<64x8xf32>
    %134 = arith.mulf %133, %84 : vector<64x8xf32>
    %135 = arith.addf %132, %134 : vector<64x8xf32>
    %136 = arith.subf %84, %12 : vector<64x8xf32>
    %137 = vector.broadcast %130 : vector<64x1xf32> to vector<64x8xf32>
    %138 = arith.mulf %137, %136 : vector<64x8xf32>
    %139 = arith.addf %135, %138 : vector<64x8xf32>
    %c2_i32 = arith.constant 2 : i32
    %cst_52 = arith.constant dense<0.000000e+00> : vector<64x8xf32>
    %140 = tpu.matmul %23, %139, %cst_52 {dimension_numbers = #tpu.dot_dimension_numbers<[1], [0], [0], [1], [0, 0, 1, 1], [], []>} : vector<64x64xf32>, vector<64x8xf32>, vector<64x8xf32> -> vector<64x8xf32>
    %cst_53 = arith.constant dense<0xFF800000> : vector<64xf32>
    %141 = vector.multi_reduction <maximumf>, %140, %cst_53 [1] : vector<64x8xf32> to vector<64xf32>
    %142 = vector.shape_cast %141 : vector<64xf32> to vector<64x1xf32>
    %143 = vector.broadcast %142 : vector<64x1xf32> to vector<64x8xf32>
    %144 = arith.subf %140, %143 : vector<64x8xf32>
    %145 = math.exp %144 : vector<64x8xf32>
    %cst_54 = arith.constant dense<0.000000e+00> : vector<64xf32>
    %146 = vector.multi_reduction <add>, %145, %cst_54 [1] : vector<64x8xf32> to vector<64xf32>
    %147 = vector.shape_cast %146 : vector<64xf32> to vector<64x1xf32>
    %148 = math.log %147 : vector<64x1xf32>
    %149 = vector.broadcast %148 : vector<64x1xf32> to vector<64x8xf32>
    %150 = arith.subf %144, %149 : vector<64x8xf32>
    %151 = math.exp %150 : vector<64x8xf32>
    %152 = arith.subf %150, %22 : vector<64x8xf32>
    %153 = arith.mulf %151, %152 : vector<64x8xf32>
    %cst_55 = arith.constant dense<0.000000e+00> : vector<64xf32>
    %154 = vector.multi_reduction <add>, %153, %cst_55 [1] : vector<64x8xf32> to vector<64xf32>
    %155 = vector.shape_cast %154 : vector<64xf32> to vector<64x1xf32>
    %cst_56 = arith.constant dense<0.000000e+00> : vector<1x64xf32>
    %156 = tpu.matmul %24, %153, %cst_56 {dimension_numbers = #tpu.dot_dimension_numbers<[1], [1], [0], [0], [0, 0, 1, 0], [], []>} : vector<1x8xf32>, vector<64x8xf32>, vector<1x64xf32> -> vector<1x64xf32>
    %157 = vector.broadcast %156 : vector<1x64xf32> to vector<64x64xf32>
    %158 = vector.broadcast %155 : vector<64x1xf32> to vector<64x64xf32>
    %159 = arith.cmpf ole, %157, %158 : vector<64x64xf32>
    %160 = arith.extui %159 : vector<64x64xi1> to vector<64x64xi32>
    %161 = arith.sitofp %160 : vector<64x64xi32> to vector<64x64xf32>
    %cst_57 = arith.constant 1.000000e+00 : f32
    %162 = vector.broadcast %cst_57 : f32 to vector<64x64xf32>
    %163 = arith.select %27, %162, %161 : vector<64x64xi1>, vector<64x64xf32>
    %cst_58 = arith.constant dense<0.000000e+00> : vector<64xf32>
    %164 = vector.multi_reduction <add>, %163, %cst_58 [1] : vector<64x64xf32> to vector<64xf32>
    %165 = vector.shape_cast %164 : vector<64xf32> to vector<64x1xf32>
    %cst_59 = arith.constant 5.700000e+01 : f32
    %166 = vector.broadcast %cst_59 : f32 to vector<64x1xf32>
    %167 = arith.cmpf oge, %165, %166 : vector<64x1xf32>
    %cst_60 = arith.constant 1.000000e+30 : f32
    %168 = vector.broadcast %cst_60 : f32 to vector<64x1xf32>
    %169 = arith.select %167, %155, %168 : vector<64x1xi1>, vector<64x1xf32>
    %cst_61 = arith.constant dense<0x7F800000> : vector<1xf32>
    %170 = vector.multi_reduction <minimumf>, %169, %cst_61 [0] : vector<64x1xf32> to vector<1xf32>
    %171 = vector.shape_cast %170 : vector<1xf32> to vector<1x1xf32>
    %cst_62 = arith.constant 5.800000e+01 : f32
    %172 = vector.broadcast %cst_62 : f32 to vector<64x1xf32>
    %173 = arith.cmpf oge, %165, %172 : vector<64x1xf32>
    %cst_63 = arith.constant 1.000000e+30 : f32
    %174 = vector.broadcast %cst_63 : f32 to vector<64x1xf32>
    %175 = arith.select %173, %155, %174 : vector<64x1xi1>, vector<64x1xf32>
    %cst_64 = arith.constant dense<0x7F800000> : vector<1xf32>
    %176 = vector.multi_reduction <minimumf>, %175, %cst_64 [0] : vector<64x1xf32> to vector<1xf32>
    %177 = vector.shape_cast %176 : vector<1xf32> to vector<1x1xf32>
    %178 = arith.subf %177, %171 : vector<1x1xf32>
    %cst_65 = arith.constant 0.699999988 : f32
    %179 = vector.broadcast %cst_65 : f32 to vector<1x1xf32>
    %180 = arith.mulf %179, %178 : vector<1x1xf32>
    %181 = arith.addf %171, %180 : vector<1x1xf32>
    %182 = vector.broadcast %181 : vector<1x1xf32> to vector<64x1xf32>
    %183 = arith.cmpf olt, %155, %182 : vector<64x1xf32>
    %cst_66 = arith.constant 0.000000e+00 : f32
    %cst_67 = arith.constant 1.000000e-01 : f32
    %184 = vector.broadcast %cst_66 : f32 to vector<64x1xf32>
    %185 = vector.broadcast %cst_67 : f32 to vector<64x1xf32>
    %186 = arith.select %183, %184, %185 : vector<64x1xi1>, vector<64x1xf32>
    %cst_68 = arith.constant 1.000000e-01 : f32
    %187 = vector.broadcast %cst_68 : f32 to vector<64x8xf32>
    %188 = arith.mulf %187, %12 : vector<64x8xf32>
    %cst_69 = arith.constant 0.899999976 : f32
    %189 = vector.broadcast %cst_69 : f32 to vector<64x8xf32>
    %190 = arith.mulf %189, %140 : vector<64x8xf32>
    %191 = arith.addf %188, %190 : vector<64x8xf32>
    %192 = arith.subf %140, %12 : vector<64x8xf32>
    %193 = vector.broadcast %186 : vector<64x1xf32> to vector<64x8xf32>
    %194 = arith.mulf %193, %192 : vector<64x8xf32>
    %195 = arith.addf %191, %194 : vector<64x8xf32>
    %c3_i32 = arith.constant 3 : i32
    %cst_70 = arith.constant dense<0.000000e+00> : vector<64x8xf32>
    %196 = tpu.matmul %23, %195, %cst_70 {dimension_numbers = #tpu.dot_dimension_numbers<[1], [0], [0], [1], [0, 0, 1, 1], [], []>} : vector<64x64xf32>, vector<64x8xf32>, vector<64x8xf32> -> vector<64x8xf32>
    %cst_71 = arith.constant dense<0xFF800000> : vector<64xf32>
    %197 = vector.multi_reduction <maximumf>, %196, %cst_71 [1] : vector<64x8xf32> to vector<64xf32>
    %198 = vector.shape_cast %197 : vector<64xf32> to vector<64x1xf32>
    %199 = vector.broadcast %198 : vector<64x1xf32> to vector<64x8xf32>
    %200 = arith.subf %196, %199 : vector<64x8xf32>
    %201 = math.exp %200 : vector<64x8xf32>
    %cst_72 = arith.constant dense<0.000000e+00> : vector<64xf32>
    %202 = vector.multi_reduction <add>, %201, %cst_72 [1] : vector<64x8xf32> to vector<64xf32>
    %203 = vector.shape_cast %202 : vector<64xf32> to vector<64x1xf32>
    %204 = math.log %203 : vector<64x1xf32>
    %205 = vector.broadcast %204 : vector<64x1xf32> to vector<64x8xf32>
    %206 = arith.subf %200, %205 : vector<64x8xf32>
    %207 = math.exp %206 : vector<64x8xf32>
    %208 = arith.subf %206, %22 : vector<64x8xf32>
    %209 = arith.mulf %207, %208 : vector<64x8xf32>
    %cst_73 = arith.constant dense<0.000000e+00> : vector<64xf32>
    %210 = vector.multi_reduction <add>, %209, %cst_73 [1] : vector<64x8xf32> to vector<64xf32>
    %211 = vector.shape_cast %210 : vector<64xf32> to vector<64x1xf32>
    %cst_74 = arith.constant dense<0.000000e+00> : vector<1x64xf32>
    %212 = tpu.matmul %24, %209, %cst_74 {dimension_numbers = #tpu.dot_dimension_numbers<[1], [1], [0], [0], [0, 0, 1, 0], [], []>} : vector<1x8xf32>, vector<64x8xf32>, vector<1x64xf32> -> vector<1x64xf32>
    %213 = vector.broadcast %212 : vector<1x64xf32> to vector<64x64xf32>
    %214 = vector.broadcast %211 : vector<64x1xf32> to vector<64x64xf32>
    %215 = arith.cmpf ole, %213, %214 : vector<64x64xf32>
    %216 = arith.extui %215 : vector<64x64xi1> to vector<64x64xi32>
    %217 = arith.sitofp %216 : vector<64x64xi32> to vector<64x64xf32>
    %cst_75 = arith.constant 1.000000e+00 : f32
    %218 = vector.broadcast %cst_75 : f32 to vector<64x64xf32>
    %219 = arith.select %27, %218, %217 : vector<64x64xi1>, vector<64x64xf32>
    %cst_76 = arith.constant dense<0.000000e+00> : vector<64xf32>
    %220 = vector.multi_reduction <add>, %219, %cst_76 [1] : vector<64x64xf32> to vector<64xf32>
    %221 = vector.shape_cast %220 : vector<64xf32> to vector<64x1xf32>
    %cst_77 = arith.constant 5.700000e+01 : f32
    %222 = vector.broadcast %cst_77 : f32 to vector<64x1xf32>
    %223 = arith.cmpf oge, %221, %222 : vector<64x1xf32>
    %cst_78 = arith.constant 1.000000e+30 : f32
    %224 = vector.broadcast %cst_78 : f32 to vector<64x1xf32>
    %225 = arith.select %223, %211, %224 : vector<64x1xi1>, vector<64x1xf32>
    %cst_79 = arith.constant dense<0x7F800000> : vector<1xf32>
    %226 = vector.multi_reduction <minimumf>, %225, %cst_79 [0] : vector<64x1xf32> to vector<1xf32>
    %227 = vector.shape_cast %226 : vector<1xf32> to vector<1x1xf32>
    %cst_80 = arith.constant 5.800000e+01 : f32
    %228 = vector.broadcast %cst_80 : f32 to vector<64x1xf32>
    %229 = arith.cmpf oge, %221, %228 : vector<64x1xf32>
    %cst_81 = arith.constant 1.000000e+30 : f32
    %230 = vector.broadcast %cst_81 : f32 to vector<64x1xf32>
    %231 = arith.select %229, %211, %230 : vector<64x1xi1>, vector<64x1xf32>
    %cst_82 = arith.constant dense<0x7F800000> : vector<1xf32>
    %232 = vector.multi_reduction <minimumf>, %231, %cst_82 [0] : vector<64x1xf32> to vector<1xf32>
    %233 = vector.shape_cast %232 : vector<1xf32> to vector<1x1xf32>
    %234 = arith.subf %233, %227 : vector<1x1xf32>
    %cst_83 = arith.constant 0.699999988 : f32
    %235 = vector.broadcast %cst_83 : f32 to vector<1x1xf32>
    %236 = arith.mulf %235, %234 : vector<1x1xf32>
    %237 = arith.addf %227, %236 : vector<1x1xf32>
    %238 = vector.broadcast %237 : vector<1x1xf32> to vector<64x1xf32>
    %239 = arith.cmpf olt, %211, %238 : vector<64x1xf32>
    %cst_84 = arith.constant 0.000000e+00 : f32
    %cst_85 = arith.constant 1.000000e-01 : f32
    %240 = vector.broadcast %cst_84 : f32 to vector<64x1xf32>
    %241 = vector.broadcast %cst_85 : f32 to vector<64x1xf32>
    %242 = arith.select %239, %240, %241 : vector<64x1xi1>, vector<64x1xf32>
    %cst_86 = arith.constant 1.000000e-01 : f32
    %243 = vector.broadcast %cst_86 : f32 to vector<64x8xf32>
    %244 = arith.mulf %243, %12 : vector<64x8xf32>
    %cst_87 = arith.constant 0.899999976 : f32
    %245 = vector.broadcast %cst_87 : f32 to vector<64x8xf32>
    %246 = arith.mulf %245, %196 : vector<64x8xf32>
    %247 = arith.addf %244, %246 : vector<64x8xf32>
    %248 = arith.subf %196, %12 : vector<64x8xf32>
    %249 = vector.broadcast %242 : vector<64x1xf32> to vector<64x8xf32>
    %250 = arith.mulf %249, %248 : vector<64x8xf32>
    %251 = arith.addf %247, %250 : vector<64x8xf32>
    %cst_88 = arith.constant dense<0xFF800000> : vector<64xf32>
    %252 = vector.multi_reduction <maximumf>, %251, %cst_88 [1] : vector<64x8xf32> to vector<64xf32>
    %253 = vector.shape_cast %252 : vector<64xf32> to vector<64x1xf32>
    %254 = vector.broadcast %253 : vector<64x1xf32> to vector<64x8xf32>
    %255 = arith.subf %251, %254 : vector<64x8xf32>
    %256 = math.exp %255 : vector<64x8xf32>
    %cst_89 = arith.constant dense<0.000000e+00> : vector<64xf32>
    %257 = vector.multi_reduction <add>, %256, %cst_89 [1] : vector<64x8xf32> to vector<64xf32>
    %258 = vector.shape_cast %257 : vector<64xf32> to vector<64x1xf32>
    %259 = math.log %258 : vector<64x1xf32>
    %260 = vector.broadcast %259 : vector<64x1xf32> to vector<64x8xf32>
    %261 = arith.subf %255, %260 : vector<64x8xf32>
    %c0_90 = arith.constant 0 : index
    %c0_91 = arith.constant 0 : index
    %262 = vector.load %arg6[%c0_90, %c0_91] : memref<64x8xf32, #tpu.memory_space<vmem>>, vector<64x8xf32>
    tpu.vector_store %arg6[%c0_90, %c0_91], %261 {strides = array<i32>} : memref<64x8xf32, #tpu.memory_space<vmem>>, vector<64x8xf32>,
    return
  }
}

</mosaic_0001>

<bundles_post_ra>
// kernel: tpu_custom_call.1
= control target key start
LH: loop header
LB: loop body
LE: loop exit
PB: predicated region body
PF: predicated region fallthrough
CT: control target
= control target key end

     0   :  { %vm39_vm0 = vcmask 261120   ;;  %vm186_vm1 = vcmask 64512   ;;  %vm310_vm2 = vcmask 523264   ;;  %s3932_s1 = inlined_call_operand.vmem [shape: f32[32,32], index: 1, kind: input, shape index: {}]   ;;  %s3933_s3 = inlined_call_operand.vmem [shape: f32[32,8], index: 3, kind: input, shape index: {}]   ;;  %s3934_s0 = inlined_call_operand.vmem [shape: f32[64,32], index: 0, kind: input, shape index: {}]   ;;  %s3935_s2 = inlined_call_operand.vmem [shape: f32[1,32], index: 2, kind: input, shape index: {}]   ;;  %s3936_s4 = inlined_call_operand.vmem [shape: f32[1,8], index: 4, kind: input, shape index: {}]   ;;  %s3937_s5 = inlined_call_operand.vmem [shape: f32[64,64], index: 5, kind: input, shape index: {}]   ;;  %s3938_s6 = inlined_call_operand.vmem [shape: f32[64,8], index: 6, kind: output, shape index: {}]  }
   0x1   :  { %v34_v0 = vld [vmem:[%s3932_s1 + $0x18] sm:$0xff]  ;;  %v33_v1 = vld [vmem:[%s3932_s1 + $0x10] sm:$0xff]  ;;  %v32_v2 = vld [vmem:[%s3932_s1 + $0x8] sm:$0xff] }
   0x2   :  { %76 = vmatpush.msra.mxu0 %v34_v0  ;;  %2214 = vmatpush.msra.mxu3 %v34_v0  ;;  %v31_v3 = vld [vmem:[%s3932_s1] sm:$0xff]  ;;  %v116_v4 = vld [vmem:[%s3933_s3 + $0x18] sm:$0xff]  ;;  %v24_v7 = vld [vmem:[%s3934_s0 + $0x8] sm:$0xff] }
   0x3   :  { %v23_v5 = vld [vmem:[%s3934_s0] sm:$0xff]  ;;  %157 = vmatpush.msra.mxu1 %v116_v4  ;;  %v28_v8 = vld [vmem:[%s3934_s0 + $0x28] sm:$0xff]  ;;  %v25_v9 = vld [vmem:[%s3934_s0 + $0x10] sm:$0xff] }
   0x4   :  { %77 = vmatpush.msra.mxu0 %v33_v1  ;;  %2215 = vmatpush.msra.mxu3 %v33_v1  ;;  %v27_v6 = vld [vmem:[%s3934_s0 + $0x20] sm:$0xff]  ;;  %v29_v10 = vld [vmem:[%s3934_s0 + $0x30] sm:$0xff]  ;;  %v26_v11 = vld [vmem:[%s3934_s0 + $0x18] sm:$0xff] }
   0x5   :  { %v30_v12 = vld [vmem:[%s3934_s0 + $0x38] sm:$0xff]  ;;  %v115_v13 = vld [vmem:[%s3933_s3 + $0x10] sm:$0xff]  ;;  %v114_v14 = vld [vmem:[%s3933_s3 + $0x8] sm:$0xff] }
   0x6   :  { %78 = vmatpush.msra.mxu0 %v32_v2  ;;  %2216 = vmatpush.msra.mxu3 %v32_v2  ;;  %v113_v15 = vld [vmem:[%s3933_s3] sm:$0xff]  ;;  %v284_v61 = vld [vmem:[%s3937_s5 + $0x8] sm:$0xff]  ;;  %v285_v62 = vld [vmem:[%s3937_s5 + $0x10] sm:$0xff] }
   0x7   :  { %158 = vmatpush.msra.mxu1 %v115_v13  ;;  %v2221_v16 = vld [vmem:[%s3935_s2] ss:$0 sm:$0xff]  ;;  %v286_v63 = vld [vmem:[%s3937_s5 + $0x18] sm:$0xff]  ;;  %v288_v1 = vld [vmem:[%s3937_s5 + $0x28] sm:$0xff] }
   0x8   :  { %79 = vmatpush.msra.mxu0 %v31_v3  ;;  %2217 = vmatpush.msra.mxu3 %v31_v3  ;;  %v2222_v47 = vld [vmem:[%s3936_s4] ss:$0 sm:$0xff]  ;;  %v289_v2 = vld [vmem:[%s3937_s5 + $0x30] sm:$0xff]  ;;  %v290_v3 = vld [vmem:[%s3937_s5 + $0x38] sm:$0xff] }
   0x9   :  { %2098 = vmatmul.msk.f32.vlgmr.msra.gmra.mxu0 %vm39_vm0, %v23_v5  ;;  %2102 = vmatmul.msk.f32.vlgmr.msra.gmra.mxu3 %vm39_vm0, %v27_v6  ;;  %v283_v60 = vld [vmem:[%s3937_s5] sm:$0xff] }
   0xa   :  { %159 = vmatpush.msra.mxu1 %v114_v14  ;;  %v287_v0 = vld [vmem:[%s3937_s5 + $0x20] sm:$0xff] }
   0xc   :  { %160 = vmatpush.msra.mxu1 %v113_v15 }
  0x11   :  { %2099 = vmatmul.msk.f32.gmra.mxu0 %vm39_vm0, %v24_v7  ;;  %2103 = vmatmul.msk.f32.gmra.mxu3 %vm39_vm0, %v28_v8 }
  0x19   :  { %2100 = vmatmul.msk.f32.gmra.mxu0 %vm39_vm0, %v25_v9  ;;  %2104 = vmatmul.msk.f32.gmra.mxu3 %vm39_vm0, %v29_v10 }
  0x21   :  { %2101 = vmatmul.msk.f32.gmra.mxu0 %vm39_vm0, %v26_v11  ;;  %2105 = vmatmul.msk.f32.gmra.mxu3 %vm39_vm0, %v30_v12 }
  0x86   :  { %v81_v17 = vpop.f32.mrf.mxu0 }
  0x87   :  { %v82_v18 = vadd.f32 %v2221_v16, %v81_v17 }
  0x89   :  { %v105_v19 = vmax.f32 %v82_v18, 0.0 }
  0x8b   :  { %2106 = vmatmul.msk.f32.vlgmr.msra.gmra.mxu1 %vm39_vm0, %v105_v19 }
  0x8c   :  { %v93_v26 = vpop.f32.mrf.mxu3 }
  0x8d   :  { %v94_v30 = vadd.f32 %v2221_v16, %v93_v26 }
  0x8e   :  { %v84_v20 = vpop.f32.mrf.mxu0 }
  0x8f   :  { %v85_v21 = vadd.f32 %v2221_v16, %v84_v20  ;;  %v109_v32 = vmax.f32 %v94_v30, 0.0 }
  0x91   :  { %v106_v22 = vmax.f32 %v85_v21, 0.0 }
  0x93   :  { %2107 = vmatmul.msk.f32.gmra.mxu1 %vm39_vm0, %v106_v22 }
  0x94   :  { %v96_v31 = vpop.f32.mrf.mxu3 }
  0x95   :  { %v97_v33 = vadd.f32 %v2221_v16, %v96_v31 }
  0x96   :  { %v87_v23 = vpop.f32.mrf.mxu0 }
  0x97   :  { %v88_v24 = vadd.f32 %v2221_v16, %v87_v23  ;;  %v110_v35 = vmax.f32 %v97_v33, 0.0 }
  0x99   :  { %v107_v25 = vmax.f32 %v88_v24, 0.0 }
  0x9b   :  { %2108 = vmatmul.msk.f32.gmra.mxu1 %vm39_vm0, %v107_v25 }
  0x9c   :  { %v99_v34 = vpop.f32.mrf.mxu3 }
  0x9d   :  { %v100_v36 = vadd.f32 %v2221_v16, %v99_v34 }
  0x9e   :  { %v90_v27 = vpop.f32.mrf.mxu0 }
  0x9f   :  { %v91_v28 = vadd.f32 %v2221_v16, %v90_v27  ;;  %v111_v37 = vmax.f32 %v100_v36, 0.0 }
  0xa1   :  { %v108_v29 = vmax.f32 %v91_v28, 0.0 }
  0xa3   :  { %2109 = vmatmul.msk.f32.gmra.mxu1 %vm39_vm0, %v108_v29 }
  0xa4   :  { %v102_v38 = vpop.f32.mrf.mxu3 }
  0xa5   :  { %v103_v39 = vadd.f32 %v2221_v16, %v102_v38 }
  0xa7   :  { %v112_v40 = vmax.f32 %v103_v39, 0.0 }
  0xab   :  { %2110 = vmatmul.msk.f32.gmra.mxu1 %vm39_vm0, %v109_v32 }
  0xb3   :  { %2111 = vmatmul.msk.f32.gmra.mxu1 %vm39_vm0, %v110_v35 }
  0xbb   :  { %2112 = vmatmul.msk.f32.gmra.mxu1 %vm39_vm0, %v111_v37 }
  0xc3   :  { %2113 = vmatmul.msk.f32.gmra.mxu1 %vm39_vm0, %v112_v40 }
 0x108   :  { %v162_v41 = vpop.f32.mrf.mxu1 }
 0x109   :  { %v2627_v59 = vadd.f32 %v2222_v47, %v162_v41 }
 0x10b   :  { %v187_v28 = vsel %vm186_vm1, %v2627_v59, -inf }
 0x110   :  { %v165_v42 = vpop.f32.mrf.mxu1 }
 0x111   :  { %v2624_v58 = vadd.f32 %v2222_v47, %v165_v42 }
 0x113   :  { %v190_v17 = vsel %vm186_vm1, %v2624_v58, -inf }
 0x118   :  { %v168_v43 = vpop.f32.mrf.mxu1 }
 0x119   :  { %v2621_v57 = vadd.f32 %v2222_v47, %v168_v43 }
 0x11b   :  { %v193_v26 = vsel %vm186_vm1, %v2621_v57, -inf }
 0x120   :  { %v171_v44 = vpop.f32.mrf.mxu1 }
 0x121   :  { %v2618_v56 = vadd.f32 %v2222_v47, %v171_v44 }
 0x123   :  { %v196_v18 = vsel %vm186_vm1, %v2618_v56, -inf }
 0x128   :  { %v174_v45 = vpop.f32.mrf.mxu1 }
 0x129   :  { %v2615_v55 = vadd.f32 %v2222_v47, %v174_v45 }
 0x12b   :  { %v199_v11 = vsel %vm186_vm1, %v2615_v55, -inf }
 0x130   :  { %v177_v46 = vpop.f32.mrf.mxu1 }
 0x131   :  { %v2612_v54 = vadd.f32 %v2222_v47, %v177_v46 }
 0x133   :  { %v202_v22 = vsel %vm186_vm1, %v2612_v54, -inf }
 0x138   :  { %v180_v48 = vpop.f32.mrf.mxu1 }
 0x139   :  { %v2603_v49 = vadd.f32 %v2222_v47, %v180_v48 }
 0x13b   :  { %v205_v50 = vsel %vm186_vm1, %v2603_v49, -inf }
 0x13c   :  { %206 = vmax.xlane.f32.xlu2 %v205_v50 }
 0x140   :  { %v183_v51 = vpop.f32.mrf.mxu1 }
 0x141   :  { %v2607_v52 = vadd.f32 %v2222_v47, %v183_v51 }
 0x143   :  { %343 = vmatpush.msra.mxu2 %v2607_v52  ;;  %v208_v53 = vsel %vm186_vm1, %v2607_v52, -inf }
 0x144   :  { %209 = vmax.xlane.f32.xlu1 %v208_v53 }
 0x145   :  { %344 = vmatpush.msra.mxu2 %v2603_v49 }
 0x147   :  { %345 = vmatpush.msra.mxu2 %v2612_v54 }
 0x149   :  { %346 = vmatpush.msra.mxu2 %v2615_v55 }
 0x14b   :  { %347 = vmatpush.msra.mxu2 %v2618_v56 }
 0x14d   :  { %348 = vmatpush.msra.mxu2 %v2621_v57 }
 0x14f   :  { %349 = vmatpush.msra.mxu2 %v2624_v58 }
 0x151   :  { %350 = vmatpush.msra.mxu2 %v2627_v59 }
 0x152   :  { %2114 = vmatmul.msk.f32.vlgmr.msra.gmra.mxu2 %vm310_vm2, %v283_v60 }
 0x15a   :  { %2115 = vmatmul.msk.f32.gmra.mxu2 %vm310_vm2, %v284_v61 }
 0x162   :  { %2116 = vmatmul.msk.f32.gmra.mxu2 %vm310_vm2, %v285_v62 }
 0x16a   :  { %2117 = vmatmul.msk.f32.gmra.mxu2 %vm310_vm2, %v286_v63 }
 0x172   :  { %2118 = vmatmul.msk.f32.gmra.mxu2 %vm310_vm2, %v287_v0 }
 0x17a   :  { %2119 = vmatmul.msk.f32.gmra.mxu2 %vm310_vm2, %v288_v1 }
 0x182   :  { %2120 = vmatmul.msk.f32.gmra.mxu2 %vm310_vm2, %v289_v2 }
 0x18a   :  { %2121 = vmatmul.msk.f32.gmra.mxu2 %vm310_vm2, %v290_v3 }
 0x1af   :  { %v207_v31 = vpop.xlane.xlu2 %206 }
 0x1b0   :  { %v2743_v3 = vsub.f32 %v2603_v49, %v207_v31 }
 0x1b7   :  { %v210_v24 = vpop.xlane.xlu1 %209 }
 0x1b8   :  { %v2704_v25 = vsub.f32 %v2607_v52, %v210_v24 }
 0x1ba   :  { %v233_v27 = vmul.f32 1.442695, %v2704_v25 }
 0x1bc   :  { %2223 = vpow2.f32 %v233_v27 }
 0x1c2   :  { %v2224_v29 = vpop.eup %2223 }
 0x1c3   :  { %v256_v30 = vsel %vm186_vm1, %v2224_v29, 0.0 }
 0x1d5   :  { %v2663_v4 = vpop.f32.mrf.mxu2 }
 0x1d6   :  { %v376_v20 = vsel %vm186_vm1, %v2663_v4, -inf }
 0x1dd   :  { %v2665_v5 = vpop.f32.mrf.mxu2 }
 0x1de   :  { %v379_v14 = vsel %vm186_vm1, %v2665_v5, -inf }
 0x1e5   :  { %v2667_v6 = vpop.f32.mrf.mxu2 }
 0x1e6   :  { %v382_v23 = vsel %vm186_vm1, %v2667_v6, -inf }
 0x1ed   :  { %v2669_v7 = vpop.f32.mrf.mxu2 }
 0x1ee   :  { %v385_v15 = vsel %vm186_vm1, %v2669_v7, -inf }
 0x1f5   :  { %v2671_v8 = vpop.f32.mrf.mxu2 }
 0x1f6   :  { %v388_v9 = vsel %vm186_vm1, %v2671_v8, -inf }
 0x1f7   :  { %389 = vmax.xlane.f32.xlu2 %v388_v9 }
 0x1fd   :  { %v2675_v10 = vpop.f32.mrf.mxu2 }
 0x1fe   :  { %v391_v12 = vsel %vm186_vm1, %v2675_v10, -inf }
 0x1ff   :  { %200 = vmax.xlane.f32.xlu2 %v199_v11  ;;  %392 = vmax.xlane.f32.xlu1 %v391_v12 }
 0x205   :  { %v2681_v13 = vpop.f32.mrf.mxu2 }
 0x206   :  { %v394_v21 = vsel %vm186_vm1, %v2681_v13, -inf }
 0x207   :  { %380 = vmax.xlane.f32.xlu2 %v379_v14  ;;  %386 = vmax.xlane.f32.xlu1 %v385_v15 }
 0x20d   :  { %v2687_v16 = vpop.f32.mrf.mxu2 }
 0x20e   :  { %v397_v19 = vsel %vm186_vm1, %v2687_v16, -inf }
 0x20f   :  { %191 = vmax.xlane.f32.xlu2 %v190_v17  ;;  %197 = vmax.xlane.f32.xlu1 %v196_v18  ;;  %v231_v17 = vmul.f32 1.442695, %v2743_v3 }
 0x210   :  { %398 = vmax.xlane.f32.xlu0 %v397_v19 }
 0x217   :  { %377 = vmax.xlane.f32.xlu1 %v376_v20 }
 0x218   :  { %395 = vmax.xlane.f32.xlu0 %v394_v21 }
 0x220   :  { %203 = vmax.xlane.f32.xlu0 %v202_v22 }
 0x228   :  { %383 = vmax.xlane.f32.xlu0 %v382_v23 }
 0x230   :  { %194 = vmax.xlane.f32.xlu0 %v193_v26 }
 0x238   :  { %188 = vmax.xlane.f32.xlu0 %v187_v28 }
 0x240   :  { %257 = vadd.xlane.f32.xlu0 %v256_v30 }
 0x26a   :  { %v390_v32 = vpop.xlane.xlu2 %389 }
 0x26b   :  { %v2713_v33 = vsub.f32 %v2671_v8, %v390_v32 }
 0x26d   :  { %v416_v34 = vmul.f32 1.442695, %v2713_v33 }
 0x26f   :  { %2225 = vpow2.f32 %v416_v34 }
 0x272   :  { %v201_v35 = vpop.xlane.xlu2 %200  ;;  %v393_v48 = vpop.xlane.xlu1 %392 }
 0x273   :  { %v2717_v36 = vsub.f32 %v2615_v55, %v201_v35  ;;  %v2736_v62 = vsub.f32 %v2675_v10, %v393_v48 }
 0x275   :  { %v2226_v37 = vpop.eup %2225  ;;  %v227_v38 = vmul.f32 1.442695, %v2717_v36  ;;  %v418_v63 = vmul.f32 1.442695, %v2736_v62 }
 0x276   :  { %v436_v39 = vsel %vm186_vm1, %v2226_v37, 0.0 }
 0x277   :  { %2227 = vpow2.f32 %v227_v38  ;;  %437 = vadd.xlane.f32.xlu0 %v436_v39 }
 0x27a   :  { %v381_v40 = vpop.xlane.xlu2 %380  ;;  %v387_v14 = vpop.xlane.xlu1 %386 }
 0x27b   :  { %v2722_v41 = vsub.f32 %v2665_v5, %v381_v40  ;;  %v2753_v22 = vsub.f32 %v2669_v7, %v387_v14 }
 0x27d   :  { %v2228_v42 = vpop.eup %2227  ;;  %v410_v43 = vmul.f32 1.442695, %v2722_v41  ;;  %v414_v28 = vmul.f32 1.442695, %v2753_v22 }
 0x27e   :  { %v247_v44 = vsel %vm186_vm1, %v2228_v42, 0.0 }
 0x27f   :  { %2229 = vpow2.f32 %v410_v43  ;;  %248 = vadd.xlane.f32.xlu0 %v247_v44 }
 0x282   :  { %v192_v45 = vpop.xlane.xlu2 %191  ;;  %v198_v27 = vpop.xlane.xlu1 %197 }
 0x283   :  { %v2727_v46 = vsub.f32 %v2624_v58, %v192_v45  ;;  %v399_v47 = vpop.xlane.xlu0 %398  ;;  %v2763_v34 = vsub.f32 %v2618_v56, %v198_v27 }
 0x284   :  { %v2730_v50 = vsub.f32 %v2687_v16, %v399_v47 }
 0x285   :  { %v2230_v51 = vpop.eup %2229  ;;  %v221_v53 = vmul.f32 1.442695, %v2727_v46  ;;  %v225_v39 = vmul.f32 1.442695, %v2763_v34 }
 0x286   :  { %v422_v60 = vmul.f32 1.442695, %v2730_v50  ;;  %v427_v61 = vsel %vm186_vm1, %v2230_v51, 0.0 }
 0x287   :  { %2231 = vpow2.f32 %v221_v53  ;;  %428 = vadd.xlane.f32.xlu0 %v427_v61 }
 0x288   :  { %2233 = vpow2.f32 %v422_v60 }
 0x289   :  { %2235 = vpow2.f32 %v418_v63 }
 0x28a   :  { %v378_v40 = vpop.xlane.xlu1 %377 }
 0x28b   :  { %v396_v0 = vpop.xlane.xlu0 %395  ;;  %v2773_v47 = vsub.f32 %v2663_v4, %v378_v40 }
 0x28c   :  { %v2740_v1 = vsub.f32 %v2681_v13, %v396_v0 }
 0x28d   :  { %v2232_v2 = vpop.eup %2231  ;;  %v408_v60 = vmul.f32 1.442695, %v2773_v47 }
 0x28e   :  { %v420_v9 = vmul.f32 1.442695, %v2740_v1  ;;  %v238_v11 = vsel %vm186_vm1, %v2232_v2, 0.0  ;;  %v2234_v12 = vpop.eup %2233 }
 0x28f   :  { %239 = vadd.xlane.f32.xlu0 %v238_v11  ;;  %v445_v15 = vsel %vm186_vm1, %v2234_v12, 0.0  ;;  %v2236_v20 = vpop.eup %2235 }
 0x290   :  { %2237 = vpow2.f32 %v420_v9  ;;  %446 = vadd.xlane.f32.xlu1 %v445_v15  ;;  %v439_v26 = vsel %vm186_vm1, %v2236_v20, 0.0 }
 0x291   :  { %2239 = vpow2.f32 %v231_v17 }
 0x293   :  { %v204_v18 = vpop.xlane.xlu0 %203 }
 0x294   :  { %v2750_v19 = vsub.f32 %v2612_v54, %v204_v18 }
 0x296   :  { %v2238_v21 = vpop.eup %2237  ;;  %v229_v23 = vmul.f32 1.442695, %v2750_v19 }
 0x297   :  { %v442_v24 = vsel %vm186_vm1, %v2238_v21, 0.0  ;;  %v2240_v30 = vpop.eup %2239 }
 0x298   :  { %2241 = vpow2.f32 %v229_v23  ;;  %443 = vadd.xlane.f32.xlu2 %v442_v24  ;;  %440 = vadd.xlane.f32.xlu1 %v439_v26  ;;  %v253_v37 = vsel %vm186_vm1, %v2240_v30, 0.0 }
 0x299   :  { %2243 = vpow2.f32 %v414_v28 }
 0x29b   :  { %v384_v29 = vpop.xlane.xlu0 %383 }
 0x29c   :  { %v2760_v31 = vsub.f32 %v2667_v6, %v384_v29 }
 0x29e   :  { %v2242_v32 = vpop.eup %2241  ;;  %v412_v35 = vmul.f32 1.442695, %v2760_v31 }
 0x29f   :  { %v250_v38 = vsel %vm186_vm1, %v2242_v32, 0.0  ;;  %v2244_v43 = vpop.eup %2243 }
 0x2a0   :  { %2245 = vpow2.f32 %v412_v35  ;;  %254 = vadd.xlane.f32.xlu2 %v253_v37  ;;  %251 = vadd.xlane.f32.xlu1 %v250_v38  ;;  %v433_v51 = vsel %vm186_vm1, %v2244_v43, 0.0 }
 0x2a1   :  { %2247 = vpow2.f32 %v225_v39 }
 0x2a3   :  { %v195_v42 = vpop.xlane.xlu0 %194 }
 0x2a4   :  { %v2770_v44 = vsub.f32 %v2621_v57, %v195_v42 }
 0x2a6   :  { %v2246_v45 = vpop.eup %2245  ;;  %v223_v48 = vmul.f32 1.442695, %v2770_v44 }
 0x2a7   :  { %v430_v53 = vsel %vm186_vm1, %v2246_v45, 0.0  ;;  %v2248_v63 = vpop.eup %2247 }
 0x2a8   :  { %2249 = vpow2.f32 %v223_v48  ;;  %434 = vadd.xlane.f32.xlu2 %v433_v51  ;;  %431 = vadd.xlane.f32.xlu1 %v430_v53  ;;  %v244_v11 = vsel %vm186_vm1, %v2248_v63, 0.0 }
 0x2a9   :  { %2251 = vpow2.f32 %v408_v60 }
 0x2ab   :  { %v189_v61 = vpop.xlane.xlu0 %188 }
 0x2ac   :  { %v2780_v0 = vsub.f32 %v2627_v59, %v189_v61 }
 0x2ae   :  { %v2250_v2 = vpop.eup %2249  ;;  %v219_v9 = vmul.f32 1.442695, %v2780_v0 }
 0x2af   :  { %v241_v12 = vsel %vm186_vm1, %v2250_v2, 0.0  ;;  %v2252_v14 = vpop.eup %2251 }
 0x2b0   :  { %2253 = vpow2.f32 %v219_v9  ;;  %245 = vadd.xlane.f32.xlu2 %v244_v11  ;;  %242 = vadd.xlane.f32.xlu1 %v241_v12  ;;  %v424_v17 = vsel %vm186_vm1, %v2252_v14, 0.0 }
 0x2b3   :  { %v258_v20 = vpop.xlane.xlu0 %257 }
 0x2b6   :  { %v2254_v15 = vpop.eup %2253 }
 0x2b7   :  { %v235_v18 = vsel %vm186_vm1, %v2254_v15, 0.0 }
 0x2b8   :  { %425 = vadd.xlane.f32.xlu2 %v424_v17  ;;  %236 = vadd.xlane.f32.xlu1 %v235_v18 }
 0x2ea   :  { %v438_v21 = vpop.xlane.xlu0 %437 }
 0x2eb   :  { %2255 = vlog2.f32 %v438_v21 }
 0x2f1   :  { %v2256_v26 = vpop.eup %2255 }
 0x2f2   :  { %v249_v23 = vpop.xlane.xlu0 %248  ;;  %v457_v27 = vmul.f32 0.6931472, %v2256_v26 }
 0x2f4   :  { %v468_v32 = vsub.f32 %v2713_v33, %v457_v27 }
 0x2f6   :  { %v480_v40 = vmul.f32 1.442695, %v468_v32 }
 0x2fa   :  { %v429_v24 = vpop.xlane.xlu0 %428 }
 0x2fb   :  { %2257 = vlog2.f32 %v429_v24 }
 0x2fc   :  { %2259 = vlog2.f32 %v249_v23 }
 0x301   :  { %v2258_v28 = vpop.eup %2257 }
 0x302   :  { %v451_v29 = vmul.f32 0.6931472, %v2258_v28  ;;  %v240_v30 = vpop.xlane.xlu0 %239  ;;  %v2260_v39 = vpop.eup %2259 }
 0x303   :  { %2261 = vlog2.f32 %v240_v30  ;;  %v447_v37 = vpop.xlane.xlu1 %446  ;;  %v268_v43 = vmul.f32 0.6931472, %v2260_v39 }
 0x304   :  { %v465_v35 = vsub.f32 %v2722_v41, %v451_v29  ;;  %2263 = vlog2.f32 %v447_v37 }
 0x305   :  { %2265 = vlog2.f32 %v258_v20  ;;  %v2793_v63 = vsub.f32 %v2717_v36, %v268_v43 }
 0x306   :  { %v474_v38 = vmul.f32 1.442695, %v465_v35 }
 0x307   :  { %3995 = vst [vmem:[#allocation3_spill] sm:$0xff] %v2793_v63  ;;  %v492_v18 = vsub.f32 %v468_v32, %v2793_v63 }
 0x308   :  { %2267 = vpow2.f32 %v474_v38 }
 0x309   :  { %v2262_v42 = vpop.eup %2261  ;;  %2269 = vpow2.f32 %v480_v40 }
 0x30a   :  { %v262_v45 = vmul.f32 0.6931472, %v2262_v42  ;;  %v2264_v48 = vpop.eup %2263 }
 0x30b   :  { %v444_v51 = vpop.xlane.xlu2 %443  ;;  %v463_v53 = vmul.f32 0.6931472, %v2264_v48  ;;  %v441_v33 = vpop.xlane.xlu1 %440 }
 0x30c   :  { %v2790_v60 = vsub.f32 %v2727_v46, %v262_v45  ;;  %2271 = vlog2.f32 %v444_v51  ;;  %v2266_v41 = vpop.eup %2265 }
 0x30d   :  { %2273 = vlog2.f32 %v441_v33  ;;  %v471_v2 = vsub.f32 %v2730_v50, %v463_v53  ;;  %v274_v15 = vmul.f32 0.6931472, %v2266_v41 }
 0x30e   :  { %3994 = vst [vmem:[#allocation2_spill] sm:$0xff] %v2790_v60  ;;  %v2268_v61 = vpop.eup %2267  ;;  %v489_v9 = vsub.f32 %v465_v35, %v2790_v60 }
 0x30f   :  { %v486_v11 = vmul.f32 1.442695, %v471_v2  ;;  %v2270_v14 = vpop.eup %2269  ;;  %v2803_v24 = vsub.f32 %v2704_v25, %v274_v15 }
 0x310   :  { %v2797_v12 = vmul.f32 %v2268_v61, %v489_v9  ;;  %v500_v28 = vmul.f32 %v2270_v14, %v492_v18 }
 0x311   :  { %2275 = vpow2.f32 %v486_v11  ;;  %3996 = vst [vmem:[#allocation4_spill] sm:$0xff] %v2803_v24  ;;  %v495_v30 = vsub.f32 %v471_v2, %v2803_v24 }
 0x312   :  { %v2272_v17 = vpop.eup %2271  ;;  %v507_v46 = vsel %vm186_vm1, %v2797_v12, 0.0  ;;  %v516_v39 = vsel %vm186_vm1, %v500_v28, 0.0 }
 0x313   :  { %v2274_v20 = vpop.eup %2273  ;;  %v461_v21 = vmul.f32 0.6931472, %v2272_v17  ;;  %v255_v36 = vpop.xlane.xlu2 %254  ;;  %508 = vadd.xlane.f32.xlu0 %v507_v46 }
 0x314   :  { %v459_v23 = vmul.f32 0.6931472, %v2274_v20  ;;  %2277 = vlog2.f32 %v255_v36  ;;  %v252_v50 = vpop.xlane.xlu1 %251 }
 0x315   :  { %v470_v26 = vsub.f32 %v2740_v1, %v461_v21  ;;  %2279 = vlog2.f32 %v252_v50 }
 0x316   :  { %v469_v27 = vsub.f32 %v2736_v62, %v459_v23 }
 0x317   :  { %v484_v29 = vmul.f32 1.442695, %v470_v26  ;;  %v2276_v32 = vpop.eup %2275 }
 0x318   :  { %v482_v35 = vmul.f32 1.442695, %v469_v27  ;;  %v503_v37 = vmul.f32 %v2276_v32, %v495_v30 }
 0x319   :  { %2281 = vpow2.f32 %v484_v29 }
 0x31a   :  { %v2278_v38 = vpop.eup %2277  ;;  %2283 = vpow2.f32 %v482_v35  ;;  %2122 = vmatpush.xpose.msk.msrb.mxu3 %vm186_vm1, %v503_v37  ;;  %v525_v2 = vsel %vm186_vm1, %v503_v37, 0.0 }
 0x31b   :  { %v2280_v40 = vpop.eup %2279  ;;  %v272_v25 = vmul.f32 0.6931472, %v2278_v38  ;;  %v435_v1 = vpop.xlane.xlu2 %434  ;;  %517 = vadd.xlane.f32.xlu0 %v516_v39 }
 0x31c   :  { %v270_v42 = vmul.f32 0.6931472, %v2280_v40  ;;  %2285 = vlog2.f32 %v435_v1  ;;  %v432_v62 = vpop.xlane.xlu1 %431 }
 0x31d   :  { %v2811_v43 = vsub.f32 %v2743_v3, %v272_v25  ;;  %2287 = vlog2.f32 %v432_v62 }
 0x31e   :  { %v2814_v45 = vsub.f32 %v2750_v19, %v270_v42 }
 0x31f   :  { %3997 = vst [vmem:[#allocation5_spill] sm:$0xff] %v2811_v43  ;;  %v2282_v48 = vpop.eup %2281  ;;  %v494_v51 = vsub.f32 %v470_v26, %v2811_v43 }
 0x320   :  { %3998 = vst [vmem:[#allocation6_spill] sm:$0xff] %v2814_v45  ;;  %v2284_v53 = vpop.eup %2283  ;;  %v493_v41 = vsub.f32 %v469_v27, %v2814_v45 }
 0x321   :  { %v2817_v33 = vmul.f32 %v2282_v48, %v494_v51 }
 0x322   :  { %v2286_v61 = vpop.eup %2285  ;;  %v501_v17 = vmul.f32 %v2284_v53, %v493_v41  ;;  %v3947_v41 = vmov 1.0  }
 0x323   :  { %v2288_v9 = vpop.eup %2287  ;;  %v455_v11 = vmul.f32 0.6931472, %v2286_v61  ;;  %v246_v14 = vpop.xlane.xlu2 %245  ;;  %2123 = vmatpush.xpose.msk.msrb.mxu3 %vm186_vm1, %v2817_v33  ;;  %526 = vadd.xlane.f32.xlu0 %v525_v2  ;;  %v291_v61 = vlaneseq }
 0x324   :  { %v453_v3 = vmul.f32 0.6931472, %v2288_v9  ;;  %2289 = vlog2.f32 %v246_v14  ;;  %v243_v19 = vpop.xlane.xlu1 %242  ;;  %v519_v62 = vsel %vm186_vm1, %v501_v17, 0.0 }
 0x325   :  { %v467_v15 = vsub.f32 %v2753_v22, %v455_v11  ;;  %2291 = vlog2.f32 %v243_v19  ;;  %v2857_v11 = vshrl.u32 %v291_v61, 7 }
 0x326   :  { %v466_v46 = vsub.f32 %v2760_v31, %v453_v3  ;;  %v2861_v3 = vand.u32 127, %v291_v61 }
 0x327   :  { %v478_v18 = vmul.f32 1.442695, %v467_v15  ;;  %2124 = vmatpush.xpose.msk.msrb.mxu3 %vm186_vm1, %v501_v17  ;;  %4002 = vst [vmem:[#allocation10_spill] sm:$0xff] %v2857_v11  ;;  %v2864_v19 = vadd.s32 16, %v2857_v11 }
 0x328   :  { %v476_v20 = vmul.f32 1.442695, %v466_v46  ;;  %4003 = vst [vmem:[#allocation11_spill] sm:$0xff] %v2861_v3  ;;  %vm302_vm3 = vcmp.eq.s32.totalorder %v2857_v11, %v2861_v3 }
 0x329   :  { %2293 = vpow2.f32 %v478_v18  ;;  %4004 = vst [vmem:[#allocation12_spill] sm:$0xff] %v2864_v19  ;;  %vm3944_vm4 = vcmp.eq.s32.totalorder %v2864_v19, %v2861_v3  ;;  %v2878_v18 = vadd.s32 24, %v2857_v11 }
 0x32a   :  { %v2290_v21 = vpop.eup %2289  ;;  %2295 = vpow2.f32 %v476_v20 }
 0x32b   :  { %v2292_v36 = vpop.eup %2291  ;;  %v266_v23 = vmul.f32 0.6931472, %v2290_v21  ;;  %v426_v50 = vpop.xlane.xlu2 %425  ;;  %2125 = vmatpush.xpose.msk.msrb.mxu3 %vm186_vm1, %v500_v28  ;;  %4006 = vst [vmem:[#allocation14_spill] sm:$0xff] %v2878_v18  ;;  %v2886_v21 = vadd.s32 40, %v2857_v11  ;;  %vm3942_vm12 = vcmp.eq.s32.totalorder %v2878_v18, %v2861_v3 }
 0x32c   :  { %v264_v26 = vmul.f32 0.6931472, %v2292_v36  ;;  %2297 = vlog2.f32 %v426_v50  ;;  %v237_v27 = vpop.xlane.xlu1 %236  ;;  %v3945_v36 = vmov 0.0  }
 0x32d   :  { %v2828_v22 = vsub.f32 %v2763_v34, %v266_v23  ;;  %2299 = vlog2.f32 %v237_v27  ;;  %4007 = vst [vmem:[#allocation15_spill] sm:$0xff] %v2886_v21  ;;  %v2892_v27 = vadd.s32 32, %v2857_v11  ;;  %vm3941_vm13 = vcmp.eq.s32.totalorder %v2886_v21, %v2861_v3 }
 0x32e   :  { %v2831_v31 = vsub.f32 %v2770_v44, %v264_v26 }
 0x32f   :  { %3999 = vst [vmem:[#allocation7_spill] sm:$0xff] %v2828_v22  ;;  %v2294_v29 = vpop.eup %2293  ;;  %v491_v30 = vsub.f32 %v467_v15, %v2828_v22  ;;  %v2867_v15 = vadd.s32 8, %v2857_v11  ;;  %vm3943_vm14 = vcmp.eq.s32.totalorder %v2892_v27, %v2861_v3 }
 0x330   :  { %4000 = vst [vmem:[#allocation8_spill] sm:$0xff] %v2831_v31  ;;  %v2296_v32 = vpop.eup %2295  ;;  %v490_v35 = vsub.f32 %v466_v46, %v2831_v31 }
 0x331   :  { %v499_v37 = vmul.f32 %v2294_v29, %v491_v30  ;;  %4005 = vst [vmem:[#allocation13_spill] sm:$0xff] %v2867_v15  ;;  %vm303_vm5 = vcmp.eq.s32.totalorder %v2867_v15, %v2861_v3 }
 0x332   :  { %v2298_v38 = vpop.eup %2297  ;;  %v498_v39 = vmul.f32 %v2296_v32, %v490_v35  ;;  %4008 = vst [vmem:[#allocation16_spill] sm:$0xff] %v2892_v27 }
 0x333   :  { %v2300_v28 = vpop.eup %2299  ;;  %v449_v40 = vmul.f32 0.6931472, %v2298_v38  ;;  %2126 = vmatpush.xpose.msk.msrb.mxu3 %vm186_vm1, %v499_v37 }
 0x334   :  { %v510_v34 = vsel %vm186_vm1, %v498_v39, 0.0  ;;  %v260_v44 = vmul.f32 0.6931472, %v2300_v28 }
 0x335   :  { %v464_v25 = vsub.f32 %v2773_v47, %v449_v40  ;;  %511 = vadd.xlane.f32.xlu1 %v510_v34 }
 0x336   :  { %v2840_v42 = vsub.f32 %v2780_v0, %v260_v44  ;;  %v513_v0 = vsel %vm186_vm1, %v499_v37, 0.0 }
 0x337   :  { %v472_v1 = vmul.f32 1.442695, %v464_v25  ;;  %2127 = vmatpush.xpose.msk.msrb.mxu3 %vm186_vm1, %v498_v39 }
 0x338   :  { %4001 = vst [vmem:[#allocation9_spill] sm:$0xff] %v2840_v42  ;;  %v488_v48 = vsub.f32 %v464_v25, %v2840_v42 }
 0x339   :  { %2301 = vpow2.f32 %v472_v1 }
 0x33b   :  { %2128 = vmatpush.xpose.msk.msrb.mxu3 %vm186_vm1, %v2797_v12  ;;  %v522_v12 = vsel %vm186_vm1, %v2817_v33, 0.0 }
 0x33d   :  { %520 = vadd.xlane.f32.xlu1 %v519_v62 }
 0x33f   :  { %v2302_v51 = vpop.eup %2301 }
 0x340   :  { %v496_v53 = vmul.f32 %v2302_v51, %v488_v48  ;;  %v2932_v48 = vadd.s32 48, %v2857_v11 }
 0x342   :  { %2129 = vmatpush.xpose.msk.msrb.mxu3 %vm186_vm1, %v496_v53  ;;  %v504_v47 = vsel %vm186_vm1, %v496_v53, 0.0  ;;  %4009 = vst [vmem:[#allocation17_spill] sm:$0xff] %v2932_v48  ;;  %v2938_v53 = vadd.s32 56, %v2857_v11 }
 0x343   :  { %505 = vadd.xlane.f32.xlu2 %v504_v47 }
 0x344   :  { %4010 = vst [vmem:[#allocation18_spill] sm:$0xff] %v2938_v53 }
 0x345   :  { %2130 = vmatmul.msk.f32.vlgmr.msrb.gmra.mxu3 %vm186_vm1, %v3947_v41 }
 0x34b   :  { %514 = vadd.xlane.f32.xlu2 %v513_v0 }
 0x353   :  { %523 = vadd.xlane.f32.xlu2 %v522_v12 }
 0x386   :  { %v2855_v9 = vpop.xlane.xlu0 %508 }
 0x38e   :  { %v2880_v20 = vpop.xlane.xlu0 %517 }
 0x396   :  { %v2934_v51 = vpop.xlane.xlu0 %526 }
 0x3a8   :  { %v2859_v14 = vpop.xlane.xlu1 %511 }
 0x3b0   :  { %v2904_v35 = vpop.xlane.xlu1 %520 }
 0x3b6   :  { %v2853_v2 = vpop.xlane.xlu2 %505 }
 0x3be   :  { %v2869_v46 = vpop.xlane.xlu2 %514 }
 0x3c6   :  { %v2926_v1 = vpop.xlane.xlu2 %523 }
 0x3c8   :  { %v572_v17 = vpop.f32.mrf.mxu3 }
 0x3c9   :  { %v575_v33 = vperm.slane %v572_v17, 0 }
 0x3cb   :  { %vm576_vm6 = vcmp.le.f32.partialorder %v575_v33, %v2853_v2  ;;  %vm578_vm7 = vcmp.le.f32.partialorder %v575_v33, %v2859_v14  ;;  %vm577_vm8 = vcmp.le.f32.partialorder %v575_v33, %v2855_v9  ;;  %vm579_vm9 = vcmp.le.f32.partialorder %v575_v33, %v2869_v46 }
 0x3cc   :  { %v2131_v23 = vsel %vm576_vm6, 1.0, %v3945_v36  ;;  %v2133_v50 = vsel %vm578_vm7, 1.0, %v3945_v36  ;;  %v2132_v26 = vsel %vm577_vm8, 1.0, %v3945_v36  ;;  %vm581_vm10 = vcmp.le.f32.partialorder %v575_v33, %v2904_v35 }
 0x3cd   :  { %v600_v29 = vsel %vm302_vm3, 1.0, %v2131_v23  ;;  %v602_v30 = vsel %vm3944_vm4, 1.0, %v2133_v50  ;;  %v601_v32 = vsel %vm303_vm5, 1.0, %v2132_v26  ;;  %vm580_vm11 = vcmp.le.f32.partialorder %v575_v33, %v2880_v20 }
 0x3ce   :  { %v608_v37 = vsel %vm310_vm2, %v600_v29, 0.0  ;;  %v614_v38 = vsel %vm310_vm2, %v602_v30, 0.0  ;;  %v611_v39 = vsel %vm310_vm2, %v601_v32, 0.0  ;;  %v2134_v28 = vsel %vm579_vm9, 1.0, %v3945_v36 }
 0x3cf   :  { %609 = vadd.xlane.f32.xlu1 %v608_v37  ;;  %615 = vadd.xlane.f32.xlu0 %v614_v38  ;;  %v2136_v40 = vsel %vm581_vm10, 1.0, %v3945_v36  ;;  %v2135_v34 = vsel %vm580_vm11, 1.0, %v3945_v36  ;;  %v603_v25 = vsel %vm3942_vm12, 1.0, %v2134_v28  ;;  %vm582_vm15 = vcmp.le.f32.partialorder %v575_v33, %v2926_v1 }
 0x3d0   :  { %612 = vadd.xlane.f32.xlu2 %v611_v39  ;;  %v605_v44 = vsel %vm3941_vm13, 1.0, %v2136_v40  ;;  %v604_v62 = vsel %vm3943_vm14, 1.0, %v2135_v34  ;;  %v617_v47 = vsel %vm310_vm2, %v603_v25, 0.0  ;;  %vm583_vm0 = vcmp.le.f32.partialorder %v575_v33, %v2934_v51 }
 0x3d1   :  { %v623_v0 = vsel %vm310_vm2, %v605_v44, 0.0  ;;  %v620_v12 = vsel %vm310_vm2, %v604_v62, 0.0  ;;  %vm3939_vm6 = vcmp.eq.s32.totalorder %v2932_v48, %v2861_v3  ;;  %v2137_v61 = vsel %vm582_vm15, 1.0, %v3945_v36 }
 0x3d2   :  { %vm3940_vm7 = vcmp.eq.s32.totalorder %v2938_v53, %v2861_v3  ;;  %v2138_v17 = vsel %vm583_vm0, 1.0, %v3945_v36  ;;  %v606_v23 = vsel %vm3939_vm6, 1.0, %v2137_v61 }
 0x3d3   :  { %v607_v33 = vsel %vm3940_vm7, 1.0, %v2138_v17  ;;  %v626_v50 = vsel %vm310_vm2, %v606_v23, 0.0 }
 0x3d4   :  { %v629_v26 = vsel %vm310_vm2, %v607_v33, 0.0 }
 0x3d7   :  { %618 = vadd.xlane.f32.xlu1 %v617_v47  ;;  %624 = vadd.xlane.f32.xlu0 %v623_v0 }
 0x3d8   :  { %621 = vadd.xlane.f32.xlu2 %v620_v12 }
 0x3df   :  { %627 = vadd.xlane.f32.xlu1 %v626_v50 }
 0x3e0   :  { %630 = vadd.xlane.f32.xlu2 %v629_v26 }
 0x442   :  { %v610_v29 = vpop.xlane.xlu1 %609  ;;  %v616_v30 = vpop.xlane.xlu0 %615 }
 0x443   :  { %v613_v32 = vpop.xlane.xlu2 %612  ;;  %vm632_vm8 = vcmp.ge.f32.partialorder %v610_v29, 57.0  ;;  %vm661_vm9 = vcmp.ge.f32.partialorder %v610_v29, 58.0  ;;  %vm634_vm0 = vcmp.ge.f32.partialorder %v616_v30, 57.0  ;;  %vm663_vm12 = vcmp.ge.f32.partialorder %v616_v30, 58.0 }
 0x444   :  { %vm633_vm15 = vcmp.ge.f32.partialorder %v613_v32, 57.0  ;;  %v640_v28 = vsel %vm632_vm8, %v2853_v2, 1e+30  ;;  %v669_v40 = vsel %vm661_vm9, %v2853_v2, 1e+30  ;;  %vm662_vm13 = vcmp.ge.f32.partialorder %v613_v32, 58.0 }
 0x445   :  { %v641_v44 = vsel %vm633_vm15, %v2855_v9, 1e+30  ;;  %v670_v0 = vsel %vm662_vm13, %v2855_v9, 1e+30  ;;  %v642_v12 = vsel %vm634_vm0, %v2859_v14, 1e+30 }
 0x446   :  { %v671_v61 = vsel %vm663_vm12, %v2859_v14, 1e+30 }
 0x44a   :  { %v619_v37 = vpop.xlane.xlu1 %618  ;;  %v625_v38 = vpop.xlane.xlu0 %624 }
 0x44b   :  { %v622_v39 = vpop.xlane.xlu2 %621  ;;  %vm637_vm6 = vcmp.ge.f32.partialorder %v625_v38, 57.0  ;;  %vm666_vm7 = vcmp.ge.f32.partialorder %v625_v38, 58.0  ;;  %vm635_vm14 = vcmp.ge.f32.partialorder %v619_v37, 57.0  ;;  %vm664_vm4 = vcmp.ge.f32.partialorder %v619_v37, 58.0 }
 0x44c   :  { %vm636_vm10 = vcmp.ge.f32.partialorder %v622_v39, 57.0  ;;  %vm665_vm11 = vcmp.ge.f32.partialorder %v622_v39, 58.0  ;;  %v645_v62 = vsel %vm637_vm6, %v2904_v35, 1e+30  ;;  %v674_v47 = vsel %vm666_vm7, %v2904_v35, 1e+30 }
 0x44d   :  { %v644_v34 = vsel %vm636_vm10, %v2880_v20, 1e+30  ;;  %v673_v25 = vsel %vm665_vm11, %v2880_v20, 1e+30  ;;  %v643_v17 = vsel %vm635_vm14, %v2869_v46, 1e+30  ;;  %v649_v29 = vmin.f32 %v641_v44, %v645_v62 }
 0x44e   :  { %v672_v23 = vsel %vm664_vm4, %v2869_v46, 1e+30  ;;  %v648_v33 = vmin.f32 %v640_v28, %v644_v34  ;;  %v677_v50 = vmin.f32 %v669_v40, %v673_v25  ;;  %v678_v30 = vmin.f32 %v670_v0, %v674_v47 }
 0x450   :  { %v652_v34 = vmin.f32 %v648_v33, %v649_v29  ;;  %v681_v25 = vmin.f32 %v677_v50, %v678_v30  ;;  %v2979_v33 = vmul.f32 0.1, %v2603_v49 }
 0x452   :  { %v628_v26 = vpop.xlane.xlu1 %627 }
 0x453   :  { %vm638_vm8 = vcmp.ge.f32.partialorder %v628_v26, 57.0  ;;  %vm667_vm9 = vcmp.ge.f32.partialorder %v628_v26, 58.0  ;;  %v631_v32 = vpop.xlane.xlu2 %630 }
 0x454   :  { %v646_v37 = vsel %vm638_vm8, %v2926_v1, 1e+30  ;;  %v675_v38 = vsel %vm667_vm9, %v2926_v1, 1e+30  ;;  %vm639_vm13 = vcmp.ge.f32.partialorder %v631_v32, 57.0  ;;  %vm668_vm6 = vcmp.ge.f32.partialorder %v631_v32, 58.0 }
 0x455   :  { %v650_v39 = vmin.f32 %v642_v12, %v646_v37  ;;  %v679_v36 = vmin.f32 %v671_v61, %v675_v38  ;;  %v647_v41 = vsel %vm639_vm13, %v2934_v51, 1e+30  ;;  %v676_v48 = vsel %vm668_vm6, %v2934_v51, 1e+30 }
 0x456   :  { %v651_v28 = vmin.f32 %v643_v17, %v647_v41  ;;  %v680_v40 = vmin.f32 %v672_v23, %v676_v48  ;;  %v2975_v17 = vmul.f32 0.1, %v2612_v54 }
 0x458   :  { %v653_v44 = vmin.f32 %v650_v39, %v651_v28  ;;  %v682_v62 = vmin.f32 %v679_v36, %v680_v40  ;;  %v724_v36 = vmul.f32 0.9, %v2687_v16 }
 0x45a   :  { %v654_v47 = vmin.f32 %v652_v34, %v653_v44  ;;  %v683_v0 = vmin.f32 %v681_v25, %v682_v62  ;;  %v736_v25 = vsub.f32 %v2669_v7, %v2618_v56  ;;  %v3011_v44 = vmul.f32 0.1, %v2615_v55 }
 0x45c   :  { %v655_v26 = vrot.slane %v654_v47, 4  ;;  %v684_v53 = vrot.slane %v683_v0, 4 }
 0x45e   :  { %v656_v21 = vmin.f32 %v654_v47, %v655_v26  ;;  %v685_v18 = vmin.f32 %v683_v0, %v684_v53  ;;  %v723_v53 = vmul.f32 0.9, %v2681_v13  ;;  %v719_v0 = vmul.f32 0.9, %v2667_v6 }
 0x45f   :  { %v3020_v26 = vmul.f32 0.1, %v2618_v56 }
 0x460   :  { %v657_v27 = vrot.slane %v656_v21, 2  ;;  %v686_v32 = vrot.slane %v685_v18, 2  ;;  %v731_v40 = vadd.f32 %v723_v53, %v2979_v33  ;;  %v717_v53 = vmul.f32 0.9, %v2663_v4 }
 0x462   :  { %v658_v12 = vmin.f32 %v656_v21, %v657_v27  ;;  %v687_v61 = vmin.f32 %v685_v18, %v686_v32  ;;  %v739_v18 = vsub.f32 %v2681_v13, %v2603_v49  ;;  %v2985_v21 = vmul.f32 0.1, %v2607_v52 }
 0x463   :  { %v3963_v27 = vmov 0.1  }
 0x464   :  { %v659_v37 = vrot.slane %v658_v12, 1  ;;  %v688_v38 = vrot.slane %v687_v61, 1 }
 0x466   :  { %v660_v19 = vmin.f32 %v658_v12, %v659_v37  ;;  %v689_v11 = vmin.f32 %v687_v61, %v688_v38  ;;  %v718_v37 = vmul.f32 0.9, %v2665_v5 }
 0x468   :  { %v690_v41 = vsub.f32 %v689_v11, %v660_v19  ;;  %v740_v11 = vsub.f32 %v2687_v16, %v2607_v52  ;;  %v738_v16 = vsub.f32 %v2675_v10, %v2612_v54 }
 0x46a   :  { %v691_v48 = vmul.f32 0.7, %v690_v41 }
 0x46c   :  { %v692_v23 = vadd.f32 %v691_v48, %v660_v19  ;;  %v722_v19 = vmul.f32 0.9, %v2675_v10  ;;  %v720_v10 = vmul.f32 0.9, %v2669_v7 }
 0x46e   :  { %vm700_vm4 = vcmp.lt.f32.partialorder %v2934_v51, %v692_v23  ;;  %vm699_vm12 = vcmp.lt.f32.partialorder %v2926_v1, %v692_v23  ;;  %vm698_vm14 = vcmp.lt.f32.partialorder %v2904_v35, %v692_v23  ;;  %vm697_vm7 = vcmp.lt.f32.partialorder %v2880_v20, %v692_v23 }
 0x46f   :  { %v708_v50 = vsel %vm700_vm4, 0.0, %v3963_v27  ;;  %v707_v13 = vsel %vm699_vm12, 0.0, %v3963_v27  ;;  %v706_v29 = vsel %vm698_vm14, 0.0, %v3963_v27  ;;  %v732_v51 = vadd.f32 %v724_v36, %v2985_v21 }
 0x470   :  { %v748_v30 = vmul.f32 %v740_v11, %v708_v50  ;;  %v747_v1 = vmul.f32 %v739_v18, %v707_v13  ;;  %v721_v35 = vmul.f32 0.9, %v2671_v8  ;;  %v737_v20 = vsub.f32 %v2671_v8, %v2615_v55 }
 0x471   :  { %v705_v39 = vsel %vm697_vm7, 0.0, %v3963_v27  ;;  %vm696_vm10 = vcmp.lt.f32.partialorder %v2869_v46, %v692_v23  ;;  %v746_v34 = vmul.f32 %v738_v16, %v706_v29  ;;  %vm695_vm11 = vcmp.lt.f32.partialorder %v2859_v14, %v692_v23 }
 0x472   :  { %v756_v28 = vadd.f32 %v748_v30, %v732_v51  ;;  %v704_v8 = vsel %vm696_vm10, 0.0, %v3963_v27  ;;  %v755_v62 = vadd.f32 %v747_v1, %v731_v40  ;;  %v730_v46 = vadd.f32 %v722_v19, %v2975_v17  ;;  %v3084_v40 = vld [vmem:[%s3937_s5 + $0x28] sm:$0xff] }
 0x473   :  { %v745_v47 = vmul.f32 %v737_v20, %v705_v39  ;;  %vm694_vm15 = vcmp.lt.f32.partialorder %v2855_v9, %v692_v23  ;;  %v735_v14 = vsub.f32 %v2667_v6, %v2621_v57  ;;  %v703_v7 = vsel %vm695_vm11, 0.0, %v3963_v27  ;;  %v3063_v20 = vld [vmem:[%s3937_s5 + $0x10] sm:$0xff]  ;;  %v3070_v39 = vld [vmem:[%s3937_s5 + $0x18] sm:$0xff]  ;;  %4014 = vst [vmem:[#allocation22_spill] sm:$0xff] %v3084_v40 }
 0x474   :  { %765 = vmatpush.msra.mxu3 %v756_v28  ;;  %v754_v32 = vadd.f32 %v746_v34, %v730_v46  ;;  %v729_v12 = vadd.f32 %v721_v35, %v3011_v44  ;;  %v744_v61 = vmul.f32 %v736_v25, %v704_v8  ;;  %vm693_vm0 = vcmp.lt.f32.partialorder %v2853_v2, %v692_v23  ;;  %v3056_v35 = vld [vmem:[%s3937_s5 + $0x8] sm:$0xff]  ;;  %v3077_v28 = vld [vmem:[%s3937_s5 + $0x20] sm:$0xff]  ;;  %v3091_v34 = vld [vmem:[%s3937_s5 + $0x30] sm:$0xff] }
 0x475   :  { %v3027_v9 = vmul.f32 0.1, %v2621_v57  ;;  %v702_v38 = vsel %vm694_vm15, 0.0, %v3963_v27  ;;  %v734_v6 = vsub.f32 %v2665_v5, %v2624_v58  ;;  %v728_v48 = vadd.f32 %v720_v10, %v3020_v26  ;;  %4011 = vst [vmem:[#allocation19_spill] sm:$0xff] %v3063_v20  ;;  %v3098_v10 = vld [vmem:[%s3937_s5 + $0x38] sm:$0xff] }
 0x476   :  { %766 = vmatpush.msra.mxu3 %v755_v62  ;;  %v753_v41 = vadd.f32 %v745_v47, %v729_v12  ;;  %v743_v36 = vmul.f32 %v735_v14, %v703_v7  ;;  %v3035_v18 = vmul.f32 0.1, %v2624_v58  ;;  %v701_v2 = vsel %vm693_vm0, 0.0, %v3963_v27  ;;  %4012 = vst [vmem:[#allocation20_spill] sm:$0xff] %v3070_v39 }
 0x477   :  { %v733_v23 = vsub.f32 %v2663_v4, %v2627_v59  ;;  %v752_v11 = vadd.f32 %v744_v61, %v728_v48  ;;  %v727_v19 = vadd.f32 %v719_v0, %v3027_v9  ;;  %v742_v5 = vmul.f32 %v734_v6, %v702_v38  ;;  %v3049_v4 = vld [vmem:[%s3937_s5] sm:$0xff]  ;;  %4013 = vst [vmem:[#allocation21_spill] sm:$0xff] %v3077_v28 }
 0x478   :  { %767 = vmatpush.msra.mxu3 %v754_v32  ;;  %v726_v13 = vadd.f32 %v718_v37, %v3035_v18  ;;  %v3043_v29 = vmul.f32 0.1, %v2627_v59  ;;  %4015 = vst [vmem:[#allocation23_spill] sm:$0xff] %v3091_v34 }
 0x479   :  { %v751_v50 = vadd.f32 %v743_v36, %v727_v19  ;;  %v741_v16 = vmul.f32 %v733_v23, %v701_v2  ;;  %4016 = vst [vmem:[#allocation24_spill] sm:$0xff] %v3098_v10 }
 0x47a   :  { %768 = vmatpush.msra.mxu3 %v753_v41  ;;  %v750_v51 = vadd.f32 %v742_v5, %v726_v13  ;;  %v725_v30 = vadd.f32 %v717_v53, %v3043_v29 }
 0x47c   :  { %769 = vmatpush.msra.mxu3 %v752_v11  ;;  %v749_v1 = vadd.f32 %v741_v16, %v725_v30 }
 0x47e   :  { %770 = vmatpush.msra.mxu3 %v751_v50 }
 0x480   :  { %771 = vmatpush.msra.mxu3 %v750_v51 }
 0x482   :  { %772 = vmatpush.msra.mxu3 %v749_v1 }
 0x483   :  { %2139 = vmatmul.msk.f32.vlgmr.msra.gmra.mxu3 %vm310_vm2, %v3049_v4 }
 0x48b   :  { %2140 = vmatmul.msk.f32.gmra.mxu3 %vm310_vm2, %v3056_v35 }
 0x493   :  { %2141 = vmatmul.msk.f32.gmra.mxu3 %vm310_vm2, %v3063_v20 }
 0x49b   :  { %2142 = vmatmul.msk.f32.gmra.mxu3 %vm310_vm2, %v3070_v39 }
 0x4a3   :  { %2143 = vmatmul.msk.f32.gmra.mxu3 %vm310_vm2, %v3077_v28 }
 0x4ab   :  { %2144 = vmatmul.msk.f32.gmra.mxu3 %vm310_vm2, %v3084_v40 }
 0x4b3   :  { %2145 = vmatmul.msk.f32.gmra.mxu3 %vm310_vm2, %v3091_v34 }
 0x4bb   :  { %2146 = vmatmul.msk.f32.gmra.mxu3 %vm310_vm2, %v3098_v10 }
 0x506   :  { %v3102_v25 = vpop.f32.mrf.mxu3 }
 0x507   :  { %v798_v6 = vsel %vm186_vm1, %v3102_v25, -inf }
 0x50e   :  { %v3104_v8 = vpop.f32.mrf.mxu3 }
 0x50f   :  { %v801_v48 = vsel %vm186_vm1, %v3104_v8, -inf }
 0x516   :  { %v3106_v62 = vpop.f32.mrf.mxu3 }
 0x517   :  { %v804_v32 = vsel %vm186_vm1, %v3106_v62, -inf }
 0x51e   :  { %v3108_v46 = vpop.f32.mrf.mxu3 }
 0x51f   :  { %v807_v37 = vsel %vm186_vm1, %v3108_v46, -inf }
 0x526   :  { %v3110_v47 = vpop.f32.mrf.mxu3 }
 0x527   :  { %v810_v41 = vsel %vm186_vm1, %v3110_v47, -inf }
 0x52e   :  { %v3112_v0 = vpop.f32.mrf.mxu3 }
 0x52f   :  { %v813_v14 = vsel %vm186_vm1, %v3112_v0, -inf }
 0x530   :  { %814 = vmax.xlane.f32.xlu2 %v813_v14 }
 0x536   :  { %v3116_v7 = vpop.f32.mrf.mxu3 }
 0x537   :  { %v816_v12 = vsel %vm186_vm1, %v3116_v7, -inf }
 0x538   :  { %805 = vmax.xlane.f32.xlu2 %v804_v32  ;;  %817 = vmax.xlane.f32.xlu1 %v816_v12 }
 0x53e   :  { %v3122_v61 = vpop.f32.mrf.mxu3 }
 0x53f   :  { %v819_v38 = vsel %vm186_vm1, %v3122_v61, -inf }
 0x540   :  { %808 = vmax.xlane.f32.xlu1 %v807_v37  ;;  %820 = vmax.xlane.f32.xlu0 %v819_v38 }
 0x548   :  { %799 = vmax.xlane.f32.xlu1 %v798_v6  ;;  %811 = vmax.xlane.f32.xlu0 %v810_v41 }
 0x550   :  { %802 = vmax.xlane.f32.xlu0 %v801_v48 }
 0x5a3   :  { %v815_v36 = vpop.xlane.xlu2 %814 }
 0x5a4   :  { %v3135_v53 = vsub.f32 %v3112_v0, %v815_v36 }
 0x5a6   :  { %v840_v2 = vmul.f32 1.442695, %v3135_v53 }
 0x5a8   :  { %2303 = vpow2.f32 %v840_v2 }
 0x5ab   :  { %v806_v23 = vpop.xlane.xlu2 %805  ;;  %v818_v11 = vpop.xlane.xlu1 %817 }
 0x5ac   :  { %v3139_v19 = vsub.f32 %v3106_v62, %v806_v23  ;;  %v3142_v5 = vsub.f32 %v3116_v7, %v818_v11 }
 0x5ae   :  { %v2304_v50 = vpop.eup %2303  ;;  %v834_v13 = vmul.f32 1.442695, %v3139_v19  ;;  %v842_v16 = vmul.f32 1.442695, %v3142_v5 }
 0x5af   :  { %v861_v51 = vsel %vm186_vm1, %v2304_v50, 0.0 }
 0x5b0   :  { %2305 = vpow2.f32 %v834_v13  ;;  %862 = vadd.xlane.f32.xlu1 %v861_v51 }
 0x5b1   :  { %2307 = vpow2.f32 %v842_v16 }
 0x5b3   :  { %v809_v30 = vpop.xlane.xlu1 %808  ;;  %v821_v1 = vpop.xlane.xlu0 %820 }
 0x5b4   :  { %v3148_v14 = vsub.f32 %v3108_v46, %v809_v30  ;;  %v3151_v32 = vsub.f32 %v3122_v61, %v821_v1 }
 0x5b6   :  { %v2306_v12 = vpop.eup %2305  ;;  %v836_v37 = vmul.f32 1.442695, %v3148_v14  ;;  %v844_v38 = vmul.f32 1.442695, %v3151_v32 }
 0x5b7   :  { %v2308_v6 = vpop.eup %2307  ;;  %v852_v41 = vsel %vm186_vm1, %v2306_v12, 0.0 }
 0x5b8   :  { %2309 = vpow2.f32 %v836_v37  ;;  %853 = vadd.xlane.f32.xlu1 %v852_v41  ;;  %v864_v48 = vsel %vm186_vm1, %v2308_v6, 0.0 }
 0x5b9   :  { %2311 = vpow2.f32 %v844_v38  ;;  %865 = vadd.xlane.f32.xlu0 %v864_v48 }
 0x5bb   :  { %v800_v36 = vpop.xlane.xlu1 %799  ;;  %v812_v2 = vpop.xlane.xlu0 %811 }
 0x5bc   :  { %v3158_v23 = vsub.f32 %v3102_v25, %v800_v36  ;;  %v3161_v11 = vsub.f32 %v3110_v47, %v812_v2 }
 0x5be   :  { %v2310_v50 = vpop.eup %2309  ;;  %v830_v13 = vmul.f32 1.442695, %v3158_v23  ;;  %v838_v16 = vmul.f32 1.442695, %v3161_v11 }
 0x5bf   :  { %v2312_v51 = vpop.eup %2311  ;;  %v855_v30 = vsel %vm186_vm1, %v2310_v50, 0.0 }
 0x5c0   :  { %2313 = vpow2.f32 %v830_v13  ;;  %v867_v1 = vsel %vm186_vm1, %v2312_v51, 0.0 }
 0x5c1   :  { %2315 = vpow2.f32 %v838_v16  ;;  %856 = vadd.xlane.f32.xlu0 %v855_v30  ;;  %868 = vadd.xlane.f32.xlu2 %v867_v1 }
 0x5c3   :  { %v803_v12 = vpop.xlane.xlu0 %802 }
 0x5c4   :  { %v3168_v37 = vsub.f32 %v3104_v8, %v803_v12 }
 0x5c6   :  { %v2314_v38 = vpop.eup %2313  ;;  %v832_v6 = vmul.f32 1.442695, %v3168_v37 }
 0x5c7   :  { %v2316_v41 = vpop.eup %2315  ;;  %v846_v48 = vsel %vm186_vm1, %v2314_v38, 0.0 }
 0x5c8   :  { %2317 = vpow2.f32 %v832_v6  ;;  %v858_v36 = vsel %vm186_vm1, %v2316_v41, 0.0 }
 0x5c9   :  { %847 = vadd.xlane.f32.xlu0 %v846_v48  ;;  %859 = vadd.xlane.f32.xlu2 %v858_v36 }
 0x5ce   :  { %v2318_v2 = vpop.eup %2317 }
 0x5cf   :  { %v849_v50 = vsel %vm186_vm1, %v2318_v2, 0.0 }
 0x5d1   :  { %850 = vadd.xlane.f32.xlu2 %v849_v50 }
 0x623   :  { %v863_v13 = vpop.xlane.xlu1 %862 }
 0x624   :  { %2319 = vlog2.f32 %v863_v13 }
 0x62a   :  { %v2320_v30 = vpop.eup %2319 }
 0x62b   :  { %v854_v16 = vpop.xlane.xlu1 %853  ;;  %v881_v1 = vmul.f32 0.6931472, %v2320_v30 }
 0x62c   :  { %2321 = vlog2.f32 %v854_v16  ;;  %v866_v51 = vpop.xlane.xlu0 %865 }
 0x62d   :  { %2323 = vlog2.f32 %v866_v51  ;;  %v891_v38 = vsub.f32 %v3135_v53, %v881_v1 }
 0x62f   :  { %v904_v50 = vmul.f32 1.442695, %v891_v38 }
 0x632   :  { %v2322_v12 = vpop.eup %2321 }
 0x633   :  { %v875_v27 = vmul.f32 0.6931472, %v2322_v12  ;;  %v2324_v48 = vpop.eup %2323 }
 0x634   :  { %v869_v6 = vpop.xlane.xlu2 %868  ;;  %v857_v41 = vpop.xlane.xlu0 %856  ;;  %v883_v10 = vmul.f32 0.6931472, %v2324_v48 }
 0x635   :  { %v888_v36 = vsub.f32 %v3139_v19, %v875_v27  ;;  %2325 = vlog2.f32 %v869_v6 }
 0x636   :  { %v892_v16 = vsub.f32 %v3142_v5, %v883_v10 }
 0x637   :  { %v898_v2 = vmul.f32 1.442695, %v888_v36  ;;  %v912_v1 = vsub.f32 %v888_v36, %v2831_v31 }
 0x638   :  { %v906_v6 = vmul.f32 1.442695, %v892_v16 }
 0x639   :  { %2327 = vpow2.f32 %v898_v2 }
 0x63a   :  { %2329 = vlog2.f32 %v857_v41 }
 0x63b   :  { %v2326_v13 = vpop.eup %2325  ;;  %2331 = vpow2.f32 %v904_v50 }
 0x63c   :  { %v885_v51 = vmul.f32 0.6931472, %v2326_v13  ;;  %v860_v30 = vpop.xlane.xlu2 %859  ;;  %v848_v12 = vpop.xlane.xlu0 %847 }
 0x63d   :  { %2333 = vlog2.f32 %v860_v30 }
 0x63e   :  { %v893_v53 = vsub.f32 %v3151_v32, %v885_v51  ;;  %2335 = vlog2.f32 %v848_v12  ;;  %v915_v32 = vsub.f32 %v891_v38, %v2814_v45 }
 0x63f   :  { %v2328_v27 = vpop.eup %2327 }
 0x640   :  { %v2330_v19 = vpop.eup %2329  ;;  %v908_v34 = vmul.f32 1.442695, %v893_v53  ;;  %v920_v48 = vmul.f32 %v2328_v27, %v912_v1  ;;  %v917_v27 = vsub.f32 %v893_v53, %v2803_v24 }
 0x641   :  { %v2332_v2 = vpop.eup %2331  ;;  %v877_v10 = vmul.f32 0.6931472, %v2330_v19 }
 0x642   :  { %2337 = vpow2.f32 %v908_v34  ;;  %v932_v41 = vsel %vm186_vm1, %v920_v48, 0.0  ;;  %v923_v12 = vmul.f32 %v2332_v2, %v915_v32 }
 0x643   :  { %v2334_v50 = vpop.eup %2333  ;;  %933 = vadd.xlane.f32.xlu0 %v932_v41  ;;  %2339 = vpow2.f32 %v906_v6  ;;  %v889_v1 = vsub.f32 %v3148_v14, %v877_v10 }
 0x644   :  { %v2336_v5 = vpop.eup %2335  ;;  %v879_v13 = vmul.f32 0.6931472, %v2334_v50  ;;  %v851_v30 = vpop.xlane.xlu2 %850  ;;  %v941_v50 = vsel %vm186_vm1, %v923_v12, 0.0 }
 0x645   :  { %v871_v51 = vmul.f32 0.6931472, %v2336_v5  ;;  %2341 = vlog2.f32 %v851_v30  ;;  %v900_v38 = vmul.f32 1.442695, %v889_v1 }
 0x646   :  { %v890_v36 = vsub.f32 %v3161_v11, %v879_v13  ;;  %v916_v11 = vsub.f32 %v892_v16, %v2811_v43 }
 0x647   :  { %v886_v34 = vsub.f32 %v3158_v23, %v871_v51 }
 0x648   :  { %v2338_v31 = vpop.eup %2337  ;;  %v902_v19 = vmul.f32 1.442695, %v890_v36  ;;  %v914_v30 = vsub.f32 %v890_v36, %v2793_v63 }
 0x649   :  { %v894_v41 = vmul.f32 1.442695, %v886_v34  ;;  %v925_v40 = vmul.f32 %v2338_v31, %v917_v27  ;;  %v2340_v6 = vpop.eup %2339  ;;  %v910_v2 = vsub.f32 %v886_v34, %v2840_v42 }
 0x64a   :  { %v924_v23 = vmul.f32 %v2340_v6, %v916_v11  ;;  %v4017_v6 = vmov 1.0  }
 0x64b   :  { %v2342_v28 = vpop.eup %2341  ;;  %2343 = vpow2.f32 %v894_v41  ;;  %2147 = vmatpush.xpose.msk.msrb.mxu0 %vm186_vm1, %v925_v40  ;;  %942 = vadd.xlane.f32.xlu0 %v941_v50  ;;  %v947_v50 = vsel %vm186_vm1, %v925_v40, 0.0  ;;  %v4018_v40 = vmov 0.0  }
 0x64c   :  { %2345 = vpow2.f32 %v902_v19  ;;  %v873_v14 = vmul.f32 0.6931472, %v2342_v28  ;;  %v944_v41 = vsel %vm186_vm1, %v924_v23, 0.0 }
 0x64d   :  { %2347 = vpow2.f32 %v900_v38 }
 0x64e   :  { %v887_v53 = vsub.f32 %v3168_v37, %v873_v14  ;;  %v913_v37 = vsub.f32 %v889_v1, %v2828_v22 }
 0x64f   :  { %2148 = vmatpush.xpose.msk.msrb.mxu0 %vm186_vm1, %v924_v23 }
 0x650   :  { %v896_v31 = vmul.f32 1.442695, %v887_v53  ;;  %v911_v51 = vsub.f32 %v887_v53, %v2790_v60 }
 0x651   :  { %v2344_v10 = vpop.eup %2343 }
 0x652   :  { %v2346_v5 = vpop.eup %2345  ;;  %2349 = vpow2.f32 %v896_v31  ;;  %v918_v13 = vmul.f32 %v2344_v10, %v910_v2 }
 0x653   :  { %2149 = vmatpush.xpose.msk.msrb.mxu0 %vm186_vm1, %v923_v12  ;;  %v2348_v28 = vpop.eup %2347  ;;  %v922_v32 = vmul.f32 %v2346_v5, %v914_v30 }
 0x654   :  { %v926_v16 = vsel %vm186_vm1, %v918_v13, 0.0  ;;  %v921_v27 = vmul.f32 %v2348_v28, %v913_v37  ;;  %v4020_v28 = vld [vmem:[#allocation12_spill] sm:$0xff] }
 0x655   :  { %927 = vadd.xlane.f32.xlu1 %v926_v16  ;;  %v938_v1 = vsel %vm186_vm1, %v922_v32, 0.0  ;;  %vm4021_vm6 = vcmp.eq.s32.totalorder %v4020_v28, %v2861_v3 }
 0x656   :  { %v935_v36 = vsel %vm186_vm1, %v921_v27, 0.0 }
 0x657   :  { %2150 = vmatpush.xpose.msk.msrb.mxu0 %vm186_vm1, %v922_v32 }
 0x658   :  { %v2350_v34 = vpop.eup %2349 }
 0x659   :  { %v919_v19 = vmul.f32 %v2350_v34, %v911_v51 }
 0x65b   :  { %2151 = vmatpush.xpose.msk.msrb.mxu0 %vm186_vm1, %v921_v27  ;;  %v929_v12 = vsel %vm186_vm1, %v919_v19, 0.0 }
 0x65c   :  { %930 = vadd.xlane.f32.xlu2 %v929_v12 }
 0x65d   :  { %936 = vadd.xlane.f32.xlu1 %v935_v36 }
 0x65f   :  { %2152 = vmatpush.xpose.msk.msrb.mxu0 %vm186_vm1, %v920_v48 }
 0x663   :  { %2153 = vmatpush.xpose.msk.msrb.mxu0 %vm186_vm1, %v919_v19 }
 0x664   :  { %939 = vadd.xlane.f32.xlu2 %v938_v1  ;;  %v4022_v1 = vld [vmem:[#allocation16_spill] sm:$0xff] }
 0x665   :  { %945 = vadd.xlane.f32.xlu1 %v944_v41  ;;  %vm4023_vm7 = vcmp.eq.s32.totalorder %v4022_v1, %v2861_v3 }
 0x667   :  { %2154 = vmatpush.xpose.msk.msrb.mxu0 %vm186_vm1, %v918_v13 }
 0x66a   :  { %2155 = vmatmul.msk.f32.vlgmr.msrb.gmra.mxu0 %vm186_vm1, %v4017_v6 }
 0x66c   :  { %948 = vadd.xlane.f32.xlu2 %v947_v50  ;;  %v4024_v50 = vld [vmem:[#allocation14_spill] sm:$0xff] }
 0x66d   :  { %vm4025_vm10 = vcmp.eq.s32.totalorder %v4024_v50, %v2861_v3 }
 0x6b6   :  { %v3212_v48 = vpop.xlane.xlu0 %933 }
 0x6be   :  { %v3234_v37 = vpop.xlane.xlu0 %942 }
 0x6c8   :  { %v3208_v38 = vpop.xlane.xlu1 %927 }
 0x6cf   :  { %v3210_v11 = vpop.xlane.xlu2 %930 }
 0x6d0   :  { %v3214_v31 = vpop.xlane.xlu1 %936 }
 0x6d7   :  { %v3216_v23 = vpop.xlane.xlu2 %939 }
 0x6e7   :  { %v991_v14 = vpop.f32.mrf.mxu0 }
 0x6e8   :  { %v994_v53 = vperm.slane %v991_v14, 0 }
 0x6ea   :  { %vm996_vm8 = vcmp.le.f32.partialorder %v994_v53, %v3210_v11  ;;  %vm995_vm9 = vcmp.le.f32.partialorder %v994_v53, %v3208_v38  ;;  %vm997_vm13 = vcmp.le.f32.partialorder %v994_v53, %v3212_v48  ;;  %vm999_vm4 = vcmp.le.f32.partialorder %v994_v53, %v3216_v23 }
 0x6eb   :  { %v2157_v2 = vsel %vm996_vm8, 1.0, %v4018_v40  ;;  %v2156_v10 = vsel %vm995_vm9, 1.0, %v4018_v40  ;;  %v2158_v5 = vsel %vm997_vm13, 1.0, %v4018_v40  ;;  %vm998_vm12 = vcmp.le.f32.partialorder %v994_v53, %v3214_v31 }
 0x6ec   :  { %v1020_v13 = vsel %vm303_vm5, 1.0, %v2157_v2  ;;  %v1019_v16 = vsel %vm302_vm3, 1.0, %v2156_v10  ;;  %v1021_v32 = vsel %vm4021_vm6, 1.0, %v2158_v5  ;;  %vm1000_vm14 = vcmp.le.f32.partialorder %v994_v53, %v3234_v37  ;;  %v3250_v2 = vpop.xlane.xlu1 %945  ;;  %v3252_v10 = vpop.xlane.xlu2 %948  ;;  %v4026_v5 = vld [vmem:[#allocation15_spill] sm:$0xff] }
 0x6ed   :  { %v1030_v51 = vsel %vm310_vm2, %v1020_v13, 0.0  ;;  %v1027_v34 = vsel %vm310_vm2, %v1019_v16, 0.0  ;;  %v1033_v27 = vsel %vm310_vm2, %v1021_v32, 0.0  ;;  %v2160_v19 = vsel %vm999_vm4, 1.0, %v4018_v40 }
 0x6ee   :  { %1031 = vadd.xlane.f32.xlu1 %v1030_v51  ;;  %1028 = vadd.xlane.f32.xlu0 %v1027_v34  ;;  %v2159_v12 = vsel %vm998_vm12, 1.0, %v4018_v40  ;;  %v2161_v36 = vsel %vm1000_vm14, 1.0, %v4018_v40  ;;  %v1023_v41 = vsel %vm4023_vm7, 1.0, %v2160_v19  ;;  %vm4027_vm11 = vcmp.eq.s32.totalorder %v4026_v5, %v2861_v3  ;;  %v4028_v19 = vld [vmem:[#allocation18_spill] sm:$0xff] }
 0x6ef   :  { %1034 = vadd.xlane.f32.xlu2 %v1033_v27  ;;  %v1022_v14 = vsel %vm4025_vm10, 1.0, %v2159_v12  ;;  %v1024_v13 = vsel %vm4027_vm11, 1.0, %v2161_v36  ;;  %vm1002_vm15 = vcmp.le.f32.partialorder %v994_v53, %v3252_v10  ;;  %vm1001_vm0 = vcmp.le.f32.partialorder %v994_v53, %v3250_v2  ;;  %v4030_v36 = vld [vmem:[#allocation17_spill] sm:$0xff] }
 0x6f0   :  { %v1039_v16 = vsel %vm310_vm2, %v1023_v41, 0.0  ;;  %v1036_v32 = vsel %vm310_vm2, %v1022_v14, 0.0  ;;  %v1042_v51 = vsel %vm310_vm2, %v1024_v13, 0.0  ;;  %v2163_v34 = vsel %vm1002_vm15, 1.0, %v4018_v40 }
 0x6f1   :  { %v2162_v27 = vsel %vm1001_vm0, 1.0, %v4018_v40  ;;  %vm4029_vm8 = vcmp.eq.s32.totalorder %v4028_v19, %v2861_v3  ;;  %vm4031_vm9 = vcmp.eq.s32.totalorder %v4030_v36, %v2861_v3 }
 0x6f2   :  { %v1026_v12 = vsel %vm4029_vm8, 1.0, %v2163_v34  ;;  %v1025_v53 = vsel %vm4031_vm9, 1.0, %v2162_v27 }
 0x6f3   :  { %v1048_v41 = vsel %vm310_vm2, %v1026_v12, 0.0  ;;  %v1045_v14 = vsel %vm310_vm2, %v1025_v53, 0.0 }
 0x6f6   :  { %1040 = vadd.xlane.f32.xlu1 %v1039_v16  ;;  %1037 = vadd.xlane.f32.xlu0 %v1036_v32 }
 0x6f7   :  { %1043 = vadd.xlane.f32.xlu2 %v1042_v51 }
 0x6fe   :  { %1049 = vadd.xlane.f32.xlu1 %v1048_v41  ;;  %1046 = vadd.xlane.f32.xlu0 %v1045_v14 }
 0x761   :  { %v1032_v13 = vpop.xlane.xlu1 %1031  ;;  %v1029_v16 = vpop.xlane.xlu0 %1028 }
 0x762   :  { %v1035_v32 = vpop.xlane.xlu2 %1034  ;;  %vm1052_vm13 = vcmp.ge.f32.partialorder %v1032_v13, 57.0  ;;  %vm1081_vm14 = vcmp.ge.f32.partialorder %v1032_v13, 58.0  ;;  %vm1051_vm10 = vcmp.ge.f32.partialorder %v1029_v16, 57.0  ;;  %vm1080_vm11 = vcmp.ge.f32.partialorder %v1029_v16, 58.0 }
 0x763   :  { %vm1053_vm7 = vcmp.ge.f32.partialorder %v1035_v32, 57.0  ;;  %v1060_v34 = vsel %vm1052_vm13, %v3210_v11, 1e+30  ;;  %vm1082_vm15 = vcmp.ge.f32.partialorder %v1035_v32, 58.0  ;;  %v1089_v41 = vsel %vm1081_vm14, %v3210_v11, 1e+30 }
 0x764   :  { %v1061_v14 = vsel %vm1053_vm7, %v3212_v48, 1e+30  ;;  %v1059_v13 = vsel %vm1051_vm10, %v3208_v38, 1e+30  ;;  %v1090_v16 = vsel %vm1082_vm15, %v3212_v48, 1e+30 }
 0x769   :  { %v1041_v51 = vpop.xlane.xlu1 %1040  ;;  %v1038_v5 = vpop.xlane.xlu0 %1037 }
 0x76a   :  { %vm1055_vm6 = vcmp.ge.f32.partialorder %v1041_v51, 57.0  ;;  %v1044_v50 = vpop.xlane.xlu2 %1043  ;;  %vm1084_vm4 = vcmp.ge.f32.partialorder %v1041_v51, 58.0  ;;  %vm1054_vm8 = vcmp.ge.f32.partialorder %v1038_v5, 57.0  ;;  %vm1083_vm9 = vcmp.ge.f32.partialorder %v1038_v5, 58.0 }
 0x76b   :  { %vm1056_vm12 = vcmp.ge.f32.partialorder %v1044_v50, 57.0  ;;  %v1063_v27 = vsel %vm1055_vm6, %v3216_v23, 1e+30  ;;  %vm1085_vm0 = vcmp.ge.f32.partialorder %v1044_v50, 58.0  ;;  %v1092_v12 = vsel %vm1084_vm4, %v3216_v23, 1e+30 }
 0x76c   :  { %v1064_v53 = vsel %vm1056_vm12, %v3234_v37, 1e+30  ;;  %v1088_v51 = vsel %vm1080_vm11, %v3208_v38, 1e+30  ;;  %v1067_v32 = vmin.f32 %v1059_v13, %v1063_v27  ;;  %v1093_v36 = vsel %vm1085_vm0, %v3234_v37, 1e+30 }
 0x76d   :  { %v1096_v50 = vmin.f32 %v1088_v51, %v1092_v12  ;;  %v1068_v19 = vmin.f32 %v1060_v34, %v1064_v53  ;;  %v1062_v1 = vsel %vm1054_vm8, %v3214_v31, 1e+30  ;;  %v1091_v28 = vsel %vm1083_vm9, %v3214_v31, 1e+30 }
 0x76e   :  { %v1097_v3 = vmin.f32 %v1089_v41, %v1093_v36 }
 0x76f   :  { %v1071_v6 = vmin.f32 %v1067_v32, %v1068_v19  ;;  %v1135_v19 = vmul.f32 0.9, %v3122_v61 }
 0x770   :  { %v1100_v22 = vmin.f32 %v1096_v50, %v1097_v3 }
 0x771   :  { %v1050_v5 = vpop.xlane.xlu1 %1049  ;;  %v1047_v30 = vpop.xlane.xlu0 %1046 }
 0x772   :  { %vm1058_vm13 = vcmp.ge.f32.partialorder %v1050_v5, 57.0  ;;  %vm1087_vm6 = vcmp.ge.f32.partialorder %v1050_v5, 58.0  ;;  %vm1057_vm4 = vcmp.ge.f32.partialorder %v1047_v30, 57.0  ;;  %vm1086_vm12 = vcmp.ge.f32.partialorder %v1047_v30, 58.0 }
 0x773   :  { %v1066_v15 = vsel %vm1058_vm13, %v3252_v10, 1e+30  ;;  %v1095_v40 = vsel %vm1087_vm6, %v3252_v10, 1e+30  ;;  %v1065_v27 = vsel %vm1057_vm4, %v3250_v2, 1e+30 }
 0x774   :  { %v1070_v13 = vmin.f32 %v1062_v1, %v1066_v15  ;;  %v1099_v12 = vmin.f32 %v1091_v28, %v1095_v40  ;;  %v1069_v34 = vmin.f32 %v1061_v14, %v1065_v27  ;;  %v1094_v53 = vsel %vm1086_vm12, %v3250_v2, 1e+30 }
 0x775   :  { %v1098_v51 = vmin.f32 %v1090_v16, %v1094_v53  ;;  %v1130_v53 = vmul.f32 0.9, %v3106_v62 }
 0x776   :  { %v1072_v60 = vmin.f32 %v1069_v34, %v1070_v13  ;;  %v1131_v13 = vmul.f32 0.9, %v3108_v46 }
 0x777   :  { %v1101_v63 = vmin.f32 %v1098_v51, %v1099_v12 }
 0x778   :  { %v1073_v5 = vmin.f32 %v1071_v6, %v1072_v60  ;;  %v1151_v60 = vsub.f32 %v3122_v61, %v2607_v52  ;;  %v1149_v6 = vsub.f32 %v3112_v0, %v2612_v54 }
 0x779   :  { %v1102_v42 = vmin.f32 %v1100_v22, %v1101_v63  ;;  %v1134_v63 = vmul.f32 0.9, %v3116_v7  ;;  %v1150_v22 = vsub.f32 %v3116_v7, %v2603_v49 }
 0x77a   :  { %v1074_v30 = vrot.slane %v1073_v5, 4 }
 0x77b   :  { %v1103_v36 = vrot.slane %v1102_v42, 4  ;;  %v1142_v32 = vadd.f32 %v1134_v63, %v2979_v33 }
 0x77c   :  { %v1075_v41 = vmin.f32 %v1073_v5, %v1074_v30 }
 0x77d   :  { %v1104_v43 = vmin.f32 %v1102_v42, %v1103_v36  ;;  %v1129_v36 = vmul.f32 0.9, %v3104_v8 }
 0x77e   :  { %v1076_v24 = vrot.slane %v1075_v41, 2 }
 0x77f   :  { %v1105_v45 = vrot.slane %v1104_v43, 2 }
 0x780   :  { %v1077_v39 = vmin.f32 %v1075_v41, %v1076_v24  ;;  %v4032_v24 = vmov 0.1   ;;  %v1139_v41 = vadd.f32 %v1131_v13, %v3020_v26 }
 0x781   :  { %v1106_v20 = vmin.f32 %v1104_v43, %v1105_v45 }
 0x782   :  { %v1078_v15 = vrot.slane %v1077_v39, 1 }
 0x783   :  { %v1107_v40 = vrot.slane %v1106_v20, 1 }
 0x784   :  { %v1079_v28 = vmin.f32 %v1077_v39, %v1078_v15  ;;  %v1143_v39 = vadd.f32 %v1135_v19, %v2985_v21 }
 0x785   :  { %v1108_v1 = vmin.f32 %v1106_v20, %v1107_v40  ;;  %v1133_v20 = vmul.f32 0.9, %v3112_v0  ;;  %v1147_v0 = vsub.f32 %v3108_v46, %v2618_v56  ;;  %v1145_v40 = vsub.f32 %v3104_v8, %v2624_v58 }
 0x787   :  { %v1109_v14 = vsub.f32 %v1108_v1, %v1079_v28  ;;  %v1141_v34 = vadd.f32 %v1133_v20, %v2975_v17  ;;  %v4037_v20 = vld [vmem:[#allocation23_spill] sm:$0xff] }
 0x789   :  { %v1110_v16 = vmul.f32 0.7, %v1109_v14 }
 0x78b   :  { %v1111_v3 = vadd.f32 %v1110_v16, %v1079_v28  ;;  %v1128_v28 = vmul.f32 0.9, %v3102_v25  ;;  %v1144_v16 = vsub.f32 %v3102_v25, %v2627_v59  ;;  %v4034_v25 = vld [vmem:[#allocation20_spill] sm:$0xff] }
 0x78d   :  { %vm1119_vm14 = vcmp.lt.f32.partialorder %v3252_v10, %v1111_v3  ;;  %vm1118_vm7 = vcmp.lt.f32.partialorder %v3250_v2, %v1111_v3  ;;  %vm1117_vm10 = vcmp.lt.f32.partialorder %v3234_v37, %v1111_v3  ;;  %vm1116_vm11 = vcmp.lt.f32.partialorder %v3216_v23, %v1111_v3 }
 0x78e   :  { %v1127_v43 = vsel %vm1119_vm14, 0.0, %v4032_v24  ;;  %v1126_v45 = vsel %vm1118_vm7, 0.0, %v4032_v24  ;;  %v1125_v42 = vsel %vm1117_vm10, 0.0, %v4032_v24  ;;  %v1124_v2 = vsel %vm1116_vm11, 0.0, %v4032_v24 }
 0x78f   :  { %v1159_v61 = vmul.f32 %v1151_v60, %v1127_v43  ;;  %v1158_v7 = vmul.f32 %v1150_v22, %v1126_v45  ;;  %v1132_v37 = vmul.f32 0.9, %v3110_v47  ;;  %v1148_v23 = vsub.f32 %v3110_v47, %v2615_v55  ;;  %v4033_v43 = vld [vmem:[#allocation19_spill] sm:$0xff]  ;;  %v4035_v45 = vld [vmem:[#allocation21_spill] sm:$0xff] }
 0x790   :  { %vm1115_vm15 = vcmp.lt.f32.partialorder %v3214_v31, %v1111_v3  ;;  %v1157_v50 = vmul.f32 %v1149_v6, %v1125_v42  ;;  %vm1114_vm0 = vcmp.lt.f32.partialorder %v3212_v48, %v1111_v3  ;;  %vm1113_vm8 = vcmp.lt.f32.partialorder %v3210_v11, %v1111_v3  ;;  %v4036_v42 = vld [vmem:[#allocation22_spill] sm:$0xff] }
 0x791   :  { %v1167_v10 = vadd.f32 %v1159_v61, %v1143_v39  ;;  %v1123_v27 = vsel %vm1115_vm15, 0.0, %v4032_v24  ;;  %v1166_v12 = vadd.f32 %v1158_v7, %v1142_v32  ;;  %v1156_v47 = vmul.f32 %v1148_v23, %v1124_v2  ;;  %v4038_v39 = vld [vmem:[#allocation24_spill] sm:$0xff] }
 0x792   :  { %v1122_v31 = vsel %vm1114_vm0, 0.0, %v4032_v24  ;;  %v1146_v48 = vsub.f32 %v3106_v62, %v2621_v57  ;;  %v1165_v51 = vadd.f32 %v1157_v50, %v1141_v34  ;;  %v1140_v5 = vadd.f32 %v1132_v37, %v3011_v44 }
 0x793   :  { %1176 = vmatpush.msrb.mxu1 %v1167_v10  ;;  %v1155_v30 = vmul.f32 %v1147_v0, %v1123_v27  ;;  %vm1112_vm9 = vcmp.lt.f32.partialorder %v3208_v38, %v1111_v3  ;;  %v1121_v46 = vsel %vm1113_vm8, 0.0, %v4032_v24  ;;  %v1138_v38 = vadd.f32 %v1130_v53, %v3027_v9 }
 0x794   :  { %v1164_v11 = vadd.f32 %v1156_v47, %v1140_v5  ;;  %v1154_v15 = vmul.f32 %v1146_v48, %v1122_v31  ;;  %v1120_v62 = vsel %vm1112_vm9, 0.0, %v4032_v24  ;;  %v1153_v14 = vmul.f32 %v1145_v40, %v1121_v46 }
 0x795   :  { %1177 = vmatpush.msrb.mxu1 %v1166_v12  ;;  %v1163_v1 = vadd.f32 %v1155_v30, %v1139_v41  ;;  %v1137_v3 = vadd.f32 %v1129_v36, %v3035_v18  ;;  %v1152_v60 = vmul.f32 %v1144_v16, %v1120_v62  ;;  %v1136_v8 = vadd.f32 %v1128_v28, %v3043_v29 }
 0x796   :  { %v1162_v19 = vadd.f32 %v1154_v15, %v1138_v38 }
 0x797   :  { %1178 = vmatpush.msrb.mxu1 %v1165_v51  ;;  %v1161_v63 = vadd.f32 %v1153_v14, %v1137_v3  ;;  %v1160_v22 = vadd.f32 %v1152_v60, %v1136_v8 }
 0x799   :  { %1179 = vmatpush.msrb.mxu1 %v1164_v11 }
 0x79b   :  { %1180 = vmatpush.msrb.mxu1 %v1163_v1 }
 0x79d   :  { %1181 = vmatpush.msrb.mxu1 %v1162_v19 }
 0x79f   :  { %1182 = vmatpush.msrb.mxu1 %v1161_v63 }
 0x7a1   :  { %1183 = vmatpush.msrb.mxu1 %v1160_v22 }
 0x7a2   :  { %2164 = vmatmul.msk.f32.vlgmr.msrb.gmra.mxu1 %vm310_vm2, %v3049_v4 }
 0x7aa   :  { %2165 = vmatmul.msk.f32.gmra.mxu1 %vm310_vm2, %v3056_v35 }
 0x7b2   :  { %2166 = vmatmul.msk.f32.gmra.mxu1 %vm310_vm2, %v4033_v43 }
 0x7ba   :  { %2167 = vmatmul.msk.f32.gmra.mxu1 %vm310_vm2, %v4034_v25 }
 0x7c2   :  { %2168 = vmatmul.msk.f32.gmra.mxu1 %vm310_vm2, %v4035_v45 }
 0x7ca   :  { %2169 = vmatmul.msk.f32.gmra.mxu1 %vm310_vm2, %v4036_v42 }
 0x7d2   :  { %2170 = vmatmul.msk.f32.gmra.mxu1 %vm310_vm2, %v4037_v20 }
 0x7da   :  { %2171 = vmatmul.msk.f32.gmra.mxu1 %vm310_vm2, %v4038_v39 }
 0x81f   :  { %v3352_v4 = vpop.f32.mrf.mxu1 }
 0x820   :  { %v1209_v0 = vsel %vm186_vm1, %v3352_v4, -inf }
 0x827   :  { %v3354_v35 = vpop.f32.mrf.mxu1 }
 0x828   :  { %v1212_v34 = vsel %vm186_vm1, %v3354_v35, -inf }
 0x82f   :  { %v3356_v61 = vpop.f32.mrf.mxu1 }
 0x830   :  { %v1215_v10 = vsel %vm186_vm1, %v3356_v61, -inf }
 0x837   :  { %v3358_v7 = vpop.f32.mrf.mxu1 }
 0x838   :  { %v1218_v27 = vsel %vm186_vm1, %v3358_v7, -inf }
 0x83f   :  { %v3360_v6 = vpop.f32.mrf.mxu1 }
 0x840   :  { %v1221_v12 = vsel %vm186_vm1, %v3360_v6, -inf }
 0x847   :  { %v3362_v2 = vpop.f32.mrf.mxu1 }
 0x848   :  { %v1224_v37 = vsel %vm186_vm1, %v3362_v2, -inf }
 0x849   :  { %1225 = vmax.xlane.f32.xlu1 %v1224_v37 }
 0x84f   :  { %v3366_v23 = vpop.f32.mrf.mxu1 }
 0x850   :  { %v1227_v32 = vsel %vm186_vm1, %v3366_v23, -inf }
 0x851   :  { %1216 = vmax.xlane.f32.xlu1 %v1215_v10  ;;  %1228 = vmax.xlane.f32.xlu0 %v1227_v32 }
 0x857   :  { %v3372_v50 = vpop.f32.mrf.mxu1 }
 0x858   :  { %v1230_v13 = vsel %vm186_vm1, %v3372_v50, -inf }
 0x859   :  { %1219 = vmax.xlane.f32.xlu0 %v1218_v27  ;;  %1231 = vmax.xlane.f32.xlu2 %v1230_v13 }
 0x861   :  { %1210 = vmax.xlane.f32.xlu0 %v1209_v0  ;;  %1222 = vmax.xlane.f32.xlu2 %v1221_v12 }
 0x869   :  { %1213 = vmax.xlane.f32.xlu2 %v1212_v34 }
 0x8bc   :  { %v1226_v47 = vpop.xlane.xlu1 %1225 }
 0x8bd   :  { %v3385_v31 = vsub.f32 %v3362_v2, %v1226_v47 }
 0x8bf   :  { %v1251_v53 = vmul.f32 1.442695, %v3385_v31 }
 0x8c1   :  { %2351 = vpow2.f32 %v1251_v53 }
 0x8c4   :  { %v1217_v48 = vpop.xlane.xlu1 %1216  ;;  %v1229_v51 = vpop.xlane.xlu0 %1228 }
 0x8c5   :  { %v3389_v5 = vsub.f32 %v3356_v61, %v1217_v48  ;;  %v3392_v30 = vsub.f32 %v3366_v23, %v1229_v51 }
 0x8c7   :  { %v2352_v46 = vpop.eup %2351  ;;  %v1245_v36 = vmul.f32 1.442695, %v3389_v5  ;;  %v1253_v11 = vmul.f32 1.442695, %v3392_v30 }
 0x8c8   :  { %v1272_v41 = vsel %vm186_vm1, %v2352_v46, 0.0 }
 0x8c9   :  { %2353 = vpow2.f32 %v1245_v36  ;;  %1273 = vadd.xlane.f32.xlu0 %v1272_v41 }
 0x8ca   :  { %2355 = vpow2.f32 %v1253_v11 }
 0x8cc   :  { %v1220_v15 = vpop.xlane.xlu0 %1219  ;;  %v1232_v40 = vpop.xlane.xlu2 %1231 }
 0x8cd   :  { %v3398_v62 = vsub.f32 %v3358_v7, %v1220_v15  ;;  %v3401_v28 = vsub.f32 %v3372_v50, %v1232_v40 }
 0x8cf   :  { %v2354_v1 = vpop.eup %2353  ;;  %v1247_v38 = vmul.f32 1.442695, %v3398_v62  ;;  %v1255_v14 = vmul.f32 1.442695, %v3401_v28 }
 0x8d0   :  { %v2356_v16 = vpop.eup %2355  ;;  %v1263_v19 = vsel %vm186_vm1, %v2354_v1, 0.0 }
 0x8d1   :  { %2357 = vpow2.f32 %v1247_v38  ;;  %1264 = vadd.xlane.f32.xlu0 %v1263_v19  ;;  %v1275_v3 = vsel %vm186_vm1, %v2356_v16, 0.0 }
 0x8d2   :  { %2359 = vpow2.f32 %v1255_v14  ;;  %1276 = vadd.xlane.f32.xlu2 %v1275_v3 }
 0x8d4   :  { %v1211_v60 = vpop.xlane.xlu0 %1210  ;;  %v1223_v63 = vpop.xlane.xlu2 %1222 }
 0x8d5   :  { %v3408_v8 = vsub.f32 %v3352_v4, %v1211_v60  ;;  %v3411_v22 = vsub.f32 %v3360_v6, %v1223_v63 }
 0x8d7   :  { %v2358_v43 = vpop.eup %2357  ;;  %v1241_v25 = vmul.f32 1.442695, %v3408_v8  ;;  %v1249_v45 = vmul.f32 1.442695, %v3411_v22 }
 0x8d8   :  { %v2360_v42 = vpop.eup %2359  ;;  %v1266_v20 = vsel %vm186_vm1, %v2358_v43, 0.0 }
 0x8d9   :  { %2361 = vpow2.f32 %v1241_v25  ;;  %v1278_v39 = vsel %vm186_vm1, %v2360_v42, 0.0  ;;  %v4039_v42 = vld [vmem:[#allocation8_spill] sm:$0xff] }
 0x8da   :  { %2363 = vpow2.f32 %v1249_v45  ;;  %1267 = vadd.xlane.f32.xlu2 %v1266_v20  ;;  %1279 = vadd.xlane.f32.xlu1 %v1278_v39 }
 0x8dc   :  { %v1214_v37 = vpop.xlane.xlu2 %1213 }
 0x8dd   :  { %v3418_v10 = vsub.f32 %v3354_v35, %v1214_v37 }
 0x8df   :  { %v2362_v32 = vpop.eup %2361  ;;  %v1243_v27 = vmul.f32 1.442695, %v3418_v10 }
 0x8e0   :  { %v2364_v13 = vpop.eup %2363  ;;  %v1257_v0 = vsel %vm186_vm1, %v2362_v32, 0.0 }
 0x8e1   :  { %2365 = vpow2.f32 %v1243_v27  ;;  %v1269_v12 = vsel %vm186_vm1, %v2364_v13, 0.0 }
 0x8e2   :  { %1258 = vadd.xlane.f32.xlu2 %v1257_v0  ;;  %1270 = vadd.xlane.f32.xlu1 %v1269_v12 }
 0x8e7   :  { %v2366_v34 = vpop.eup %2365 }
 0x8e8   :  { %v1260_v47 = vsel %vm186_vm1, %v2366_v34, 0.0 }
 0x8ea   :  { %1261 = vadd.xlane.f32.xlu1 %v1260_v47 }
 0x93c   :  { %v1274_v53 = vpop.xlane.xlu0 %1273 }
 0x93d   :  { %2367 = vlog2.f32 %v1274_v53 }
 0x943   :  { %v2368_v46 = vpop.eup %2367 }
 0x944   :  { %v1265_v48 = vpop.xlane.xlu0 %1264  ;;  %v1292_v36 = vmul.f32 0.6931472, %v2368_v46 }
 0x945   :  { %2369 = vlog2.f32 %v1265_v48  ;;  %v1277_v51 = vpop.xlane.xlu2 %1276 }
 0x946   :  { %2371 = vlog2.f32 %v1277_v51  ;;  %v1302_v15 = vsub.f32 %v3385_v31, %v1292_v36 }
 0x948   :  { %v1315_v19 = vmul.f32 1.442695, %v1302_v15 }
 0x94b   :  { %v2370_v11 = vpop.eup %2369 }
 0x94c   :  { %v1286_v41 = vmul.f32 0.6931472, %v2370_v11  ;;  %v2372_v38 = vpop.eup %2371 }
 0x94d   :  { %v1280_v40 = vpop.xlane.xlu1 %1279  ;;  %v1268_v1 = vpop.xlane.xlu2 %1267  ;;  %v1294_v3 = vmul.f32 0.6931472, %v2372_v38 }
 0x94e   :  { %v1299_v14 = vsub.f32 %v3389_v5, %v1286_v41  ;;  %2373 = vlog2.f32 %v1280_v40  ;;  %v4041_v40 = vld [vmem:[#allocation4_spill] sm:$0xff] }
 0x94f   :  { %v1303_v63 = vsub.f32 %v3392_v30, %v1294_v3 }
 0x950   :  { %v1309_v16 = vmul.f32 1.442695, %v1299_v14  ;;  %v1323_v20 = vsub.f32 %v1299_v14, %v4039_v42 }
 0x951   :  { %v1317_v37 = vmul.f32 1.442695, %v1303_v63 }
 0x952   :  { %2375 = vpow2.f32 %v1309_v16 }
 0x953   :  { %2377 = vlog2.f32 %v1268_v1 }
 0x954   :  { %v2374_v60 = vpop.eup %2373  ;;  %2379 = vpow2.f32 %v1315_v19 }
 0x955   :  { %v1296_v43 = vmul.f32 0.6931472, %v2374_v60  ;;  %v1271_v25 = vpop.xlane.xlu1 %1270  ;;  %v1259_v45 = vpop.xlane.xlu2 %1258 }
 0x956   :  { %2381 = vlog2.f32 %v1271_v25 }
 0x957   :  { %v1304_v31 = vsub.f32 %v3401_v28, %v1296_v43  ;;  %2383 = vlog2.f32 %v1259_v45  ;;  %v4040_v28 = vld [vmem:[#allocation6_spill] sm:$0xff] }
 0x958   :  { %v2376_v5 = vpop.eup %2375  ;;  %v1326_v48 = vsub.f32 %v1302_v15, %v4040_v28 }
 0x959   :  { %v2378_v39 = vpop.eup %2377  ;;  %v1319_v32 = vmul.f32 1.442695, %v1304_v31  ;;  %v1331_v27 = vmul.f32 %v2376_v5, %v1323_v20  ;;  %v1328_v1 = vsub.f32 %v1304_v31, %v4041_v40  ;;  %v4043_v20 = vld [vmem:[#allocation9_spill] sm:$0xff] }
 0x95a   :  { %v2380_v13 = vpop.eup %2379  ;;  %v1288_v30 = vmul.f32 0.6931472, %v2378_v39 }
 0x95b   :  { %2385 = vpow2.f32 %v1319_v32  ;;  %v1343_v0 = vsel %vm186_vm1, %v1331_v27, 0.0  ;;  %v1334_v36 = vmul.f32 %v2380_v13, %v1326_v48  ;;  %v4044_v13 = vld [vmem:[#allocation3_spill] sm:$0xff] }
 0x95c   :  { %v2382_v12 = vpop.eup %2381  ;;  %1344 = vadd.xlane.f32.xlu2 %v1343_v0  ;;  %2387 = vpow2.f32 %v1317_v37  ;;  %v1300_v11 = vsub.f32 %v3398_v62, %v1288_v30 }
 0x95d   :  { %v2384_v34 = vpop.eup %2383  ;;  %v1290_v47 = vmul.f32 0.6931472, %v2382_v12  ;;  %v1262_v53 = vpop.xlane.xlu1 %1261  ;;  %v1352_v60 = vsel %vm186_vm1, %v1334_v36, 0.0 }
 0x95e   :  { %v1282_v51 = vmul.f32 0.6931472, %v2384_v34  ;;  %2389 = vlog2.f32 %v1262_v53  ;;  %v1311_v15 = vmul.f32 1.442695, %v1300_v11 }
 0x95f   :  { %v1301_v46 = vsub.f32 %v3411_v22, %v1290_v47  ;;  %v4042_v22 = vld [vmem:[#allocation5_spill] sm:$0xff]  ;;  %v4046_v47 = vld [vmem:[#allocation2_spill] sm:$0xff] }
 0x960   :  { %v1297_v41 = vsub.f32 %v3408_v8, %v1282_v51  ;;  %v1327_v25 = vsub.f32 %v1303_v63, %v4042_v22 }
 0x961   :  { %v2386_v38 = vpop.eup %2385  ;;  %v1313_v14 = vmul.f32 1.442695, %v1301_v46  ;;  %v1325_v0 = vsub.f32 %v1301_v46, %v4044_v13 }
 0x962   :  { %v1305_v16 = vmul.f32 1.442695, %v1297_v41  ;;  %v1336_v19 = vmul.f32 %v2386_v38, %v1328_v1  ;;  %v2388_v3 = vpop.eup %2387  ;;  %v1321_v5 = vsub.f32 %v1297_v41, %v4043_v20  ;;  %v4047_v38 = vmov 1.0  }
 0x963   :  { %v1335_v8 = vmul.f32 %v2388_v3, %v1327_v25 }
 0x964   :  { %v2390_v43 = vpop.eup %2389  ;;  %2391 = vpow2.f32 %v1305_v16  ;;  %2172 = vmatpush.xpose.msk.msrb.mxu2 %vm186_vm1, %v1336_v19  ;;  %1353 = vadd.xlane.f32.xlu2 %v1352_v60 }
 0x965   :  { %2393 = vpow2.f32 %v1313_v14  ;;  %v1284_v62 = vmul.f32 0.6931472, %v2390_v43  ;;  %v1355_v1 = vsel %vm186_vm1, %v1335_v8, 0.0  ;;  %v1358_v14 = vsel %vm186_vm1, %v1336_v19, 0.0 }
 0x966   :  { %2395 = vpow2.f32 %v1311_v15  ;;  %v4048_v19 = vmov 0.0  }
 0x967   :  { %v1298_v45 = vsub.f32 %v3418_v10, %v1284_v62  ;;  %v4045_v10 = vld [vmem:[#allocation7_spill] sm:$0xff] }
 0x968   :  { %2173 = vmatpush.xpose.msk.msrb.mxu2 %vm186_vm1, %v1335_v8  ;;  %v1324_v34 = vsub.f32 %v1300_v11, %v4045_v10 }
 0x969   :  { %v1307_v31 = vmul.f32 1.442695, %v1298_v45  ;;  %v1322_v53 = vsub.f32 %v1298_v45, %v4046_v47 }
 0x96a   :  { %v2392_v39 = vpop.eup %2391 }
 0x96b   :  { %v2394_v37 = vpop.eup %2393  ;;  %2397 = vpow2.f32 %v1307_v31  ;;  %v1329_v32 = vmul.f32 %v2392_v39, %v1321_v5  ;;  %v4050_v5 = vld [vmem:[#allocation11_spill] sm:$0xff] }
 0x96c   :  { %2174 = vmatpush.xpose.msk.msrb.mxu2 %vm186_vm1, %v1334_v36  ;;  %v2396_v12 = vpop.eup %2395  ;;  %v1333_v30 = vmul.f32 %v2394_v37, %v1325_v0  ;;  %v4052_v0 = vld [vmem:[#allocation12_spill] sm:$0xff] }
 0x96d   :  { %v1337_v63 = vsel %vm186_vm1, %v1329_v32, 0.0  ;;  %v1332_v51 = vmul.f32 %v2396_v12, %v1324_v34  ;;  %vm4053_vm12 = vcmp.eq.s32.totalorder %v4052_v0, %v4050_v5 }
 0x96e   :  { %1338 = vadd.xlane.f32.xlu0 %v1337_v63  ;;  %v1349_v11 = vsel %vm186_vm1, %v1333_v30, 0.0 }
 0x96f   :  { %v1346_v46 = vsel %vm186_vm1, %v1332_v51, 0.0 }
 0x970   :  { %2175 = vmatpush.xpose.msk.msrb.mxu2 %vm186_vm1, %v1333_v30 }
 0x971   :  { %v2398_v48 = vpop.eup %2397 }
 0x972   :  { %v1330_v41 = vmul.f32 %v2398_v48, %v1322_v53 }
 0x974   :  { %2176 = vmatpush.xpose.msk.msrb.mxu2 %vm186_vm1, %v1332_v51  ;;  %v1340_v36 = vsel %vm186_vm1, %v1330_v41, 0.0 }
 0x975   :  { %1341 = vadd.xlane.f32.xlu1 %v1340_v36  ;;  %v4054_v36 = vld [vmem:[#allocation16_spill] sm:$0xff] }
 0x976   :  { %1347 = vadd.xlane.f32.xlu0 %v1346_v46  ;;  %vm4055_vm11 = vcmp.eq.s32.totalorder %v4054_v36, %v4050_v5 }
 0x978   :  { %2177 = vmatpush.xpose.msk.msrb.mxu2 %vm186_vm1, %v1331_v27 }
 0x97c   :  { %2178 = vmatpush.xpose.msk.msrb.mxu2 %vm186_vm1, %v1330_v41 }
 0x97d   :  { %1350 = vadd.xlane.f32.xlu1 %v1349_v11  ;;  %v4056_v11 = vld [vmem:[#allocation14_spill] sm:$0xff] }
 0x97e   :  { %1356 = vadd.xlane.f32.xlu0 %v1355_v1  ;;  %vm4057_vm15 = vcmp.eq.s32.totalorder %v4056_v11, %v4050_v5 }
 0x980   :  { %2179 = vmatpush.xpose.msk.msrb.mxu2 %vm186_vm1, %v1329_v32 }
 0x983   :  { %2180 = vmatmul.msk.f32.vlgmr.msrb.gmra.mxu2 %vm186_vm1, %v4047_v38 }
 0x985   :  { %1359 = vadd.xlane.f32.xlu1 %v1358_v14 }
 0x9cf   :  { %v3462_v27 = vpop.xlane.xlu2 %1344 }
 0x9d7   :  { %v3484_v12 = vpop.xlane.xlu2 %1353 }
 0x9e1   :  { %v3458_v16 = vpop.xlane.xlu0 %1338 }
 0x9e8   :  { %v3460_v3 = vpop.xlane.xlu1 %1341 }
 0x9e9   :  { %v3464_v15 = vpop.xlane.xlu0 %1347 }
 0x9f0   :  { %v3466_v25 = vpop.xlane.xlu1 %1350 }
 0x9f1   :  { %v3500_v14 = vpop.xlane.xlu0 %1356 }
 0xa06   :  { %v1402_v60 = vpop.f32.mrf.mxu2 }
 0xa07   :  { %v1405_v43 = vperm.slane %v1402_v60, 0  ;;  %v3502_v60 = vpop.xlane.xlu1 %1359 }
 0xa09   :  { %vm1407_vm13 = vcmp.le.f32.partialorder %v1405_v43, %v3460_v3  ;;  %vm1406_vm6 = vcmp.le.f32.partialorder %v1405_v43, %v3458_v16  ;;  %vm1408_vm4 = vcmp.le.f32.partialorder %v1405_v43, %v3462_v27  ;;  %vm1410_vm14 = vcmp.le.f32.partialorder %v1405_v43, %v3466_v25 }
 0xa0a   :  { %v2182_v62 = vsel %vm1407_vm13, 1.0, %v4048_v19  ;;  %v2181_v8 = vsel %vm1406_vm6, 1.0, %v4048_v19  ;;  %v2183_v45 = vsel %vm1408_vm4, 1.0, %v4048_v19  ;;  %vm1409_vm7 = vcmp.le.f32.partialorder %v1405_v43, %v3464_v15 }
 0xa0b   :  { %v1431_v39 = vsel %vm303_vm5, 1.0, %v2182_v62  ;;  %v1430_v32 = vsel %vm302_vm3, 1.0, %v2181_v8  ;;  %v1432_v63 = vsel %vm4053_vm12, 1.0, %v2183_v45  ;;  %vm1411_vm10 = vcmp.le.f32.partialorder %v1405_v43, %v3484_v12  ;;  %v4058_v62 = vld [vmem:[#allocation15_spill] sm:$0xff] }
 0xa0c   :  { %v1441_v30 = vsel %vm310_vm2, %v1431_v39, 0.0  ;;  %v1438_v34 = vsel %vm310_vm2, %v1430_v32, 0.0  ;;  %v1444_v53 = vsel %vm310_vm2, %v1432_v63, 0.0  ;;  %v2185_v48 = vsel %vm1410_vm14, 1.0, %v4048_v19 }
 0xa0d   :  { %1442 = vadd.xlane.f32.xlu0 %v1441_v30  ;;  %1439 = vadd.xlane.f32.xlu2 %v1438_v34  ;;  %v2184_v51 = vsel %vm1409_vm7, 1.0, %v4048_v19  ;;  %v2186_v41 = vsel %vm1411_vm10, 1.0, %v4048_v19  ;;  %v1434_v46 = vsel %vm4055_vm11, 1.0, %v2185_v48  ;;  %vm4059_vm0 = vcmp.eq.s32.totalorder %v4058_v62, %v4050_v5  ;;  %v4060_v34 = vld [vmem:[#allocation18_spill] sm:$0xff]  ;;  %v4062_v48 = vld [vmem:[#allocation17_spill] sm:$0xff] }
 0xa0e   :  { %1445 = vadd.xlane.f32.xlu1 %v1444_v53  ;;  %v1433_v1 = vsel %vm4057_vm15, 1.0, %v2184_v51  ;;  %v1435_v8 = vsel %vm4059_vm0, 1.0, %v2186_v41  ;;  %vm1413_vm8 = vcmp.le.f32.partialorder %v1405_v43, %v3502_v60  ;;  %vm1412_vm9 = vcmp.le.f32.partialorder %v1405_v43, %v3500_v14 }
 0xa0f   :  { %v1450_v45 = vsel %vm310_vm2, %v1434_v46, 0.0  ;;  %v1447_v39 = vsel %vm310_vm2, %v1433_v1, 0.0  ;;  %v1453_v32 = vsel %vm310_vm2, %v1435_v8, 0.0  ;;  %v2188_v63 = vsel %vm1413_vm8, 1.0, %v4048_v19 }
 0xa10   :  { %v2187_v30 = vsel %vm1412_vm9, 1.0, %v4048_v19  ;;  %vm4061_vm13 = vcmp.eq.s32.totalorder %v4060_v34, %v4050_v5  ;;  %vm4063_vm6 = vcmp.eq.s32.totalorder %v4062_v48, %v4050_v5 }
 0xa11   :  { %v1437_v53 = vsel %vm4061_vm13, 1.0, %v2188_v63  ;;  %v1436_v43 = vsel %vm4063_vm6, 1.0, %v2187_v30 }
 0xa12   :  { %v1459_v51 = vsel %vm310_vm2, %v1437_v53, 0.0  ;;  %v1456_v41 = vsel %vm310_vm2, %v1436_v43, 0.0 }
 0xa15   :  { %1451 = vadd.xlane.f32.xlu0 %v1450_v45  ;;  %1448 = vadd.xlane.f32.xlu2 %v1447_v39 }
 0xa16   :  { %1454 = vadd.xlane.f32.xlu1 %v1453_v32 }
 0xa1d   :  { %1460 = vadd.xlane.f32.xlu0 %v1459_v51  ;;  %1457 = vadd.xlane.f32.xlu2 %v1456_v41 }
 0xa80   :  { %v1443_v46 = vpop.xlane.xlu0 %1442  ;;  %v1440_v1 = vpop.xlane.xlu2 %1439 }
 0xa81   :  { %v1446_v8 = vpop.xlane.xlu1 %1445  ;;  %vm1463_vm4 = vcmp.ge.f32.partialorder %v1443_v46, 57.0  ;;  %vm1492_vm10 = vcmp.ge.f32.partialorder %v1443_v46, 58.0  ;;  %vm1462_vm15 = vcmp.ge.f32.partialorder %v1440_v1, 57.0  ;;  %vm1491_vm0 = vcmp.ge.f32.partialorder %v1440_v1, 58.0 }
 0xa82   :  { %vm1464_vm11 = vcmp.ge.f32.partialorder %v1446_v8, 57.0  ;;  %v1471_v63 = vsel %vm1463_vm4, %v3460_v3, 1e+30  ;;  %vm1493_vm8 = vcmp.ge.f32.partialorder %v1446_v8, 58.0  ;;  %v1500_v51 = vsel %vm1492_vm10, %v3460_v3, 1e+30 }
 0xa83   :  { %v1472_v41 = vsel %vm1464_vm11, %v3462_v27, 1e+30  ;;  %v1470_v46 = vsel %vm1462_vm15, %v3458_v16, 1e+30  ;;  %v1501_v1 = vsel %vm1493_vm8, %v3462_v27, 1e+30 }
 0xa88   :  { %v1452_v45 = vpop.xlane.xlu0 %1451  ;;  %v1449_v39 = vpop.xlane.xlu2 %1448 }
 0xa89   :  { %vm1466_vm12 = vcmp.ge.f32.partialorder %v1452_v45, 57.0  ;;  %v1455_v32 = vpop.xlane.xlu1 %1454  ;;  %vm1495_vm14 = vcmp.ge.f32.partialorder %v1452_v45, 58.0  ;;  %vm1465_vm13 = vcmp.ge.f32.partialorder %v1449_v39, 57.0  ;;  %vm1494_vm6 = vcmp.ge.f32.partialorder %v1449_v39, 58.0 }
 0xa8a   :  { %vm1467_vm7 = vcmp.ge.f32.partialorder %v1455_v32, 57.0  ;;  %v1474_v30 = vsel %vm1466_vm12, %v3466_v25, 1e+30  ;;  %vm1496_vm9 = vcmp.ge.f32.partialorder %v1455_v32, 58.0  ;;  %v1503_v53 = vsel %vm1495_vm14, %v3466_v25, 1e+30 }
 0xa8b   :  { %v1475_v43 = vsel %vm1467_vm7, %v3484_v12, 1e+30  ;;  %v1499_v45 = vsel %vm1491_vm0, %v3458_v16, 1e+30  ;;  %v1478_v8 = vmin.f32 %v1470_v46, %v1474_v30  ;;  %v1504_v48 = vsel %vm1496_vm9, %v3484_v12, 1e+30 }
 0xa8c   :  { %v1507_v32 = vmin.f32 %v1499_v45, %v1503_v53  ;;  %v1479_v34 = vmin.f32 %v1471_v63, %v1475_v43  ;;  %v1473_v62 = vsel %vm1465_vm13, %v3464_v15, 1e+30  ;;  %v1502_v11 = vsel %vm1494_vm6, %v3464_v15, 1e+30 }
 0xa8d   :  { %v1508_v0 = vmin.f32 %v1500_v51, %v1504_v48 }
 0xa8e   :  { %v1482_v31 = vmin.f32 %v1478_v8, %v1479_v34  ;;  %v1546_v34 = vmul.f32 0.9, %v3372_v50 }
 0xa8f   :  { %v1511_v38 = vmin.f32 %v1507_v32, %v1508_v0  ;;  %v1558_v32 = vsub.f32 %v3358_v7, %v2618_v56 }
 0xa90   :  { %v1461_v39 = vpop.xlane.xlu0 %1460  ;;  %v1458_v36 = vpop.xlane.xlu2 %1457 }
 0xa91   :  { %vm1469_vm4 = vcmp.ge.f32.partialorder %v1461_v39, 57.0  ;;  %vm1498_vm12 = vcmp.ge.f32.partialorder %v1461_v39, 58.0  ;;  %vm1468_vm14 = vcmp.ge.f32.partialorder %v1458_v36, 57.0  ;;  %vm1497_vm7 = vcmp.ge.f32.partialorder %v1458_v36, 58.0 }
 0xa92   :  { %v1477_v37 = vsel %vm1469_vm4, %v3502_v60, 1e+30  ;;  %v1506_v5 = vsel %vm1498_vm12, %v3502_v60, 1e+30  ;;  %v1476_v30 = vsel %vm1468_vm14, %v3500_v14, 1e+30 }
 0xa93   :  { %v1481_v46 = vmin.f32 %v1473_v62, %v1477_v37  ;;  %v1510_v53 = vmin.f32 %v1502_v11, %v1506_v5  ;;  %v1480_v63 = vmin.f32 %v1472_v41, %v1476_v30  ;;  %v1505_v43 = vsel %vm1497_vm7, %v3500_v14, 1e+30 }
 0xa94   :  { %v1509_v45 = vmin.f32 %v1501_v1, %v1505_v43 }
 0xa95   :  { %v1483_v19 = vmin.f32 %v1480_v63, %v1481_v46  ;;  %v1557_v63 = vsub.f32 %v3356_v61, %v2621_v57 }
 0xa96   :  { %v1512_v47 = vmin.f32 %v1509_v45, %v1510_v53 }
 0xa97   :  { %v1484_v39 = vmin.f32 %v1482_v31, %v1483_v19  ;;  %v1545_v19 = vmul.f32 0.9, %v3366_v23  ;;  %v1543_v31 = vmul.f32 0.9, %v3360_v6 }
 0xa98   :  { %v1513_v10 = vmin.f32 %v1511_v38, %v1512_v47  ;;  %v1561_v47 = vsub.f32 %v3366_v23, %v2603_v49  ;;  %v1560_v23 = vsub.f32 %v3362_v2, %v2612_v54 }
 0xa99   :  { %v1485_v36 = vrot.slane %v1484_v39, 4 }
 0xa9a   :  { %v1514_v48 = vrot.slane %v1513_v10, 4 }
 0xa9b   :  { %v1486_v51 = vmin.f32 %v1484_v39, %v1485_v36  ;;  %v1540_v39 = vmul.f32 0.9, %v3354_v35 }
 0xa9c   :  { %v1515_v13 = vmin.f32 %v1513_v10, %v1514_v48  ;;  %v1562_v10 = vsub.f32 %v3372_v50, %v2607_v52  ;;  %v1554_v50 = vadd.f32 %v1546_v34, %v2985_v21 }
 0xa9d   :  { %v1487_v20 = vrot.slane %v1486_v51, 2 }
 0xa9e   :  { %v1516_v22 = vrot.slane %v1515_v13, 2 }
 0xa9f   :  { %v1488_v40 = vmin.f32 %v1486_v51, %v1487_v20 }
 0xaa0   :  { %v1517_v28 = vmin.f32 %v1515_v13, %v1516_v22 }
 0xaa1   :  { %v1489_v37 = vrot.slane %v1488_v40, 1 }
 0xaa2   :  { %v1518_v5 = vrot.slane %v1517_v28, 1 }
 0xaa3   :  { %v1490_v11 = vmin.f32 %v1488_v40, %v1489_v37  ;;  %v1539_v37 = vmul.f32 0.9, %v3352_v4 }
 0xaa4   :  { %v1519_v62 = vmin.f32 %v1517_v28, %v1518_v5  ;;  %v1544_v28 = vmul.f32 0.9, %v3362_v2  ;;  %v1542_v2 = vmul.f32 0.9, %v3358_v7  ;;  %v1551_v7 = vadd.f32 %v1543_v31, %v3011_v44 }
 0xaa6   :  { %v1520_v41 = vsub.f32 %v1519_v62, %v1490_v11 }
 0xaa8   :  { %v1521_v1 = vmul.f32 0.7, %v1520_v41 }
 0xaaa   :  { %v1522_v0 = vadd.f32 %v1521_v1, %v1490_v11  ;;  %v1555_v11 = vsub.f32 %v3352_v4, %v2627_v59  ;;  %v2487_v4 = vld [vmem:[%s3937_s5] sm:$0xff] }
 0xaac   :  { %vm1530_vm10 = vcmp.lt.f32.partialorder %v3502_v60, %v1522_v0  ;;  %vm1529_vm11 = vcmp.lt.f32.partialorder %v3500_v14, %v1522_v0  ;;  %vm1528_vm15 = vcmp.lt.f32.partialorder %v3484_v12, %v1522_v0  ;;  %vm1527_vm0 = vcmp.lt.f32.partialorder %v3466_v25, %v1522_v0 }
 0xaad   :  { %v1538_v40 = vsel %vm1530_vm10, 0.0, %v4032_v24  ;;  %v1537_v22 = vsel %vm1529_vm11, 0.0, %v4032_v24  ;;  %v1536_v20 = vsel %vm1528_vm15, 0.0, %v4032_v24  ;;  %v1559_v25 = vsub.f32 %v3360_v6, %v2615_v55 }
 0xaae   :  { %v1570_v13 = vmul.f32 %v1562_v10, %v1538_v40  ;;  %v1569_v38 = vmul.f32 %v1561_v47, %v1537_v22  ;;  %v1535_v12 = vsel %vm1527_vm0, 0.0, %v4032_v24  ;;  %vm1526_vm8 = vcmp.lt.f32.partialorder %v3464_v15, %v1522_v0  ;;  %v2488_v10 = vld [vmem:[%s3937_s5 + $0x8] sm:$0xff]  ;;  %v2490_v40 = vld [vmem:[%s3937_s5 + $0x18] sm:$0xff]  ;;  %v2491_v22 = vld [vmem:[%s3937_s5 + $0x20] sm:$0xff] }
 0xaaf   :  { %v1553_v60 = vadd.f32 %v1545_v19, %v2979_v33  ;;  %v1568_v8 = vmul.f32 %v1560_v23, %v1536_v20  ;;  %vm1525_vm9 = vcmp.lt.f32.partialorder %v3462_v27, %v1522_v0  ;;  %v1534_v30 = vsel %vm1526_vm8, 0.0, %v4032_v24  ;;  %v2492_v20 = vld [vmem:[%s3937_s5 + $0x28] sm:$0xff]  ;;  %v2493_v23 = vld [vmem:[%s3937_s5 + $0x30] sm:$0xff] }
 0xab0   :  { %v1578_v14 = vadd.f32 %v1570_v13, %v1554_v50  ;;  %v1552_v6 = vadd.f32 %v1544_v28, %v2975_v17  ;;  %v1567_v53 = vmul.f32 %v1559_v25, %v1535_v12  ;;  %vm1524_vm13 = vcmp.lt.f32.partialorder %v3460_v3, %v1522_v0  ;;  %v2489_v28 = vld [vmem:[%s3937_s5 + $0x10] sm:$0xff]  ;;  %v2494_v50 = vld [vmem:[%s3937_s5 + $0x38] sm:$0xff] }
 0xab1   :  { %v1577_v46 = vadd.f32 %v1569_v38, %v1553_v60  ;;  %v1541_v15 = vmul.f32 0.9, %v3356_v61  ;;  %v1533_v27 = vsel %vm1525_vm9, 0.0, %v4032_v24  ;;  %v1566_v45 = vmul.f32 %v1558_v32, %v1534_v30 }
 0xab2   :  { %1587 = vmatpush.msra.mxu0 %v1578_v14  ;;  %v1576_v43 = vadd.f32 %v1568_v8, %v1552_v6  ;;  %vm1523_vm6 = vcmp.lt.f32.partialorder %v3458_v16, %v1522_v0  ;;  %v1532_v36 = vsel %vm1524_vm13, 0.0, %v4032_v24  ;;  %v1556_v3 = vsub.f32 %v3354_v35, %v2624_v58 }
 0xab3   :  { %v1575_v48 = vadd.f32 %v1567_v53, %v1551_v7  ;;  %v1550_v61 = vadd.f32 %v1542_v2, %v3020_v26  ;;  %v1565_v51 = vmul.f32 %v1557_v63, %v1533_v27  ;;  %v1531_v5 = vsel %vm1523_vm6, 0.0, %v4032_v24 }
 0xab4   :  { %1588 = vmatpush.msra.mxu0 %v1577_v46  ;;  %v1549_v62 = vadd.f32 %v1541_v15, %v3027_v9  ;;  %v1564_v41 = vmul.f32 %v1556_v3, %v1532_v36  ;;  %v1548_v35 = vadd.f32 %v1540_v39, %v3035_v18  ;;  %v1563_v34 = vmul.f32 %v1555_v11, %v1531_v5 }
 0xab5   :  { %v1574_v16 = vadd.f32 %v1566_v45, %v1550_v61  ;;  %v1547_v19 = vadd.f32 %v1539_v37, %v3043_v29 }
 0xab6   :  { %1589 = vmatpush.msra.mxu0 %v1576_v43  ;;  %v1573_v1 = vadd.f32 %v1565_v51, %v1549_v62  ;;  %v1572_v0 = vadd.f32 %v1564_v41, %v1548_v35 }
 0xab7   :  { %v1571_v47 = vadd.f32 %v1563_v34, %v1547_v19 }
 0xab8   :  { %1590 = vmatpush.msra.mxu0 %v1575_v48 }
 0xaba   :  { %1591 = vmatpush.msra.mxu0 %v1574_v16 }
 0xabc   :  { %1592 = vmatpush.msra.mxu0 %v1573_v1 }
 0xabe   :  { %1593 = vmatpush.msra.mxu0 %v1572_v0 }
 0xac0   :  { %1594 = vmatpush.msra.mxu0 %v1571_v47 }
 0xac1   :  { %2189 = vmatmul.msk.f32.vlgmr.msra.gmra.mxu0 %vm310_vm2, %v2487_v4 }
 0xac9   :  { %2190 = vmatmul.msk.f32.gmra.mxu0 %vm310_vm2, %v2488_v10 }
 0xad1   :  { %2191 = vmatmul.msk.f32.gmra.mxu0 %vm310_vm2, %v2489_v28 }
 0xad9   :  { %2192 = vmatmul.msk.f32.gmra.mxu0 %vm310_vm2, %v2490_v40 }
 0xae1   :  { %2193 = vmatmul.msk.f32.gmra.mxu0 %vm310_vm2, %v2491_v22 }
 0xae9   :  { %2194 = vmatmul.msk.f32.gmra.mxu0 %vm310_vm2, %v2492_v20 }
 0xaf1   :  { %2195 = vmatmul.msk.f32.gmra.mxu0 %vm310_vm2, %v2493_v23 }
 0xaf9   :  { %2196 = vmatmul.msk.f32.gmra.mxu0 %vm310_vm2, %v2494_v50 }
 0xb3e   :  { %v3618_v13 = vpop.f32.mrf.mxu0 }
 0xb3f   :  { %v1620_v53 = vsel %vm186_vm1, %v3618_v13, -inf }
 0xb46   :  { %v3620_v38 = vpop.f32.mrf.mxu0 }
 0xb47   :  { %v1623_v63 = vsel %vm186_vm1, %v3620_v38, -inf }
 0xb4e   :  { %v3622_v31 = vpop.f32.mrf.mxu0 }
 0xb4f   :  { %v1626_v2 = vsel %vm186_vm1, %v3622_v31, -inf }
 0xb56   :  { %v3624_v25 = vpop.f32.mrf.mxu0 }
 0xb57   :  { %v1629_v46 = vsel %vm186_vm1, %v3624_v25, -inf }
 0xb5e   :  { %v3626_v12 = vpop.f32.mrf.mxu0 }
 0xb5f   :  { %v1632_v15 = vsel %vm186_vm1, %v3626_v12, -inf }
 0xb66   :  { %v3628_v14 = vpop.f32.mrf.mxu0 }
 0xb67   :  { %v1635_v60 = vsel %vm186_vm1, %v3628_v14, -inf }
 0xb68   :  { %1636 = vmax.xlane.f32.xlu0 %v1635_v60 }
 0xb6e   :  { %v3632_v8 = vpop.f32.mrf.mxu0 }
 0xb6f   :  { %v1638_v32 = vsel %vm186_vm1, %v3632_v8, -inf }
 0xb70   :  { %1627 = vmax.xlane.f32.xlu0 %v1626_v2  ;;  %1639 = vmax.xlane.f32.xlu2 %v1638_v32 }
 0xb76   :  { %v3638_v30 = vpop.f32.mrf.mxu0 }
 0xb77   :  { %v1641_v6 = vsel %vm186_vm1, %v3638_v30, -inf }
 0xb78   :  { %1630 = vmax.xlane.f32.xlu2 %v1629_v46  ;;  %1642 = vmax.xlane.f32.xlu1 %v1641_v6 }
 0xb80   :  { %1621 = vmax.xlane.f32.xlu2 %v1620_v53  ;;  %1633 = vmax.xlane.f32.xlu1 %v1632_v15 }
 0xb88   :  { %1624 = vmax.xlane.f32.xlu1 %v1623_v63 }
 0xbdb   :  { %v1637_v27 = vpop.xlane.xlu0 %1636 }
 0xbdc   :  { %v3651_v43 = vsub.f32 %v3628_v14, %v1637_v27 }
 0xbde   :  { %v1662_v7 = vmul.f32 1.442695, %v3651_v43 }
 0xbe0   :  { %2399 = vpow2.f32 %v1662_v7 }
 0xbe3   :  { %v1628_v45 = vpop.xlane.xlu0 %1627  ;;  %v1640_v39 = vpop.xlane.xlu2 %1639 }
 0xbe4   :  { %v3655_v36 = vsub.f32 %v3622_v31, %v1628_v45  ;;  %v3658_v3 = vsub.f32 %v3632_v8, %v1640_v39 }
 0xbe6   :  { %v2400_v48 = vpop.eup %2399  ;;  %v1656_v61 = vmul.f32 1.442695, %v3655_v36  ;;  %v1664_v51 = vmul.f32 1.442695, %v3658_v3 }
 0xbe7   :  { %v1683_v37 = vsel %vm186_vm1, %v2400_v48, 0.0 }
 0xbe8   :  { %2401 = vpow2.f32 %v1656_v61  ;;  %1684 = vadd.xlane.f32.xlu2 %v1683_v37 }
 0xbe9   :  { %2403 = vpow2.f32 %v1664_v51 }
 0xbeb   :  { %v1631_v5 = vpop.xlane.xlu2 %1630  ;;  %v1643_v11 = vpop.xlane.xlu1 %1642 }
 0xbec   :  { %v3664_v16 = vsub.f32 %v3624_v25, %v1631_v5  ;;  %v3667_v62 = vsub.f32 %v3638_v30, %v1643_v11 }
 0xbee   :  { %v2402_v41 = vpop.eup %2401  ;;  %v1658_v1 = vmul.f32 1.442695, %v3664_v16  ;;  %v1666_v35 = vmul.f32 1.442695, %v3667_v62 }
 0xbef   :  { %v2404_v34 = vpop.eup %2403  ;;  %v1674_v0 = vsel %vm186_vm1, %v2402_v41, 0.0 }
 0xbf0   :  { %2405 = vpow2.f32 %v1658_v1  ;;  %1675 = vadd.xlane.f32.xlu2 %v1674_v0  ;;  %v1686_v19 = vsel %vm186_vm1, %v2404_v34, 0.0 }
 0xbf1   :  { %2407 = vpow2.f32 %v1666_v35  ;;  %1687 = vadd.xlane.f32.xlu1 %v1686_v19 }
 0xbf3   :  { %v1622_v47 = vpop.xlane.xlu2 %1621  ;;  %v1634_v4 = vpop.xlane.xlu1 %1633 }
 0xbf4   :  { %v3674_v10 = vsub.f32 %v3618_v13, %v1622_v47  ;;  %v3677_v28 = vsub.f32 %v3626_v12, %v1634_v4 }
 0xbf6   :  { %v2406_v40 = vpop.eup %2405  ;;  %v1652_v22 = vmul.f32 1.442695, %v3674_v10  ;;  %v1660_v20 = vmul.f32 1.442695, %v3677_v28 }
 0xbf7   :  { %v2408_v23 = vpop.eup %2407  ;;  %v1677_v50 = vsel %vm186_vm1, %v2406_v40, 0.0 }
 0xbf8   :  { %2409 = vpow2.f32 %v1652_v22  ;;  %v1689_v60 = vsel %vm186_vm1, %v2408_v23, 0.0 }
 0xbf9   :  { %2411 = vpow2.f32 %v1660_v20  ;;  %1678 = vadd.xlane.f32.xlu1 %v1677_v50  ;;  %1690 = vadd.xlane.f32.xlu0 %v1689_v60 }
 0xbfb   :  { %v1625_v2 = vpop.xlane.xlu1 %1624 }
 0xbfc   :  { %v3684_v32 = vsub.f32 %v3620_v38, %v1625_v2 }
 0xbfe   :  { %v2410_v46 = vpop.eup %2409  ;;  %v1654_v6 = vmul.f32 1.442695, %v3684_v32 }
 0xbff   :  { %v2412_v53 = vpop.eup %2411  ;;  %v1668_v15 = vsel %vm186_vm1, %v2410_v46, 0.0 }
 0xc00   :  { %2413 = vpow2.f32 %v1654_v6  ;;  %v1680_v63 = vsel %vm186_vm1, %v2412_v53, 0.0 }
 0xc01   :  { %1669 = vadd.xlane.f32.xlu1 %v1668_v15  ;;  %1681 = vadd.xlane.f32.xlu0 %v1680_v63 }
 0xc06   :  { %v2414_v27 = vpop.eup %2413 }
 0xc07   :  { %v1671_v7 = vsel %vm186_vm1, %v2414_v27, 0.0 }
 0xc09   :  { %1672 = vadd.xlane.f32.xlu0 %v1671_v7 }
 0xc5b   :  { %v1685_v45 = vpop.xlane.xlu2 %1684 }
 0xc5c   :  { %2415 = vlog2.f32 %v1685_v45 }
 0xc62   :  { %v2416_v61 = vpop.eup %2415 }
 0xc63   :  { %v1676_v39 = vpop.xlane.xlu2 %1675  ;;  %v1703_v51 = vmul.f32 0.6931472, %v2416_v61 }
 0xc64   :  { %2417 = vlog2.f32 %v1676_v39  ;;  %v1688_v48 = vpop.xlane.xlu1 %1687 }
 0xc65   :  { %2419 = vlog2.f32 %v1688_v48  ;;  %v1713_v11 = vsub.f32 %v3651_v43, %v1703_v51  ;;  %v4065_v51 = vld [vmem:[#allocation4_spill] sm:$0xff] }
 0xc67   :  { %v1726_v19 = vmul.f32 1.442695, %v1713_v11 }
 0xc6a   :  { %v2418_v37 = vpop.eup %2417 }
 0xc6b   :  { %v1697_v5 = vmul.f32 0.6931472, %v2418_v37  ;;  %v2420_v35 = vpop.eup %2419 }
 0xc6c   :  { %v1691_v41 = vpop.xlane.xlu0 %1690  ;;  %v1679_v1 = vpop.xlane.xlu1 %1678  ;;  %v1705_v47 = vmul.f32 0.6931472, %v2420_v35 }
 0xc6d   :  { %v1710_v34 = vsub.f32 %v3655_v36, %v1697_v5  ;;  %2421 = vlog2.f32 %v1691_v41 }
 0xc6e   :  { %v1714_v40 = vsub.f32 %v3658_v3, %v1705_v47 }
 0xc6f   :  { %v1720_v0 = vmul.f32 1.442695, %v1710_v34  ;;  %v1734_v50 = vsub.f32 %v1710_v34, %v4039_v42 }
 0xc70   :  { %v1728_v2 = vmul.f32 1.442695, %v1714_v40 }
 0xc71   :  { %2423 = vpow2.f32 %v1720_v0 }
 0xc72   :  { %2425 = vlog2.f32 %v1679_v1 }
 0xc73   :  { %v2422_v4 = vpop.eup %2421  ;;  %2427 = vpow2.f32 %v1726_v19 }
 0xc74   :  { %v1707_v22 = vmul.f32 0.6931472, %v2422_v4  ;;  %v1682_v20 = vpop.xlane.xlu0 %1681  ;;  %v1670_v23 = vpop.xlane.xlu1 %1669 }
 0xc75   :  { %2429 = vlog2.f32 %v1682_v20 }
 0xc76   :  { %v1715_v43 = vsub.f32 %v3667_v62, %v1707_v22  ;;  %2431 = vlog2.f32 %v1670_v23  ;;  %v4064_v62 = vld [vmem:[#allocation6_spill] sm:$0xff] }
 0xc77   :  { %v2424_v36 = vpop.eup %2423  ;;  %v1737_v39 = vsub.f32 %v1713_v11, %v4064_v62  ;;  %v4066_v11 = vld [vmem:[#allocation5_spill] sm:$0xff] }
 0xc78   :  { %v2426_v60 = vpop.eup %2425  ;;  %v1730_v46 = vmul.f32 1.442695, %v1715_v43  ;;  %v1742_v6 = vmul.f32 %v2424_v36, %v1734_v50  ;;  %v1739_v37 = vsub.f32 %v1715_v43, %v4065_v51  ;;  %v1738_v22 = vsub.f32 %v1714_v40, %v4066_v11  ;;  %v4067_v43 = vld [vmem:[#allocation9_spill] sm:$0xff] }
 0xc79   :  { %v2428_v53 = vpop.eup %2427  ;;  %v1699_v3 = vmul.f32 0.6931472, %v2426_v60 }
 0xc7a   :  { %2433 = vpow2.f32 %v1730_v46  ;;  %v1754_v15 = vsel %vm186_vm1, %v1742_v6, 0.0  ;;  %v1745_v61 = vmul.f32 %v2428_v53, %v1737_v39 }
 0xc7b   :  { %v2430_v63 = vpop.eup %2429  ;;  %1755 = vadd.xlane.f32.xlu1 %v1754_v15  ;;  %2435 = vpow2.f32 %v1728_v2  ;;  %v1711_v5 = vsub.f32 %v3664_v16, %v1699_v3  ;;  %v4068_v2 = vld [vmem:[#allocation3_spill] sm:$0xff] }
 0xc7c   :  { %v2432_v27 = vpop.eup %2431  ;;  %v1701_v7 = vmul.f32 0.6931472, %v2430_v63  ;;  %v1673_v45 = vpop.xlane.xlu0 %1672  ;;  %v1763_v47 = vsel %vm186_vm1, %v1745_v61, 0.0 }
 0xc7d   :  { %v1693_v48 = vmul.f32 0.6931472, %v2432_v27  ;;  %2437 = vlog2.f32 %v1673_v45  ;;  %v1722_v20 = vmul.f32 1.442695, %v1711_v5  ;;  %v4070_v27 = vld [vmem:[#allocation2_spill] sm:$0xff] }
 0xc7e   :  { %v1712_v42 = vsub.f32 %v3677_v28, %v1701_v7 }
 0xc7f   :  { %v1708_v41 = vsub.f32 %v3674_v10, %v1693_v48 }
 0xc80   :  { %v2434_v1 = vpop.eup %2433  ;;  %v1724_v35 = vmul.f32 1.442695, %v1712_v42  ;;  %v1736_v46 = vsub.f32 %v1712_v42, %v4068_v2 }
 0xc81   :  { %v1747_v34 = vmul.f32 %v2434_v1, %v1739_v37  ;;  %v1716_v0 = vmul.f32 1.442695, %v1708_v41  ;;  %v2436_v19 = vpop.eup %2435  ;;  %v1732_v50 = vsub.f32 %v1708_v41, %v4067_v43  ;;  %v4071_v37 = vmov 1.0   ;;  %v4076_v43 = vld [vmem:[#allocation12_spill] sm:$0xff] }
 0xc82   :  { %v1746_v16 = vmul.f32 %v2436_v19, %v1738_v22 }
 0xc83   :  { %v2438_v4 = vpop.eup %2437  ;;  %2439 = vpow2.f32 %v1716_v0  ;;  %2197 = vmatpush.xpose.msk.msra.mxu2 %vm186_vm1, %v1747_v34  ;;  %1764 = vadd.xlane.f32.xlu1 %v1763_v47 }
 0xc84   :  { %2441 = vpow2.f32 %v1724_v35  ;;  %v1695_v28 = vmul.f32 0.6931472, %v2438_v4  ;;  %v1766_v51 = vsel %vm186_vm1, %v1746_v16, 0.0 }
 0xc85   :  { %2443 = vpow2.f32 %v1722_v20 }
 0xc86   :  { %v1709_v10 = vsub.f32 %v3684_v32, %v1695_v28  ;;  %v4069_v32 = vld [vmem:[#allocation7_spill] sm:$0xff] }
 0xc87   :  { %2198 = vmatpush.xpose.msk.msra.mxu2 %vm186_vm1, %v1746_v16  ;;  %v1735_v3 = vsub.f32 %v1711_v5, %v4069_v32  ;;  %v1769_v5 = vsel %vm186_vm1, %v1747_v34, 0.0  ;;  %v4072_v34 = vmov 0.0   ;;  %v4074_v28 = vld [vmem:[#allocation11_spill] sm:$0xff] }
 0xc88   :  { %v1718_v23 = vmul.f32 1.442695, %v1709_v10  ;;  %v1733_v7 = vsub.f32 %v1709_v10, %v4070_v27  ;;  %vm4077_vm7 = vcmp.eq.s32.totalorder %v4076_v43, %v4074_v28 }
 0xc89   :  { %v2440_v36 = vpop.eup %2439 }
 0xc8a   :  { %v2442_v60 = vpop.eup %2441  ;;  %2445 = vpow2.f32 %v1718_v23  ;;  %v1740_v40 = vmul.f32 %v2440_v36, %v1732_v50 }
 0xc8b   :  { %2199 = vmatpush.xpose.msk.msra.mxu2 %vm186_vm1, %v1745_v61  ;;  %v2444_v15 = vpop.eup %2443  ;;  %v1744_v63 = vmul.f32 %v2442_v60, %v1736_v46 }
 0xc8c   :  { %v1748_v53 = vsel %vm186_vm1, %v1740_v40, 0.0  ;;  %v1743_v62 = vmul.f32 %v2444_v15, %v1735_v3  ;;  %v4080_v3 = vld [vmem:[#allocation14_spill] sm:$0xff] }
 0xc8d   :  { %1749 = vadd.xlane.f32.xlu2 %v1748_v53  ;;  %v1760_v61 = vsel %vm186_vm1, %v1744_v63, 0.0  ;;  %vm4081_vm15 = vcmp.eq.s32.totalorder %v4080_v3, %v4074_v28 }
 0xc8e   :  { %v1757_v42 = vsel %vm186_vm1, %v1743_v62, 0.0 }
 0xc8f   :  { %2200 = vmatpush.xpose.msk.msra.mxu2 %vm186_vm1, %v1744_v63  ;;  %v4078_v63 = vld [vmem:[#allocation16_spill] sm:$0xff] }
 0xc90   :  { %v2446_v45 = vpop.eup %2445  ;;  %vm4079_vm11 = vcmp.eq.s32.totalorder %v4078_v63, %v4074_v28 }
 0xc91   :  { %v1741_v39 = vmul.f32 %v2446_v45, %v1733_v7 }
 0xc93   :  { %2201 = vmatpush.xpose.msk.msra.mxu2 %vm186_vm1, %v1743_v62  ;;  %v1751_v48 = vsel %vm186_vm1, %v1741_v39, 0.0  ;;  %v4082_v62 = vld [vmem:[#allocation15_spill] sm:$0xff] }
 0xc94   :  { %1752 = vadd.xlane.f32.xlu0 %v1751_v48  ;;  %vm4083_vm0 = vcmp.eq.s32.totalorder %v4082_v62, %v4074_v28 }
 0xc95   :  { %1758 = vadd.xlane.f32.xlu2 %v1757_v42 }
 0xc97   :  { %2202 = vmatpush.xpose.msk.msra.mxu2 %vm186_vm1, %v1742_v6 }
 0xc9b   :  { %2203 = vmatpush.xpose.msk.msra.mxu2 %vm186_vm1, %v1741_v39 }
 0xc9c   :  { %1761 = vadd.xlane.f32.xlu0 %v1760_v61 }
 0xc9d   :  { %1767 = vadd.xlane.f32.xlu2 %v1766_v51 }
 0xc9f   :  { %2204 = vmatpush.xpose.msk.msra.mxu2 %vm186_vm1, %v1740_v40 }
 0xca2   :  { %2205 = vmatmul.msk.f32.vlgmr.msra.gmra.mxu2 %vm186_vm1, %v4071_v37 }
 0xca4   :  { %1770 = vadd.xlane.f32.xlu0 %v1769_v5  ;;  %v4084_v5 = vld [vmem:[#allocation18_spill] sm:$0xff] }
 0xca5   :  { %vm4085_vm13 = vcmp.eq.s32.totalorder %v4084_v5, %v4074_v28 }
 0xcee   :  { %v3728_v6 = vpop.xlane.xlu1 %1755 }
 0xcf6   :  { %v3750_v36 = vpop.xlane.xlu1 %1764 }
 0xd00   :  { %v3724_v41 = vpop.xlane.xlu2 %1749 }
 0xd07   :  { %v3726_v1 = vpop.xlane.xlu0 %1752 }
 0xd08   :  { %v3730_v19 = vpop.xlane.xlu2 %1758 }
 0xd0f   :  { %v3732_v47 = vpop.xlane.xlu0 %1761 }
 0xd10   :  { %v3766_v7 = vpop.xlane.xlu2 %1767 }
 0xd17   :  { %v3768_v45 = vpop.xlane.xlu0 %1770 }
 0xd25   :  { %v1813_v35 = vpop.f32.mrf.mxu2 }
 0xd26   :  { %v1816_v0 = vperm.slane %v1813_v35, 0 }
 0xd28   :  { %vm1818_vm4 = vcmp.le.f32.partialorder %v1816_v0, %v3726_v1  ;;  %vm1817_vm12 = vcmp.le.f32.partialorder %v1816_v0, %v3724_v41  ;;  %vm1819_vm14 = vcmp.le.f32.partialorder %v1816_v0, %v3728_v6  ;;  %vm1821_vm10 = vcmp.le.f32.partialorder %v1816_v0, %v3732_v47 }
 0xd29   :  { %v2207_v4 = vsel %vm1818_vm4, 1.0, %v4072_v34  ;;  %v2206_v11 = vsel %vm1817_vm12, 1.0, %v4072_v34  ;;  %v2208_v22 = vsel %vm1819_vm14, 1.0, %v4072_v34  ;;  %v2210_v46 = vsel %vm1821_vm10, 1.0, %v4072_v34 }
 0xd2a   :  { %v1842_v16 = vsel %vm303_vm5, 1.0, %v2207_v4  ;;  %v1841_v23 = vsel %vm302_vm3, 1.0, %v2206_v11  ;;  %v1843_v50 = vsel %vm4077_vm7, 1.0, %v2208_v22  ;;  %vm1820_vm5 = vcmp.le.f32.partialorder %v1816_v0, %v3730_v19  ;;  %v4086_v4 = vld [vmem:[#allocation17_spill] sm:$0xff] }
 0xd2b   :  { %v1852_v60 = vsel %vm310_vm2, %v1842_v16, 0.0  ;;  %v1849_v40 = vsel %vm310_vm2, %v1841_v23, 0.0  ;;  %v1855_v2 = vsel %vm310_vm2, %v1843_v50, 0.0  ;;  %vm1822_vm3 = vcmp.le.f32.partialorder %v1816_v0, %v3750_v36 }
 0xd2c   :  { %1853 = vadd.xlane.f32.xlu2 %v1852_v60  ;;  %1850 = vadd.xlane.f32.xlu1 %v1849_v40  ;;  %v2209_v53 = vsel %vm1820_vm5, 1.0, %v4072_v34  ;;  %v2211_v15 = vsel %vm1822_vm3, 1.0, %v4072_v34  ;;  %v1845_v32 = vsel %vm4079_vm11, 1.0, %v2210_v46  ;;  %vm1824_vm8 = vcmp.le.f32.partialorder %v1816_v0, %v3768_v45 }
 0xd2d   :  { %1856 = vadd.xlane.f32.xlu0 %v1855_v2  ;;  %v1844_v27 = vsel %vm4081_vm15, 1.0, %v2209_v53  ;;  %v1846_v39 = vsel %vm4083_vm0, 1.0, %v2211_v15  ;;  %vm1823_vm9 = vcmp.le.f32.partialorder %v1816_v0, %v3766_v7  ;;  %v1861_v48 = vsel %vm310_vm2, %v1845_v32, 0.0 }
 0xd2e   :  { %v1858_v42 = vsel %vm310_vm2, %v1844_v27, 0.0  ;;  %v1864_v61 = vsel %vm310_vm2, %v1846_v39, 0.0  ;;  %v2213_v51 = vsel %vm1824_vm8, 1.0, %v4072_v34  ;;  %v2212_v37 = vsel %vm1823_vm9, 1.0, %v4072_v34 }
 0xd2f   :  { %v1848_v35 = vsel %vm4085_vm13, 1.0, %v2213_v51  ;;  %vm4087_vm6 = vcmp.eq.s32.totalorder %v4086_v4, %v4074_v28 }
 0xd30   :  { %v1847_v0 = vsel %vm4087_vm6, 1.0, %v2212_v37  ;;  %v1870_v11 = vsel %vm310_vm2, %v1848_v35, 0.0 }
 0xd31   :  { %v1867_v22 = vsel %vm310_vm2, %v1847_v0, 0.0 }
 0xd34   :  { %1862 = vadd.xlane.f32.xlu2 %v1861_v48  ;;  %1859 = vadd.xlane.f32.xlu1 %v1858_v42 }
 0xd35   :  { %1865 = vadd.xlane.f32.xlu0 %v1864_v61 }
 0xd3c   :  { %1871 = vadd.xlane.f32.xlu2 %v1870_v11  ;;  %1868 = vadd.xlane.f32.xlu1 %v1867_v22 }
 0xd9f   :  { %v1854_v20 = vpop.xlane.xlu2 %1853  ;;  %v1851_v16 = vpop.xlane.xlu1 %1850 }
 0xda0   :  { %v1857_v10 = vpop.xlane.xlu0 %1856  ;;  %vm1874_vm4 = vcmp.ge.f32.partialorder %v1854_v20, 57.0  ;;  %vm1903_vm10 = vcmp.ge.f32.partialorder %v1854_v20, 58.0  ;;  %vm1873_vm3 = vcmp.ge.f32.partialorder %v1851_v16, 57.0  ;;  %vm1902_vm11 = vcmp.ge.f32.partialorder %v1851_v16, 58.0 }
 0xda1   :  { %vm1875_vm5 = vcmp.ge.f32.partialorder %v1857_v10, 57.0  ;;  %v1882_v28 = vsel %vm1874_vm4, %v3726_v1, 1e+30  ;;  %vm1904_vm15 = vcmp.ge.f32.partialorder %v1857_v10, 58.0  ;;  %v1911_v2 = vsel %vm1903_vm10, %v3726_v1, 1e+30 }
 0xda2   :  { %v1883_v46 = vsel %vm1875_vm5, %v3728_v6, 1e+30  ;;  %v1881_v53 = vsel %vm1873_vm3, %v3724_v41, 1e+30  ;;  %v1912_v15 = vsel %vm1904_vm15, %v3728_v6, 1e+30 }
 0xda3   :  { %v1910_v63 = vsel %vm1902_vm11, %v3724_v41, 1e+30 }
 0xda7   :  { %v1863_v23 = vpop.xlane.xlu2 %1862  ;;  %v1860_v43 = vpop.xlane.xlu1 %1859 }
 0xda8   :  { %vm1877_vm12 = vcmp.ge.f32.partialorder %v1863_v23, 57.0  ;;  %v1866_v34 = vpop.xlane.xlu0 %1865  ;;  %vm1906_vm14 = vcmp.ge.f32.partialorder %v1863_v23, 58.0  ;;  %vm1876_vm0 = vcmp.ge.f32.partialorder %v1860_v43, 57.0  ;;  %vm1905_vm8 = vcmp.ge.f32.partialorder %v1860_v43, 58.0 }
 0xda9   :  { %vm1878_vm7 = vcmp.ge.f32.partialorder %v1866_v34, 57.0  ;;  %v1885_v50 = vsel %vm1877_vm12, %v3732_v47, 1e+30  ;;  %vm1907_vm2 = vcmp.ge.f32.partialorder %v1866_v34, 58.0  ;;  %v1914_v60 = vsel %vm1906_vm14, %v3732_v47, 1e+30 }
 0xdaa   :  { %v1886_v40 = vsel %vm1878_vm7, %v3750_v36, 1e+30  ;;  %v1889_v32 = vmin.f32 %v1881_v53, %v1885_v50  ;;  %v1915_v3 = vsel %vm1907_vm2, %v3750_v36, 1e+30  ;;  %v1918_v27 = vmin.f32 %v1910_v63, %v1914_v60 }
 0xdab   :  { %v1890_v62 = vmin.f32 %v1882_v28, %v1886_v40  ;;  %v1884_v39 = vsel %vm1876_vm0, %v3730_v19, 1e+30  ;;  %v1913_v48 = vsel %vm1905_vm8, %v3730_v19, 1e+30  ;;  %v1919_v51 = vmin.f32 %v1911_v2, %v1915_v3 }
 0xdad   :  { %v1893_v16 = vmin.f32 %v1889_v32, %v1890_v62  ;;  %v1922_v23 = vmin.f32 %v1918_v27, %v1919_v51  ;;  %v1951_v27 = vmul.f32 0.9, %v3620_v38  ;;  %v1952_v62 = vmul.f32 0.9, %v3622_v31 }
 0xdaf   :  { %v1872_v42 = vpop.xlane.xlu2 %1871  ;;  %v1869_v61 = vpop.xlane.xlu1 %1868 }
 0xdb0   :  { %vm1880_vm9 = vcmp.ge.f32.partialorder %v1872_v42, 57.0  ;;  %vm1909_vm13 = vcmp.ge.f32.partialorder %v1872_v42, 58.0  ;;  %vm1879_vm6 = vcmp.ge.f32.partialorder %v1869_v61, 57.0  ;;  %vm1908_vm4 = vcmp.ge.f32.partialorder %v1869_v61, 58.0 }
 0xdb1   :  { %v1888_v37 = vsel %vm1880_vm9, %v3768_v45, 1e+30  ;;  %v1917_v5 = vsel %vm1909_vm13, %v3768_v45, 1e+30  ;;  %v1887_v35 = vsel %vm1879_vm6, %v3766_v7, 1e+30 }
 0xdb2   :  { %v1892_v4 = vmin.f32 %v1884_v39, %v1888_v37  ;;  %v1921_v0 = vmin.f32 %v1913_v48, %v1917_v5  ;;  %v1891_v11 = vmin.f32 %v1883_v46, %v1887_v35  ;;  %v1916_v22 = vsel %vm1908_vm4, %v3766_v7, 1e+30 }
 0xdb3   :  { %v1920_v20 = vmin.f32 %v1912_v15, %v1916_v22  ;;  %v1950_v15 = vmul.f32 0.9, %v3618_v13  ;;  %v1966_v37 = vsub.f32 %v3618_v13, %v2627_v59  ;;  %v1959_v22 = vadd.f32 %v1951_v27, %v3035_v18 }
 0xdb4   :  { %v1894_v10 = vmin.f32 %v1891_v11, %v1892_v4  ;;  %v1967_v4 = vsub.f32 %v3620_v38, %v2624_v58  ;;  %v1960_v11 = vadd.f32 %v1952_v62, %v3027_v9  ;;  %v1953_v59 = vmul.f32 0.9, %v3624_v25 }
 0xdb5   :  { %v1923_v43 = vmin.f32 %v1920_v20, %v1921_v0  ;;  %v1958_v35 = vadd.f32 %v1950_v15, %v3043_v29  ;;  %v1968_v0 = vsub.f32 %v3622_v31, %v2621_v57  ;;  %v1954_v9 = vmul.f32 0.9, %v3626_v12 }
 0xdb6   :  { %v1895_v34 = vmin.f32 %v1893_v16, %v1894_v10  ;;  %v1955_v31 = vmul.f32 0.9, %v3628_v14  ;;  %v1969_v16 = vsub.f32 %v3624_v25, %v2618_v56  ;;  %v1970_v10 = vsub.f32 %v3626_v12, %v2615_v55 }
 0xdb7   :  { %v1924_v28 = vmin.f32 %v1922_v23, %v1923_v43  ;;  %v1962_v55 = vadd.f32 %v1954_v9, %v3011_v44  ;;  %v1961_v25 = vadd.f32 %v1953_v59, %v3020_v26  ;;  %v1956_v44 = vmul.f32 0.9, %v3632_v8 }
 0xdb8   :  { %v1896_v50 = vrot.slane %v1895_v34, 4  ;;  %v1963_v56 = vadd.f32 %v1955_v31, %v2975_v17 }
 0xdb9   :  { %v1925_v60 = vrot.slane %v1924_v28, 4 }
 0xdba   :  { %v1897_v40 = vmin.f32 %v1895_v34, %v1896_v50 }
 0xdbb   :  { %v1926_v2 = vmin.f32 %v1924_v28, %v1925_v60 }
 0xdbc   :  { %v1898_v53 = vrot.slane %v1897_v40, 2 }
 0xdbd   :  { %v1927_v63 = vrot.slane %v1926_v2, 2 }
 0xdbe   :  { %v1899_v3 = vmin.f32 %v1897_v40, %v1898_v53  ;;  %v1973_v53 = vsub.f32 %v3638_v30, %v2607_v52  ;;  %v1964_v52 = vadd.f32 %v1956_v44, %v2979_v33 }
 0xdbf   :  { %v1928_v42 = vmin.f32 %v1926_v2, %v1927_v63  ;;  %v1957_v2 = vmul.f32 0.9, %v3638_v30 }
 0xdc0   :  { %v1900_v39 = vrot.slane %v1899_v3, 1 }
 0xdc1   :  { %v1929_v48 = vrot.slane %v1928_v42, 1 }
 0xdc2   :  { %v1901_v46 = vmin.f32 %v1899_v3, %v1900_v39  ;;  %v1965_v39 = vadd.f32 %v1957_v2, %v2985_v21 }
 0xdc3   :  { %v1930_v61 = vmin.f32 %v1928_v42, %v1929_v48 }
 0xdc5   :  { %v1931_v32 = vsub.f32 %v1930_v61, %v1901_v46 }
 0xdc7   :  { %v1932_v51 = vmul.f32 0.7, %v1931_v32 }
 0xdc9   :  { %v1933_v5 = vadd.f32 %v1932_v51, %v1901_v46 }
 0xdcb   :  { %vm1936_vm12 = vcmp.lt.f32.partialorder %v3728_v6, %v1933_v5  ;;  %vm1935_vm14 = vcmp.lt.f32.partialorder %v3726_v1, %v1933_v5  ;;  %vm1934_vm7 = vcmp.lt.f32.partialorder %v3724_v41, %v1933_v5  ;;  %vm1939_vm10 = vcmp.lt.f32.partialorder %v3750_v36, %v1933_v5 }
 0xdcc   :  { %v1944_v29 = vsel %vm1936_vm12, 0.0, %v4032_v24  ;;  %v1943_v58 = vsel %vm1935_vm14, 0.0, %v4032_v24  ;;  %v1942_v57 = vsel %vm1934_vm7, 0.0, %v4032_v24  ;;  %v1947_v1 = vsel %vm1939_vm10, 0.0, %v4032_v24 }
 0xdcd   :  { %v1976_v13 = vmul.f32 %v1968_v0, %v1944_v29  ;;  %v1975_v18 = vmul.f32 %v1967_v4, %v1943_v58  ;;  %v1974_v38 = vmul.f32 %v1966_v37, %v1942_v57  ;;  %vm1938_vm5 = vcmp.lt.f32.partialorder %v3732_v47, %v1933_v5 }
 0xdce   :  { %vm1937_vm3 = vcmp.lt.f32.partialorder %v3730_v19, %v1933_v5  ;;  %v1971_v41 = vsub.f32 %v3628_v14, %v2612_v54  ;;  %v1946_v23 = vsel %vm1938_vm5, 0.0, %v4032_v24  ;;  %vm1941_vm11 = vcmp.lt.f32.partialorder %v3768_v45, %v1933_v5 }
 0xdcf   :  { %v1984_v6 = vadd.f32 %v1976_v13, %v1960_v11  ;;  %v1983_v36 = vadd.f32 %v1975_v18, %v1959_v22  ;;  %v1982_v20 = vadd.f32 %v1974_v38, %v1958_v35  ;;  %v1945_v43 = vsel %vm1937_vm3, 0.0, %v4032_v24 }
 0xdd0   :  { %v1979_v54 = vmul.f32 %v1971_v41, %v1947_v1  ;;  %v1978_v14 = vmul.f32 %v1970_v10, %v1946_v23  ;;  %v1977_v28 = vmul.f32 %v1969_v16, %v1945_v43  ;;  %vm1940_vm15 = vcmp.lt.f32.partialorder %v3766_v7, %v1933_v5 }
 0xdd1   :  { %v1996_v47 = vsel %vm186_vm1, %v1984_v6, -inf  ;;  %v1993_v19 = vsel %vm186_vm1, %v1983_v36, -inf  ;;  %v1990_v34 = vsel %vm186_vm1, %v1982_v20, -inf  ;;  %v1949_v40 = vsel %vm1941_vm11, 0.0, %v4032_v24 }
 0xdd2   :  { %1997 = vmax.xlane.f32.xlu2 %v1996_v47  ;;  %1994 = vmax.xlane.f32.xlu1 %v1993_v19  ;;  %v1987_v12 = vadd.f32 %v1979_v54, %v1963_v56  ;;  %v1986_v50 = vadd.f32 %v1978_v14, %v1962_v55  ;;  %v1985_v60 = vadd.f32 %v1977_v28, %v1961_v25  ;;  %v1948_v17 = vsel %vm1940_vm15, 0.0, %v4032_v24 }
 0xdd3   :  { %1991 = vmax.xlane.f32.xlu0 %v1990_v34  ;;  %v1972_v45 = vsub.f32 %v3632_v8, %v2603_v49  ;;  %v1981_v63 = vmul.f32 %v1973_v53, %v1949_v40 }
 0xdd4   :  { %v2005_v26 = vsel %vm186_vm1, %v1987_v12, -inf  ;;  %v2002_v7 = vsel %vm186_vm1, %v1986_v50, -inf  ;;  %v1999_v3 = vsel %vm186_vm1, %v1985_v60, -inf }
 0xdd5   :  { %v1980_v42 = vmul.f32 %v1972_v45, %v1948_v17  ;;  %v1989_v24 = vadd.f32 %v1981_v63, %v1965_v39 }
 0xdd7   :  { %v1988_v30 = vadd.f32 %v1980_v42, %v1964_v52  ;;  %v2011_v48 = vsel %vm186_vm1, %v1989_v24, -inf }
 0xdd9   :  { %v2008_v49 = vsel %vm186_vm1, %v1988_v30, -inf }
 0xdda   :  { %2006 = vmax.xlane.f32.xlu2 %v2005_v26  ;;  %2003 = vmax.xlane.f32.xlu1 %v2002_v7 }
 0xddb   :  { %2000 = vmax.xlane.f32.xlu0 %v1999_v3 }
 0xde2   :  { %2012 = vmax.xlane.f32.xlu1 %v2011_v48 }
 0xde3   :  { %2009 = vmax.xlane.f32.xlu0 %v2008_v49 }
 0xe45   :  { %v1998_v8 = vpop.xlane.xlu2 %1997  ;;  %v1995_v46 = vpop.xlane.xlu1 %1994 }
 0xe46   :  { %v3860_v61 = vsub.f32 %v1984_v6, %v1998_v8  ;;  %v3862_v15 = vsub.f32 %v1983_v36, %v1995_v46  ;;  %v1992_v32 = vpop.xlane.xlu0 %1991 }
 0xe47   :  { %v3864_v27 = vsub.f32 %v1982_v20, %v1992_v32 }
 0xe48   :  { %v2026_v21 = vmul.f32 1.442695, %v3860_v61  ;;  %v2024_v33 = vmul.f32 1.442695, %v3862_v15 }
 0xe49   :  { %v2022_v62 = vmul.f32 1.442695, %v3864_v27 }
 0xe4a   :  { %2447 = vpow2.f32 %v2026_v21 }
 0xe4b   :  { %2449 = vpow2.f32 %v2024_v33 }
 0xe4c   :  { %2451 = vpow2.f32 %v2022_v62 }
 0xe4d   :  { %v2007_v51 = vpop.xlane.xlu2 %2006  ;;  %v2004_v37 = vpop.xlane.xlu1 %2003 }
 0xe4e   :  { %v3869_v5 = vsub.f32 %v1987_v12, %v2007_v51  ;;  %v3871_v35 = vsub.f32 %v1986_v50, %v2004_v37  ;;  %v2001_v4 = vpop.xlane.xlu0 %2000 }
 0xe4f   :  { %v3873_v0 = vsub.f32 %v1985_v60, %v2001_v4 }
 0xe50   :  { %v2448_v11 = vpop.eup %2447  ;;  %v2032_v22 = vmul.f32 1.442695, %v3869_v5  ;;  %v2030_v59 = vmul.f32 1.442695, %v3871_v35 }
 0xe51   :  { %v2450_v29 = vpop.eup %2449  ;;  %v2028_v58 = vmul.f32 1.442695, %v3873_v0  ;;  %v2044_v57 = vsel %vm186_vm1, %v2448_v11, 0.0 }
 0xe52   :  { %v2452_v9 = vpop.eup %2451  ;;  %2453 = vpow2.f32 %v2032_v22  ;;  %2045 = vadd.xlane.f32.xlu1 %v2044_v57  ;;  %v2041_v13 = vsel %vm186_vm1, %v2450_v29, 0.0 }
 0xe53   :  { %2455 = vpow2.f32 %v2030_v59  ;;  %2042 = vadd.xlane.f32.xlu0 %v2041_v13  ;;  %v2038_v18 = vsel %vm186_vm1, %v2452_v9, 0.0 }
 0xe54   :  { %2457 = vpow2.f32 %v2028_v58  ;;  %2039 = vadd.xlane.f32.xlu2 %v2038_v18 }
 0xe55   :  { %v2013_v38 = vpop.xlane.xlu1 %2012 }
 0xe56   :  { %v3881_v31 = vsub.f32 %v1989_v24, %v2013_v38  ;;  %v2010_v1 = vpop.xlane.xlu0 %2009 }
 0xe57   :  { %v3883_v41 = vsub.f32 %v1988_v30, %v2010_v1 }
 0xe58   :  { %v2454_v6 = vpop.eup %2453  ;;  %v2036_v36 = vmul.f32 1.442695, %v3881_v31 }
 0xe59   :  { %v2456_v20 = vpop.eup %2455  ;;  %v2034_v16 = vmul.f32 1.442695, %v3883_v41  ;;  %v2053_v10 = vsel %vm186_vm1, %v2454_v6, 0.0 }
 0xe5a   :  { %v2458_v23 = vpop.eup %2457  ;;  %2459 = vpow2.f32 %v2036_v36  ;;  %2054 = vadd.xlane.f32.xlu1 %v2053_v10  ;;  %v2050_v43 = vsel %vm186_vm1, %v2456_v20, 0.0 }
 0xe5b   :  { %2461 = vpow2.f32 %v2034_v16  ;;  %2051 = vadd.xlane.f32.xlu0 %v2050_v43  ;;  %v2047_v47 = vsel %vm186_vm1, %v2458_v23, 0.0 }
 0xe5c   :  { %2048 = vadd.xlane.f32.xlu2 %v2047_v47 }
 0xe60   :  { %v2460_v19 = vpop.eup %2459 }
 0xe61   :  { %v2462_v34 = vpop.eup %2461  ;;  %v2059_v54 = vsel %vm186_vm1, %v2460_v19, 0.0 }
 0xe62   :  { %v2056_v14 = vsel %vm186_vm1, %v2462_v34, 0.0 }
 0xe63   :  { %2060 = vadd.xlane.f32.xlu0 %v2059_v54 }
 0xe64   :  { %2057 = vadd.xlane.f32.xlu2 %v2056_v14 }
 0xec5   :  { %v2046_v28 = vpop.xlane.xlu1 %2045 }
 0xec6   :  { %2463 = vlog2.f32 %v2046_v28  ;;  %v2043_v56 = vpop.xlane.xlu0 %2042 }
 0xec7   :  { %v2040_v55 = vpop.xlane.xlu2 %2039  ;;  %2465 = vlog2.f32 %v2043_v56 }
 0xec8   :  { %2467 = vlog2.f32 %v2040_v55 }
 0xecc   :  { %v2464_v25 = vpop.eup %2463 }
 0xecd   :  { %v2466_v12 = vpop.eup %2465  ;;  %v2067_v50 = vmul.f32 0.6931472, %v2464_v25  ;;  %v2055_v60 = vpop.xlane.xlu1 %2054 }
 0xece   :  { %v2468_v40 = vpop.eup %2467  ;;  %v2065_v2 = vmul.f32 0.6931472, %v2466_v12  ;;  %2469 = vlog2.f32 %v2055_v60  ;;  %v2052_v53 = vpop.xlane.xlu0 %2051 }
 0xecf   :  { %v2080_v17 = vsub.f32 %v3860_v61, %v2067_v50  ;;  %v2063_v44 = vmul.f32 0.6931472, %v2468_v40  ;;  %v2049_v45 = vpop.xlane.xlu2 %2048  ;;  %2471 = vlog2.f32 %v2052_v53 }
 0xed0   :  { %v2079_v26 = vsub.f32 %v3862_v15, %v2065_v2  ;;  %2473 = vlog2.f32 %v2049_v45 }
 0xed1   :  { %2088 = vst.msk [vmem:[%s3938_s6 + $0x10] sm:$0xff] %vm186_vm1, %v2080_v17  ;;  %v2078_v7 = vsub.f32 %v3864_v27, %v2063_v44 }
 0xed2   :  { %2087 = vst.msk [vmem:[%s3938_s6 + $0x8] sm:$0xff] %vm186_vm1, %v2079_v26 }
 0xed3   :  { %2086 = vst.msk [vmem:[%s3938_s6] sm:$0xff] %vm186_vm1, %v2078_v7 }
 0xed4   :  { %v2470_v63 = vpop.eup %2469 }
 0xed5   :  { %v2472_v3 = vpop.eup %2471  ;;  %v2073_v42 = vmul.f32 0.6931472, %v2470_v63 }
 0xed6   :  { %v2474_v39 = vpop.eup %2473  ;;  %v2071_v52 = vmul.f32 0.6931472, %v2472_v3  ;;  %v2061_v24 = vpop.xlane.xlu0 %2060 }
 0xed7   :  { %v2083_v30 = vsub.f32 %v3869_v5, %v2073_v42  ;;  %v2069_v48 = vmul.f32 0.6931472, %v2474_v39  ;;  %v2058_v49 = vpop.xlane.xlu2 %2057  ;;  %2475 = vlog2.f32 %v2061_v24 }
 0xed8   :  { %v2082_v8 = vsub.f32 %v3871_v35, %v2071_v52  ;;  %2477 = vlog2.f32 %v2058_v49 }
 0xed9   :  { %2091 = vst.msk [vmem:[%s3938_s6 + $0x28] sm:$0xff] %vm186_vm1, %v2083_v30  ;;  %v2081_v46 = vsub.f32 %v3873_v0, %v2069_v48 }
 0xeda   :  { %2090 = vst.msk [vmem:[%s3938_s6 + $0x20] sm:$0xff] %vm186_vm1, %v2082_v8 }
 0xedb   :  { %2089 = vst.msk [vmem:[%s3938_s6 + $0x18] sm:$0xff] %vm186_vm1, %v2081_v46 }
 0xedd   :  { %v2476_v61 = vpop.eup %2475 }
 0xede   :  { %v2478_v15 = vpop.eup %2477  ;;  %v2077_v32 = vmul.f32 0.6931472, %v2476_v61 }
 0xedf   :  { %v2075_v27 = vmul.f32 0.6931472, %v2478_v15 }
 0xee0   :  { %v2085_v21 = vsub.f32 %v3881_v31, %v2077_v32 }
 0xee1   :  { %v2084_v33 = vsub.f32 %v3883_v41, %v2075_v27 }
 0xee2   :  { %2093 = vst.msk [vmem:[%s3938_s6 + $0x38] sm:$0xff] %vm186_vm1, %v2085_v21 }
 0xee3   :  { %2092 = vst.msk [vmem:[%s3938_s6 + $0x30] sm:$0xff] %vm186_vm1, %v2084_v33 }

</bundles_post_ra>
